<compile_context>
chip_gen: v7x
topology: tpu7x:2x2x1
jax: 0.10.0
libtpu: 0.0.40
codegen_flags: <defaults>
</compile_context>

<pallas_src>
import functools

import jax
import jax.numpy as jnp
import numpy as np
from jax.experimental import pallas as pl
from jax.experimental.pallas import tpu as pltpu


# ---------------------------------------------------------------------------
# Static helpers (run at trace time)
# ---------------------------------------------------------------------------

def _stage_dims_from(params, H, W):
    """Per-stage (Hin, Win, Cin, Cout) derived from the conv weight shapes."""
    dims = []
    h, w = H, W
    for (wgt, _) in params:
        cout, cin, _, _ = wgt.shape
        dims.append((h, w, cin, cout))
        h, w = h // 2, w // 2
    return dims


def _conv_weight_blocks(w_oihw):
    """PyTorch OIHW (Cout, Cin, 4, 4) -> (4, 4*Cin, Cout).

    Leading index ab = 2*a + b selects the 2x2 sub-kernel offset; rows are
    ordered (ph, pw, cin) to match the space-to-depth lane order.
    """
    cout, cin, _, _ = w_oihw.shape
    w_r = jnp.transpose(w_oihw, (2, 3, 1, 0))            # (kh, kw, cin, cout)
    blocks = []
    for a in (0, 1):
        for b in (0, 1):
            blk = w_r[2 * a:2 * a + 2, 2 * b:2 * b + 2]  # (ph, pw, cin, cout)
            blocks.append(blk.reshape(4 * cin, cout))
    return jnp.stack(blocks, axis=0)


def _routing_matrices(Ho, Wo, Cout):
    """Exact 0/1 matrices realizing 'pad(1) + space-to-depth' of the stage
    output on the MXU.

    T[p] : (Ip*Jp, Ho*Wo)  routes conv-output rows (row-major oh*Wo+ow) to the
                           padded half-resolution grid (zero rows = padding).
    E[p] : (Cout, 4*Cout)  places the Cout channels into lane block p=2*ph+pw.
    """
    Ip, Jp = Ho // 2 + 1, Wo // 2 + 1
    T = np.zeros((4, Ip * Jp, Ho * Wo), np.float32)
    E = np.zeros((4, Cout, 4 * Cout), np.float32)
    for ph in (0, 1):
        for pw in (0, 1):
            p = 2 * ph + pw
            for i in range(Ip):
                for j in range(Jp):
                    oh, ow = 2 * i + ph - 1, 2 * j + pw - 1
                    if 0 <= oh < Ho and 0 <= ow < Wo:
                        T[p, i * Jp + j, oh * Wo + ow] = 1.0
            E[p, :, p * Cout:(p + 1) * Cout] = np.eye(Cout, dtype=np.float32)
    return T, E


def _const_index_map(ndim, n):
    return (0,) * ndim


def _sample_index_map(n):
    return (n, 0, 0, 0)


# ---------------------------------------------------------------------------
# Fused kernel
# ---------------------------------------------------------------------------

def _make_kernel(stage_dims):
    n_stages = len(stage_dims)

    def kernel(*refs):
        it = iter(refs)
        a_in = next(it)                       # space-to-depth padded input
        stage_refs = []
        for s in range(n_stages):
            w_ref, bias_ref = next(it), next(it)
            if s < n_stages - 1:
                t_ref, e_ref = next(it), next(it)
            else:
                t_ref = e_ref = None
            stage_refs.append((w_ref, bias_ref, t_ref, e_ref))
        o_ref = next(it)
        scratch = list(it)                    # next-stage activation buffers

        cur = a_in
        for s in range(n_stages):
            Hin, Win, Cin, Cout = stage_dims[s]
            Ho, Wo = Hin // 2, Win // 2
            P = Ho * Wo
            w_ref, bias_ref, t_ref, e_ref = stage_refs[s]

            # --- 4x4 stride-2 conv == 4 MXU matmuls over space-to-depth input
            acc = None
            for a in (0, 1):
                for b in (0, 1):
                    lhs = cur[:, a:a + Ho, b:b + Wo, :].reshape(P, 4 * Cin)
                    term = jnp.dot(lhs, w_ref[2 * a + b],
                                   preferred_element_type=jnp.float32)
                    acc = term if acc is None else acc + term
            y = acc + bias_ref[...]                       # (P, Cout)

            if s == n_stages - 1:
                o_ref[...] = y.reshape(1, 1, 1, 1)
            else:
                y = jnp.where(y >= 0.0, y, 0.2 * y)       # LeakyReLU(0.2)
                # --- exact routing matmuls: pad(1) + space-to-depth in VMEM
                nxt = scratch[s]
                _, Ipn, Jpn, lane = nxt.shape
                v = None
                for p in range(4):
                    placed = jnp.dot(y, e_ref[p],
                                     preferred_element_type=jnp.float32)
                    routed = jnp.dot(t_ref[p], placed,
                                     preferred_element_type=jnp.float32)
                    v = routed if v is None else v + routed
                nxt[...] = v.reshape(1, Ipn, Jpn, lane)   # single full store
                cur = nxt

    return kernel


# ---------------------------------------------------------------------------
# Wrapper
# ---------------------------------------------------------------------------

def discriminator_forward(params, x_nchw):
    """Forward pass of FCDiscriminator; input NCHW, output (N, 1, H/32, W/32)."""
    N, C0, H, W = x_nchw.shape
    stage_dims = _stage_dims_from(params, H, W)
    n_stages = len(stage_dims)

    # One-time input layout plumbing: NCHW -> NHWC -> pad(1) -> space-to-depth.
    x = jnp.transpose(x_nchw, (0, 2, 3, 1))
    xp = jnp.pad(x, ((0, 0), (1, 1), (1, 1), (0, 0)))
    Ip, Jp = (H + 2) // 2, (W + 2) // 2
    a1 = xp.reshape(N, Ip, 2, Jp, 2, C0).transpose(0, 1, 3, 2, 4, 5)
    a1 = a1.reshape(N, Ip, Jp, 4 * C0)

    args = [a1]
    scratch_shapes = []
    flops = 0
    for s, (Hin, Win, Cin, Cout) in enumerate(stage_dims):
        wgt, bias = params[s]
        args.append(_conv_weight_blocks(wgt))
        args.append(bias.reshape(1, Cout).astype(jnp.float32))
        Ho, Wo = Hin // 2, Win // 2
        flops += 2 * Ho * Wo * 16 * Cin * Cout
        if s < n_stages - 1:
            T, E = _routing_matrices(Ho, Wo, Cout)
            args.append(jnp.asarray(T))
            args.append(jnp.asarray(E))
            Ipn, Jpn = Ho // 2 + 1, Wo // 2 + 1
            scratch_shapes.append(
                pltpu.VMEM((1, Ipn, Jpn, 4 * Cout), jnp.float32))
            flops += 2 * 4 * (Ho * Wo * Cout * 4 * Cout
                              + Ipn * Jpn * Ho * Wo * 4 * Cout)

    in_specs = [pl.BlockSpec((1, Ip, Jp, 4 * C0), _sample_index_map)]
    for arr in args[1:]:
        in_specs.append(
            pl.BlockSpec(arr.shape, functools.partial(_const_index_map, arr.ndim)))

    bytes_accessed = int(sum(int(np.prod(a.shape)) * 4 for a in args) + N * 4)

    grid_spec = pltpu.PrefetchScalarGridSpec(
        num_scalar_prefetch=0,
        grid=(N,),
        in_specs=in_specs,
        out_specs=pl.BlockSpec((1, 1, 1, 1), _sample_index_map),
        scratch_shapes=scratch_shapes,
    )

    out = pl.pallas_call(
        _make_kernel(stage_dims),
        out_shape=jax.ShapeDtypeStruct((N, 1, 1, 1), jnp.float32),
        grid_spec=grid_spec,
        compiler_params=pltpu.CompilerParams(
            dimension_semantics=("parallel",)),
        cost_estimate=pl.CostEstimate(flops=int(N * flops),
                                      transcendentals=0,
                                      bytes_accessed=bytes_accessed),
    )(*args)
    # Output is 1x1 spatial, so NHWC == NCHW here.
    return out


# ---------------------------------------------------------------------------
# Parameters (PyTorch nn.Conv2d layout) and pure-JAX reference
# ---------------------------------------------------------------------------

def init_params(key, num_classes, ndf):
    layer_channels = [(num_classes, ndf), (ndf, ndf * 2), (ndf * 2, ndf * 4),
                      (ndf * 4, ndf * 8), (ndf * 8, 1)]
    params = []
    for cin, cout in layer_channels:
        key, kw, kb = jax.random.split(key, 3)
        scale = 1.0 / np.sqrt(cin * 16)
        w = jax.random.normal(kw, (cout, cin, 4, 4), jnp.float32) * scale
        b = jax.random.normal(kb, (cout,), jnp.float32) * 0.1
        params.append((w, b))
    return params


def ref_forward(params, x_nchw):
    x = x_nchw
    n = len(params)
    for i, (w, b) in enumerate(params):
        x = jax.lax.conv_general_dilated(
            x, w, window_strides=(2, 2), padding=((1, 1), (1, 1)),
            dimension_numbers=("NCHW", "OIHW", "NCHW"),
            precision=jax.lax.Precision.HIGHEST) + b[None, :, None, None]
        if i < n - 1:
            x = jnp.where(x >= 0, x, 0.2 * x)
    return x


if __name__ == "__main__":
    # 5 stride-2 convs => smallest valid spatial size is 32 (as in PyTorch).
    num_classes, ndf = 4, 8
    N, H, W = 2, 32, 32

    key = jax.random.PRNGKey(0)
    kx, kp = jax.random.split(key)
    x = jax.random.normal(kx, (N, num_classes, H, W), jnp.float32)
    params = init_params(kp, num_classes, ndf)

    out = jax.jit(discriminator_forward)(params, x)
    out = jax.block_until_ready(out)
    assert out.shape == (N, 1, 1, 1), out.shape

    ref = ref_forward(params, x)
    np.testing.assert_allclose(np.asarray(out), np.asarray(ref),
                               rtol=1e-3, atol=1e-3)
    print("KERNEL_OK")
</pallas_src>

<mosaic_0001>
module attributes {stable_mosaic.version = 11 : i64} {
  func.func @kernel(%arg0: i32, %arg1: memref<1x17x17x16xf32, #tpu.memory_space<vmem>>, %arg2: memref<4x16x8xf32, #tpu.memory_space<vmem>>, %arg3: memref<1x8xf32, #tpu.memory_space<vmem>>, %arg4: memref<4x81x256xf32, #tpu.memory_space<vmem>>, %arg5: memref<4x8x32xf32, #tpu.memory_space<vmem>>, %arg6: memref<4x32x16xf32, #tpu.memory_space<vmem>>, %arg7: memref<1x16xf32, #tpu.memory_space<vmem>>, %arg8: memref<4x25x64xf32, #tpu.memory_space<vmem>>, %arg9: memref<4x16x64xf32, #tpu.memory_space<vmem>>, %arg10: memref<4x64x32xf32, #tpu.memory_space<vmem>>, %arg11: memref<1x32xf32, #tpu.memory_space<vmem>>, %arg12: memref<4x9x16xf32, #tpu.memory_space<vmem>>, %arg13: memref<4x32x128xf32, #tpu.memory_space<vmem>>, %arg14: memref<4x128x64xf32, #tpu.memory_space<vmem>>, %arg15: memref<1x64xf32, #tpu.memory_space<vmem>>, %arg16: memref<4x4x4xf32, #tpu.memory_space<vmem>>, %arg17: memref<4x64x256xf32, #tpu.memory_space<vmem>>, %arg18: memref<4x256x1xf32, #tpu.memory_space<vmem>>, %arg19: memref<1x1xf32, #tpu.memory_space<vmem>>, %arg20: memref<1x1x1x1xf32, #tpu.memory_space<vmem>>, %arg21: memref<1x9x9x32xf32, #tpu.memory_space<vmem>>, %arg22: memref<1x5x5x64xf32, #tpu.memory_space<vmem>>, %arg23: memref<1x3x3x128xf32, #tpu.memory_space<vmem>>, %arg24: memref<1x2x2x256xf32, #tpu.memory_space<vmem>>) attributes {dimension_semantics = [#tpu.dimension_semantics<parallel>], iteration_bounds = array<i64: 2>, scalar_prefetch = 0 : i64, scratch_operands = 4 : i64, tpu.core_type = #tpu.core_type<tc>, window_params = [{transform_indices = @transform_0, window_bounds = array<i64: 1, 17, 17, 16>}, {pipeline_mode = #tpu.pipeline_mode<synchronous>, transform_indices = @transform_1, window_bounds = array<i64: 4, 16, 8>}, {pipeline_mode = #tpu.pipeline_mode<synchronous>, transform_indices = @transform_2, window_bounds = array<i64: 1, 8>}, {pipeline_mode = #tpu.pipeline_mode<synchronous>, transform_indices = @transform_3, window_bounds = array<i64: 4, 81, 256>}, {pipeline_mode = #tpu.pipeline_mode<synchronous>, transform_indices = @transform_4, window_bounds = array<i64: 4, 8, 32>}, {pipeline_mode = #tpu.pipeline_mode<synchronous>, transform_indices = @transform_5, window_bounds = array<i64: 4, 32, 16>}, {pipeline_mode = #tpu.pipeline_mode<synchronous>, transform_indices = @transform_6, window_bounds = array<i64: 1, 16>}, {pipeline_mode = #tpu.pipeline_mode<synchronous>, transform_indices = @transform_7, window_bounds = array<i64: 4, 25, 64>}, {pipeline_mode = #tpu.pipeline_mode<synchronous>, transform_indices = @transform_8, window_bounds = array<i64: 4, 16, 64>}, {pipeline_mode = #tpu.pipeline_mode<synchronous>, transform_indices = @transform_9, window_bounds = array<i64: 4, 64, 32>}, {pipeline_mode = #tpu.pipeline_mode<synchronous>, transform_indices = @transform_10, window_bounds = array<i64: 1, 32>}, {pipeline_mode = #tpu.pipeline_mode<synchronous>, transform_indices = @transform_11, window_bounds = array<i64: 4, 9, 16>}, {pipeline_mode = #tpu.pipeline_mode<synchronous>, transform_indices = @transform_12, window_bounds = array<i64: 4, 32, 128>}, {pipeline_mode = #tpu.pipeline_mode<synchronous>, transform_indices = @transform_13, window_bounds = array<i64: 4, 128, 64>}, {pipeline_mode = #tpu.pipeline_mode<synchronous>, transform_indices = @transform_14, window_bounds = array<i64: 1, 64>}, {pipeline_mode = #tpu.pipeline_mode<synchronous>, transform_indices = @transform_15, window_bounds = array<i64: 4, 4, 4>}, {pipeline_mode = #tpu.pipeline_mode<synchronous>, transform_indices = @transform_16, window_bounds = array<i64: 4, 64, 256>}, {pipeline_mode = #tpu.pipeline_mode<synchronous>, transform_indices = @transform_17, window_bounds = array<i64: 4, 256, 1>}, {pipeline_mode = #tpu.pipeline_mode<synchronous>, transform_indices = @transform_18, window_bounds = array<i64: 1, 1>}, {transform_indices = @transform_19, window_bounds = array<i64: 1, 1, 1, 1>}]} {
    %c0 = arith.constant 0 : index
    %c0_0 = arith.constant 0 : index
    %c0_1 = arith.constant 0 : index
    %c0_2 = arith.constant 0 : index
    %0 = vector.load %arg1[%c0, %c0_0, %c0_1, %c0_2] : memref<1x17x17x16xf32, #tpu.memory_space<vmem>>, vector<1x16x16x16xf32>
    %1 = vector.shape_cast %0 : vector<1x16x16x16xf32> to vector<256x16xf32>
    %c0_3 = arith.constant 0 : index
    %c0_4 = arith.constant 0 : index
    %c0_5 = arith.constant 0 : index
    %2 = vector.load %arg2[%c0_3, %c0_4, %c0_5] : memref<4x16x8xf32, #tpu.memory_space<vmem>>, vector<1x16x8xf32>
    %3 = vector.shape_cast %2 : vector<1x16x8xf32> to vector<16x8xf32>
    %cst = arith.constant dense<0.000000e+00> : vector<256x8xf32>
    %4 = tpu.matmul %1, %3, %cst {dimension_numbers = #tpu.dot_dimension_numbers<[1], [0], [0], [1], [0, 0, 1, 1], [], []>} : vector<256x16xf32>, vector<16x8xf32>, vector<256x8xf32> -> vector<256x8xf32>
    %c0_6 = arith.constant 0 : index
    %c0_7 = arith.constant 0 : index
    %c1 = arith.constant 1 : index
    %c0_8 = arith.constant 0 : index
    %5 = vector.load %arg1[%c0_6, %c0_7, %c1, %c0_8] : memref<1x17x17x16xf32, #tpu.memory_space<vmem>>, vector<1x16x16x16xf32>
    %6 = vector.shape_cast %5 : vector<1x16x16x16xf32> to vector<256x16xf32>
    %c1_9 = arith.constant 1 : index
    %c0_10 = arith.constant 0 : index
    %c0_11 = arith.constant 0 : index
    %7 = vector.load %arg2[%c1_9, %c0_10, %c0_11] : memref<4x16x8xf32, #tpu.memory_space<vmem>>, vector<1x16x8xf32>
    %8 = vector.shape_cast %7 : vector<1x16x8xf32> to vector<16x8xf32>
    %cst_12 = arith.constant dense<0.000000e+00> : vector<256x8xf32>
    %9 = tpu.matmul %6, %8, %cst_12 {dimension_numbers = #tpu.dot_dimension_numbers<[1], [0], [0], [1], [0, 0, 1, 1], [], []>} : vector<256x16xf32>, vector<16x8xf32>, vector<256x8xf32> -> vector<256x8xf32>
    %10 = arith.addf %4, %9 : vector<256x8xf32>
    %c0_13 = arith.constant 0 : index
    %c1_14 = arith.constant 1 : index
    %c0_15 = arith.constant 0 : index
    %c0_16 = arith.constant 0 : index
    %11 = vector.load %arg1[%c0_13, %c1_14, %c0_15, %c0_16] : memref<1x17x17x16xf32, #tpu.memory_space<vmem>>, vector<1x16x16x16xf32>
    %12 = vector.shape_cast %11 : vector<1x16x16x16xf32> to vector<256x16xf32>
    %c2 = arith.constant 2 : index
    %c0_17 = arith.constant 0 : index
    %c0_18 = arith.constant 0 : index
    %13 = vector.load %arg2[%c2, %c0_17, %c0_18] : memref<4x16x8xf32, #tpu.memory_space<vmem>>, vector<1x16x8xf32>
    %14 = vector.shape_cast %13 : vector<1x16x8xf32> to vector<16x8xf32>
    %cst_19 = arith.constant dense<0.000000e+00> : vector<256x8xf32>
    %15 = tpu.matmul %12, %14, %cst_19 {dimension_numbers = #tpu.dot_dimension_numbers<[1], [0], [0], [1], [0, 0, 1, 1], [], []>} : vector<256x16xf32>, vector<16x8xf32>, vector<256x8xf32> -> vector<256x8xf32>
    %16 = arith.addf %10, %15 : vector<256x8xf32>
    %c0_20 = arith.constant 0 : index
    %c1_21 = arith.constant 1 : index
    %c1_22 = arith.constant 1 : index
    %c0_23 = arith.constant 0 : index
    %17 = vector.load %arg1[%c0_20, %c1_21, %c1_22, %c0_23] : memref<1x17x17x16xf32, #tpu.memory_space<vmem>>, vector<1x16x16x16xf32>
    %18 = vector.shape_cast %17 : vector<1x16x16x16xf32> to vector<256x16xf32>
    %c3 = arith.constant 3 : index
    %c0_24 = arith.constant 0 : index
    %c0_25 = arith.constant 0 : index
    %19 = vector.load %arg2[%c3, %c0_24, %c0_25] : memref<4x16x8xf32, #tpu.memory_space<vmem>>, vector<1x16x8xf32>
    %20 = vector.shape_cast %19 : vector<1x16x8xf32> to vector<16x8xf32>
    %cst_26 = arith.constant dense<0.000000e+00> : vector<256x8xf32>
    %21 = tpu.matmul %18, %20, %cst_26 {dimension_numbers = #tpu.dot_dimension_numbers<[1], [0], [0], [1], [0, 0, 1, 1], [], []>} : vector<256x16xf32>, vector<16x8xf32>, vector<256x8xf32> -> vector<256x8xf32>
    %22 = arith.addf %16, %21 : vector<256x8xf32>
    %c0_27 = arith.constant 0 : index
    %c0_28 = arith.constant 0 : index
    %23 = vector.load %arg3[%c0_27, %c0_28] : memref<1x8xf32, #tpu.memory_space<vmem>>, vector<1x8xf32>
    %24 = vector.broadcast %23 : vector<1x8xf32> to vector<256x8xf32>
    %25 = arith.addf %22, %24 : vector<256x8xf32>
    %cst_29 = arith.constant 0.000000e+00 : f32
    %26 = vector.broadcast %cst_29 : f32 to vector<256x8xf32>
    %27 = arith.cmpf oge, %25, %26 : vector<256x8xf32>
    %cst_30 = arith.constant 2.000000e-01 : f32
    %28 = vector.broadcast %cst_30 : f32 to vector<256x8xf32>
    %29 = arith.mulf %28, %25 : vector<256x8xf32>
    %30 = arith.select %27, %25, %29 : vector<256x8xi1>, vector<256x8xf32>
    %c0_31 = arith.constant 0 : index
    %c0_32 = arith.constant 0 : index
    %c0_33 = arith.constant 0 : index
    %31 = vector.load %arg5[%c0_31, %c0_32, %c0_33] : memref<4x8x32xf32, #tpu.memory_space<vmem>>, vector<1x8x32xf32>
    %32 = vector.shape_cast %31 : vector<1x8x32xf32> to vector<8x32xf32>
    %cst_34 = arith.constant dense<0.000000e+00> : vector<256x32xf32>
    %33 = tpu.matmul %30, %32, %cst_34 {dimension_numbers = #tpu.dot_dimension_numbers<[1], [0], [0], [1], [0, 0, 1, 1], [], []>} : vector<256x8xf32>, vector<8x32xf32>, vector<256x32xf32> -> vector<256x32xf32>
    %c0_35 = arith.constant 0 : index
    %c0_36 = arith.constant 0 : index
    %c0_37 = arith.constant 0 : index
    %34 = vector.load %arg4[%c0_35, %c0_36, %c0_37] : memref<4x81x256xf32, #tpu.memory_space<vmem>>, vector<1x81x256xf32>
    %35 = vector.shape_cast %34 : vector<1x81x256xf32> to vector<81x256xf32>
    %cst_38 = arith.constant dense<0.000000e+00> : vector<81x32xf32>
    %36 = tpu.matmul %35, %33, %cst_38 {dimension_numbers = #tpu.dot_dimension_numbers<[1], [0], [0], [1], [0, 0, 1, 1], [], []>} : vector<81x256xf32>, vector<256x32xf32>, vector<81x32xf32> -> vector<81x32xf32>
    %c1_39 = arith.constant 1 : index
    %c0_40 = arith.constant 0 : index
    %c0_41 = arith.constant 0 : index
    %37 = vector.load %arg5[%c1_39, %c0_40, %c0_41] : memref<4x8x32xf32, #tpu.memory_space<vmem>>, vector<1x8x32xf32>
    %38 = vector.shape_cast %37 : vector<1x8x32xf32> to vector<8x32xf32>
    %cst_42 = arith.constant dense<0.000000e+00> : vector<256x32xf32>
    %39 = tpu.matmul %30, %38, %cst_42 {dimension_numbers = #tpu.dot_dimension_numbers<[1], [0], [0], [1], [0, 0, 1, 1], [], []>} : vector<256x8xf32>, vector<8x32xf32>, vector<256x32xf32> -> vector<256x32xf32>
    %c1_43 = arith.constant 1 : index
    %c0_44 = arith.constant 0 : index
    %c0_45 = arith.constant 0 : index
    %40 = vector.load %arg4[%c1_43, %c0_44, %c0_45] : memref<4x81x256xf32, #tpu.memory_space<vmem>>, vector<1x81x256xf32>
    %41 = vector.shape_cast %40 : vector<1x81x256xf32> to vector<81x256xf32>
    %cst_46 = arith.constant dense<0.000000e+00> : vector<81x32xf32>
    %42 = tpu.matmul %41, %39, %cst_46 {dimension_numbers = #tpu.dot_dimension_numbers<[1], [0], [0], [1], [0, 0, 1, 1], [], []>} : vector<81x256xf32>, vector<256x32xf32>, vector<81x32xf32> -> vector<81x32xf32>
    %43 = arith.addf %36, %42 : vector<81x32xf32>
    %c2_47 = arith.constant 2 : index
    %c0_48 = arith.constant 0 : index
    %c0_49 = arith.constant 0 : index
    %44 = vector.load %arg5[%c2_47, %c0_48, %c0_49] : memref<4x8x32xf32, #tpu.memory_space<vmem>>, vector<1x8x32xf32>
    %45 = vector.shape_cast %44 : vector<1x8x32xf32> to vector<8x32xf32>
    %cst_50 = arith.constant dense<0.000000e+00> : vector<256x32xf32>
    %46 = tpu.matmul %30, %45, %cst_50 {dimension_numbers = #tpu.dot_dimension_numbers<[1], [0], [0], [1], [0, 0, 1, 1], [], []>} : vector<256x8xf32>, vector<8x32xf32>, vector<256x32xf32> -> vector<256x32xf32>
    %c2_51 = arith.constant 2 : index
    %c0_52 = arith.constant 0 : index
    %c0_53 = arith.constant 0 : index
    %47 = vector.load %arg4[%c2_51, %c0_52, %c0_53] : memref<4x81x256xf32, #tpu.memory_space<vmem>>, vector<1x81x256xf32>
    %48 = vector.shape_cast %47 : vector<1x81x256xf32> to vector<81x256xf32>
    %cst_54 = arith.constant dense<0.000000e+00> : vector<81x32xf32>
    %49 = tpu.matmul %48, %46, %cst_54 {dimension_numbers = #tpu.dot_dimension_numbers<[1], [0], [0], [1], [0, 0, 1, 1], [], []>} : vector<81x256xf32>, vector<256x32xf32>, vector<81x32xf32> -> vector<81x32xf32>
    %50 = arith.addf %43, %49 : vector<81x32xf32>
    %c3_55 = arith.constant 3 : index
    %c0_56 = arith.constant 0 : index
    %c0_57 = arith.constant 0 : index
    %51 = vector.load %arg5[%c3_55, %c0_56, %c0_57] : memref<4x8x32xf32, #tpu.memory_space<vmem>>, vector<1x8x32xf32>
    %52 = vector.shape_cast %51 : vector<1x8x32xf32> to vector<8x32xf32>
    %cst_58 = arith.constant dense<0.000000e+00> : vector<256x32xf32>
    %53 = tpu.matmul %30, %52, %cst_58 {dimension_numbers = #tpu.dot_dimension_numbers<[1], [0], [0], [1], [0, 0, 1, 1], [], []>} : vector<256x8xf32>, vector<8x32xf32>, vector<256x32xf32> -> vector<256x32xf32>
    %c3_59 = arith.constant 3 : index
    %c0_60 = arith.constant 0 : index
    %c0_61 = arith.constant 0 : index
    %54 = vector.load %arg4[%c3_59, %c0_60, %c0_61] : memref<4x81x256xf32, #tpu.memory_space<vmem>>, vector<1x81x256xf32>
    %55 = vector.shape_cast %54 : vector<1x81x256xf32> to vector<81x256xf32>
    %cst_62 = arith.constant dense<0.000000e+00> : vector<81x32xf32>
    %56 = tpu.matmul %55, %53, %cst_62 {dimension_numbers = #tpu.dot_dimension_numbers<[1], [0], [0], [1], [0, 0, 1, 1], [], []>} : vector<81x256xf32>, vector<256x32xf32>, vector<81x32xf32> -> vector<81x32xf32>
    %57 = arith.addf %50, %56 : vector<81x32xf32>
    %58 = vector.shape_cast %57 : vector<81x32xf32> to vector<1x9x9x32xf32>
    %c0_63 = arith.constant 0 : index
    %c0_64 = arith.constant 0 : index
    %c0_65 = arith.constant 0 : index
    %c0_66 = arith.constant 0 : index
    %59 = vector.load %arg21[%c0_63, %c0_64, %c0_65, %c0_66] : memref<1x9x9x32xf32, #tpu.memory_space<vmem>>, vector<1x9x9x32xf32>
    tpu.vector_store %arg21[%c0_63, %c0_64, %c0_65, %c0_66], %58 {strides = array<i32>} : memref<1x9x9x32xf32, #tpu.memory_space<vmem>>, vector<1x9x9x32xf32>,
    %c0_67 = arith.constant 0 : index
    %c0_68 = arith.constant 0 : index
    %c0_69 = arith.constant 0 : index
    %c0_70 = arith.constant 0 : index
    %60 = vector.load %arg21[%c0_67, %c0_68, %c0_69, %c0_70] : memref<1x9x9x32xf32, #tpu.memory_space<vmem>>, vector<1x8x8x32xf32>
    %61 = vector.shape_cast %60 : vector<1x8x8x32xf32> to vector<64x32xf32>
    %c0_71 = arith.constant 0 : index
    %c0_72 = arith.constant 0 : index
    %c0_73 = arith.constant 0 : index
    %62 = vector.load %arg6[%c0_71, %c0_72, %c0_73] : memref<4x32x16xf32, #tpu.memory_space<vmem>>, vector<1x32x16xf32>
    %63 = vector.shape_cast %62 : vector<1x32x16xf32> to vector<32x16xf32>
    %cst_74 = arith.constant dense<0.000000e+00> : vector<64x16xf32>
    %64 = tpu.matmul %61, %63, %cst_74 {dimension_numbers = #tpu.dot_dimension_numbers<[1], [0], [0], [1], [0, 0, 1, 1], [], []>} : vector<64x32xf32>, vector<32x16xf32>, vector<64x16xf32> -> vector<64x16xf32>
    %c0_75 = arith.constant 0 : index
    %c0_76 = arith.constant 0 : index
    %c1_77 = arith.constant 1 : index
    %c0_78 = arith.constant 0 : index
    %65 = vector.load %arg21[%c0_75, %c0_76, %c1_77, %c0_78] : memref<1x9x9x32xf32, #tpu.memory_space<vmem>>, vector<1x8x8x32xf32>
    %66 = vector.shape_cast %65 : vector<1x8x8x32xf32> to vector<64x32xf32>
    %c1_79 = arith.constant 1 : index
    %c0_80 = arith.constant 0 : index
    %c0_81 = arith.constant 0 : index
    %67 = vector.load %arg6[%c1_79, %c0_80, %c0_81] : memref<4x32x16xf32, #tpu.memory_space<vmem>>, vector<1x32x16xf32>
    %68 = vector.shape_cast %67 : vector<1x32x16xf32> to vector<32x16xf32>
    %cst_82 = arith.constant dense<0.000000e+00> : vector<64x16xf32>
    %69 = tpu.matmul %66, %68, %cst_82 {dimension_numbers = #tpu.dot_dimension_numbers<[1], [0], [0], [1], [0, 0, 1, 1], [], []>} : vector<64x32xf32>, vector<32x16xf32>, vector<64x16xf32> -> vector<64x16xf32>
    %70 = arith.addf %64, %69 : vector<64x16xf32>
    %c0_83 = arith.constant 0 : index
    %c1_84 = arith.constant 1 : index
    %c0_85 = arith.constant 0 : index
    %c0_86 = arith.constant 0 : index
    %71 = vector.load %arg21[%c0_83, %c1_84, %c0_85, %c0_86] : memref<1x9x9x32xf32, #tpu.memory_space<vmem>>, vector<1x8x8x32xf32>
    %72 = vector.shape_cast %71 : vector<1x8x8x32xf32> to vector<64x32xf32>
    %c2_87 = arith.constant 2 : index
    %c0_88 = arith.constant 0 : index
    %c0_89 = arith.constant 0 : index
    %73 = vector.load %arg6[%c2_87, %c0_88, %c0_89] : memref<4x32x16xf32, #tpu.memory_space<vmem>>, vector<1x32x16xf32>
    %74 = vector.shape_cast %73 : vector<1x32x16xf32> to vector<32x16xf32>
    %cst_90 = arith.constant dense<0.000000e+00> : vector<64x16xf32>
    %75 = tpu.matmul %72, %74, %cst_90 {dimension_numbers = #tpu.dot_dimension_numbers<[1], [0], [0], [1], [0, 0, 1, 1], [], []>} : vector<64x32xf32>, vector<32x16xf32>, vector<64x16xf32> -> vector<64x16xf32>
    %76 = arith.addf %70, %75 : vector<64x16xf32>
    %c0_91 = arith.constant 0 : index
    %c1_92 = arith.constant 1 : index
    %c1_93 = arith.constant 1 : index
    %c0_94 = arith.constant 0 : index
    %77 = vector.load %arg21[%c0_91, %c1_92, %c1_93, %c0_94] : memref<1x9x9x32xf32, #tpu.memory_space<vmem>>, vector<1x8x8x32xf32>
    %78 = vector.shape_cast %77 : vector<1x8x8x32xf32> to vector<64x32xf32>
    %c3_95 = arith.constant 3 : index
    %c0_96 = arith.constant 0 : index
    %c0_97 = arith.constant 0 : index
    %79 = vector.load %arg6[%c3_95, %c0_96, %c0_97] : memref<4x32x16xf32, #tpu.memory_space<vmem>>, vector<1x32x16xf32>
    %80 = vector.shape_cast %79 : vector<1x32x16xf32> to vector<32x16xf32>
    %cst_98 = arith.constant dense<0.000000e+00> : vector<64x16xf32>
    %81 = tpu.matmul %78, %80, %cst_98 {dimension_numbers = #tpu.dot_dimension_numbers<[1], [0], [0], [1], [0, 0, 1, 1], [], []>} : vector<64x32xf32>, vector<32x16xf32>, vector<64x16xf32> -> vector<64x16xf32>
    %82 = arith.addf %76, %81 : vector<64x16xf32>
    %c0_99 = arith.constant 0 : index
    %c0_100 = arith.constant 0 : index
    %83 = vector.load %arg7[%c0_99, %c0_100] : memref<1x16xf32, #tpu.memory_space<vmem>>, vector<1x16xf32>
    %84 = vector.broadcast %83 : vector<1x16xf32> to vector<64x16xf32>
    %85 = arith.addf %82, %84 : vector<64x16xf32>
    %cst_101 = arith.constant 0.000000e+00 : f32
    %86 = vector.broadcast %cst_101 : f32 to vector<64x16xf32>
    %87 = arith.cmpf oge, %85, %86 : vector<64x16xf32>
    %cst_102 = arith.constant 2.000000e-01 : f32
    %88 = vector.broadcast %cst_102 : f32 to vector<64x16xf32>
    %89 = arith.mulf %88, %85 : vector<64x16xf32>
    %90 = arith.select %87, %85, %89 : vector<64x16xi1>, vector<64x16xf32>
    %c0_103 = arith.constant 0 : index
    %c0_104 = arith.constant 0 : index
    %c0_105 = arith.constant 0 : index
    %91 = vector.load %arg9[%c0_103, %c0_104, %c0_105] : memref<4x16x64xf32, #tpu.memory_space<vmem>>, vector<1x16x64xf32>
    %92 = vector.shape_cast %91 : vector<1x16x64xf32> to vector<16x64xf32>
    %cst_106 = arith.constant dense<0.000000e+00> : vector<64x64xf32>
    %93 = tpu.matmul %90, %92, %cst_106 {dimension_numbers = #tpu.dot_dimension_numbers<[1], [0], [0], [1], [0, 0, 1, 1], [], []>} : vector<64x16xf32>, vector<16x64xf32>, vector<64x64xf32> -> vector<64x64xf32>
    %c0_107 = arith.constant 0 : index
    %c0_108 = arith.constant 0 : index
    %c0_109 = arith.constant 0 : index
    %94 = vector.load %arg8[%c0_107, %c0_108, %c0_109] : memref<4x25x64xf32, #tpu.memory_space<vmem>>, vector<1x25x64xf32>
    %95 = vector.shape_cast %94 : vector<1x25x64xf32> to vector<25x64xf32>
    %cst_110 = arith.constant dense<0.000000e+00> : vector<25x64xf32>
    %96 = tpu.matmul %95, %93, %cst_110 {dimension_numbers = #tpu.dot_dimension_numbers<[1], [0], [0], [1], [0, 0, 1, 1], [], []>} : vector<25x64xf32>, vector<64x64xf32>, vector<25x64xf32> -> vector<25x64xf32>
    %c1_111 = arith.constant 1 : index
    %c0_112 = arith.constant 0 : index
    %c0_113 = arith.constant 0 : index
    %97 = vector.load %arg9[%c1_111, %c0_112, %c0_113] : memref<4x16x64xf32, #tpu.memory_space<vmem>>, vector<1x16x64xf32>
    %98 = vector.shape_cast %97 : vector<1x16x64xf32> to vector<16x64xf32>
    %cst_114 = arith.constant dense<0.000000e+00> : vector<64x64xf32>
    %99 = tpu.matmul %90, %98, %cst_114 {dimension_numbers = #tpu.dot_dimension_numbers<[1], [0], [0], [1], [0, 0, 1, 1], [], []>} : vector<64x16xf32>, vector<16x64xf32>, vector<64x64xf32> -> vector<64x64xf32>
    %c1_115 = arith.constant 1 : index
    %c0_116 = arith.constant 0 : index
    %c0_117 = arith.constant 0 : index
    %100 = vector.load %arg8[%c1_115, %c0_116, %c0_117] : memref<4x25x64xf32, #tpu.memory_space<vmem>>, vector<1x25x64xf32>
    %101 = vector.shape_cast %100 : vector<1x25x64xf32> to vector<25x64xf32>
    %cst_118 = arith.constant dense<0.000000e+00> : vector<25x64xf32>
    %102 = tpu.matmul %101, %99, %cst_118 {dimension_numbers = #tpu.dot_dimension_numbers<[1], [0], [0], [1], [0, 0, 1, 1], [], []>} : vector<25x64xf32>, vector<64x64xf32>, vector<25x64xf32> -> vector<25x64xf32>
    %103 = arith.addf %96, %102 : vector<25x64xf32>
    %c2_119 = arith.constant 2 : index
    %c0_120 = arith.constant 0 : index
    %c0_121 = arith.constant 0 : index
    %104 = vector.load %arg9[%c2_119, %c0_120, %c0_121] : memref<4x16x64xf32, #tpu.memory_space<vmem>>, vector<1x16x64xf32>
    %105 = vector.shape_cast %104 : vector<1x16x64xf32> to vector<16x64xf32>
    %cst_122 = arith.constant dense<0.000000e+00> : vector<64x64xf32>
    %106 = tpu.matmul %90, %105, %cst_122 {dimension_numbers = #tpu.dot_dimension_numbers<[1], [0], [0], [1], [0, 0, 1, 1], [], []>} : vector<64x16xf32>, vector<16x64xf32>, vector<64x64xf32> -> vector<64x64xf32>
    %c2_123 = arith.constant 2 : index
    %c0_124 = arith.constant 0 : index
    %c0_125 = arith.constant 0 : index
    %107 = vector.load %arg8[%c2_123, %c0_124, %c0_125] : memref<4x25x64xf32, #tpu.memory_space<vmem>>, vector<1x25x64xf32>
    %108 = vector.shape_cast %107 : vector<1x25x64xf32> to vector<25x64xf32>
    %cst_126 = arith.constant dense<0.000000e+00> : vector<25x64xf32>
    %109 = tpu.matmul %108, %106, %cst_126 {dimension_numbers = #tpu.dot_dimension_numbers<[1], [0], [0], [1], [0, 0, 1, 1], [], []>} : vector<25x64xf32>, vector<64x64xf32>, vector<25x64xf32> -> vector<25x64xf32>
    %110 = arith.addf %103, %109 : vector<25x64xf32>
    %c3_127 = arith.constant 3 : index
    %c0_128 = arith.constant 0 : index
    %c0_129 = arith.constant 0 : index
    %111 = vector.load %arg9[%c3_127, %c0_128, %c0_129] : memref<4x16x64xf32, #tpu.memory_space<vmem>>, vector<1x16x64xf32>
    %112 = vector.shape_cast %111 : vector<1x16x64xf32> to vector<16x64xf32>
    %cst_130 = arith.constant dense<0.000000e+00> : vector<64x64xf32>
    %113 = tpu.matmul %90, %112, %cst_130 {dimension_numbers = #tpu.dot_dimension_numbers<[1], [0], [0], [1], [0, 0, 1, 1], [], []>} : vector<64x16xf32>, vector<16x64xf32>, vector<64x64xf32> -> vector<64x64xf32>
    %c3_131 = arith.constant 3 : index
    %c0_132 = arith.constant 0 : index
    %c0_133 = arith.constant 0 : index
    %114 = vector.load %arg8[%c3_131, %c0_132, %c0_133] : memref<4x25x64xf32, #tpu.memory_space<vmem>>, vector<1x25x64xf32>
    %115 = vector.shape_cast %114 : vector<1x25x64xf32> to vector<25x64xf32>
    %cst_134 = arith.constant dense<0.000000e+00> : vector<25x64xf32>
    %116 = tpu.matmul %115, %113, %cst_134 {dimension_numbers = #tpu.dot_dimension_numbers<[1], [0], [0], [1], [0, 0, 1, 1], [], []>} : vector<25x64xf32>, vector<64x64xf32>, vector<25x64xf32> -> vector<25x64xf32>
    %117 = arith.addf %110, %116 : vector<25x64xf32>
    %118 = vector.shape_cast %117 : vector<25x64xf32> to vector<1x5x5x64xf32>
    %c0_135 = arith.constant 0 : index
    %c0_136 = arith.constant 0 : index
    %c0_137 = arith.constant 0 : index
    %c0_138 = arith.constant 0 : index
    %119 = vector.load %arg22[%c0_135, %c0_136, %c0_137, %c0_138] : memref<1x5x5x64xf32, #tpu.memory_space<vmem>>, vector<1x5x5x64xf32>
    tpu.vector_store %arg22[%c0_135, %c0_136, %c0_137, %c0_138], %118 {strides = array<i32>} : memref<1x5x5x64xf32, #tpu.memory_space<vmem>>, vector<1x5x5x64xf32>,
    %c0_139 = arith.constant 0 : index
    %c0_140 = arith.constant 0 : index
    %c0_141 = arith.constant 0 : index
    %c0_142 = arith.constant 0 : index
    %120 = vector.load %arg22[%c0_139, %c0_140, %c0_141, %c0_142] : memref<1x5x5x64xf32, #tpu.memory_space<vmem>>, vector<1x4x4x64xf32>
    %121 = vector.shape_cast %120 : vector<1x4x4x64xf32> to vector<16x64xf32>
    %c0_143 = arith.constant 0 : index
    %c0_144 = arith.constant 0 : index
    %c0_145 = arith.constant 0 : index
    %122 = vector.load %arg10[%c0_143, %c0_144, %c0_145] : memref<4x64x32xf32, #tpu.memory_space<vmem>>, vector<1x64x32xf32>
    %123 = vector.shape_cast %122 : vector<1x64x32xf32> to vector<64x32xf32>
    %cst_146 = arith.constant dense<0.000000e+00> : vector<16x32xf32>
    %124 = tpu.matmul %121, %123, %cst_146 {dimension_numbers = #tpu.dot_dimension_numbers<[1], [0], [0], [1], [0, 0, 1, 1], [], []>} : vector<16x64xf32>, vector<64x32xf32>, vector<16x32xf32> -> vector<16x32xf32>
    %c0_147 = arith.constant 0 : index
    %c0_148 = arith.constant 0 : index
    %c1_149 = arith.constant 1 : index
    %c0_150 = arith.constant 0 : index
    %125 = vector.load %arg22[%c0_147, %c0_148, %c1_149, %c0_150] : memref<1x5x5x64xf32, #tpu.memory_space<vmem>>, vector<1x4x4x64xf32>
    %126 = vector.shape_cast %125 : vector<1x4x4x64xf32> to vector<16x64xf32>
    %c1_151 = arith.constant 1 : index
    %c0_152 = arith.constant 0 : index
    %c0_153 = arith.constant 0 : index
    %127 = vector.load %arg10[%c1_151, %c0_152, %c0_153] : memref<4x64x32xf32, #tpu.memory_space<vmem>>, vector<1x64x32xf32>
    %128 = vector.shape_cast %127 : vector<1x64x32xf32> to vector<64x32xf32>
    %cst_154 = arith.constant dense<0.000000e+00> : vector<16x32xf32>
    %129 = tpu.matmul %126, %128, %cst_154 {dimension_numbers = #tpu.dot_dimension_numbers<[1], [0], [0], [1], [0, 0, 1, 1], [], []>} : vector<16x64xf32>, vector<64x32xf32>, vector<16x32xf32> -> vector<16x32xf32>
    %130 = arith.addf %124, %129 : vector<16x32xf32>
    %c0_155 = arith.constant 0 : index
    %c1_156 = arith.constant 1 : index
    %c0_157 = arith.constant 0 : index
    %c0_158 = arith.constant 0 : index
    %131 = vector.load %arg22[%c0_155, %c1_156, %c0_157, %c0_158] : memref<1x5x5x64xf32, #tpu.memory_space<vmem>>, vector<1x4x4x64xf32>
    %132 = vector.shape_cast %131 : vector<1x4x4x64xf32> to vector<16x64xf32>
    %c2_159 = arith.constant 2 : index
    %c0_160 = arith.constant 0 : index
    %c0_161 = arith.constant 0 : index
    %133 = vector.load %arg10[%c2_159, %c0_160, %c0_161] : memref<4x64x32xf32, #tpu.memory_space<vmem>>, vector<1x64x32xf32>
    %134 = vector.shape_cast %133 : vector<1x64x32xf32> to vector<64x32xf32>
    %cst_162 = arith.constant dense<0.000000e+00> : vector<16x32xf32>
    %135 = tpu.matmul %132, %134, %cst_162 {dimension_numbers = #tpu.dot_dimension_numbers<[1], [0], [0], [1], [0, 0, 1, 1], [], []>} : vector<16x64xf32>, vector<64x32xf32>, vector<16x32xf32> -> vector<16x32xf32>
    %136 = arith.addf %130, %135 : vector<16x32xf32>
    %c0_163 = arith.constant 0 : index
    %c1_164 = arith.constant 1 : index
    %c1_165 = arith.constant 1 : index
    %c0_166 = arith.constant 0 : index
    %137 = vector.load %arg22[%c0_163, %c1_164, %c1_165, %c0_166] : memref<1x5x5x64xf32, #tpu.memory_space<vmem>>, vector<1x4x4x64xf32>
    %138 = vector.shape_cast %137 : vector<1x4x4x64xf32> to vector<16x64xf32>
    %c3_167 = arith.constant 3 : index
    %c0_168 = arith.constant 0 : index
    %c0_169 = arith.constant 0 : index
    %139 = vector.load %arg10[%c3_167, %c0_168, %c0_169] : memref<4x64x32xf32, #tpu.memory_space<vmem>>, vector<1x64x32xf32>
    %140 = vector.shape_cast %139 : vector<1x64x32xf32> to vector<64x32xf32>
    %cst_170 = arith.constant dense<0.000000e+00> : vector<16x32xf32>
    %141 = tpu.matmul %138, %140, %cst_170 {dimension_numbers = #tpu.dot_dimension_numbers<[1], [0], [0], [1], [0, 0, 1, 1], [], []>} : vector<16x64xf32>, vector<64x32xf32>, vector<16x32xf32> -> vector<16x32xf32>
    %142 = arith.addf %136, %141 : vector<16x32xf32>
    %c0_171 = arith.constant 0 : index
    %c0_172 = arith.constant 0 : index
    %143 = vector.load %arg11[%c0_171, %c0_172] : memref<1x32xf32, #tpu.memory_space<vmem>>, vector<1x32xf32>
    %144 = vector.broadcast %143 : vector<1x32xf32> to vector<16x32xf32>
    %145 = arith.addf %142, %144 : vector<16x32xf32>
    %cst_173 = arith.constant 0.000000e+00 : f32
    %146 = vector.broadcast %cst_173 : f32 to vector<16x32xf32>
    %147 = arith.cmpf oge, %145, %146 : vector<16x32xf32>
    %cst_174 = arith.constant 2.000000e-01 : f32
    %148 = vector.broadcast %cst_174 : f32 to vector<16x32xf32>
    %149 = arith.mulf %148, %145 : vector<16x32xf32>
    %150 = arith.select %147, %145, %149 : vector<16x32xi1>, vector<16x32xf32>
    %c0_175 = arith.constant 0 : index
    %c0_176 = arith.constant 0 : index
    %c0_177 = arith.constant 0 : index
    %151 = vector.load %arg13[%c0_175, %c0_176, %c0_177] : memref<4x32x128xf32, #tpu.memory_space<vmem>>, vector<1x32x128xf32>
    %152 = vector.shape_cast %151 : vector<1x32x128xf32> to vector<32x128xf32>
    %cst_178 = arith.constant dense<0.000000e+00> : vector<16x128xf32>
    %153 = tpu.matmul %150, %152, %cst_178 {dimension_numbers = #tpu.dot_dimension_numbers<[1], [0], [0], [1], [0, 0, 1, 1], [], []>} : vector<16x32xf32>, vector<32x128xf32>, vector<16x128xf32> -> vector<16x128xf32>
    %c0_179 = arith.constant 0 : index
    %c0_180 = arith.constant 0 : index
    %c0_181 = arith.constant 0 : index
    %154 = vector.load %arg12[%c0_179, %c0_180, %c0_181] : memref<4x9x16xf32, #tpu.memory_space<vmem>>, vector<1x9x16xf32>
    %155 = vector.shape_cast %154 : vector<1x9x16xf32> to vector<9x16xf32>
    %cst_182 = arith.constant dense<0.000000e+00> : vector<9x128xf32>
    %156 = tpu.matmul %155, %153, %cst_182 {dimension_numbers = #tpu.dot_dimension_numbers<[1], [0], [0], [1], [0, 0, 1, 1], [], []>} : vector<9x16xf32>, vector<16x128xf32>, vector<9x128xf32> -> vector<9x128xf32>
    %c1_183 = arith.constant 1 : index
    %c0_184 = arith.constant 0 : index
    %c0_185 = arith.constant 0 : index
    %157 = vector.load %arg13[%c1_183, %c0_184, %c0_185] : memref<4x32x128xf32, #tpu.memory_space<vmem>>, vector<1x32x128xf32>
    %158 = vector.shape_cast %157 : vector<1x32x128xf32> to vector<32x128xf32>
    %cst_186 = arith.constant dense<0.000000e+00> : vector<16x128xf32>
    %159 = tpu.matmul %150, %158, %cst_186 {dimension_numbers = #tpu.dot_dimension_numbers<[1], [0], [0], [1], [0, 0, 1, 1], [], []>} : vector<16x32xf32>, vector<32x128xf32>, vector<16x128xf32> -> vector<16x128xf32>
    %c1_187 = arith.constant 1 : index
    %c0_188 = arith.constant 0 : index
    %c0_189 = arith.constant 0 : index
    %160 = vector.load %arg12[%c1_187, %c0_188, %c0_189] : memref<4x9x16xf32, #tpu.memory_space<vmem>>, vector<1x9x16xf32>
    %161 = vector.shape_cast %160 : vector<1x9x16xf32> to vector<9x16xf32>
    %cst_190 = arith.constant dense<0.000000e+00> : vector<9x128xf32>
    %162 = tpu.matmul %161, %159, %cst_190 {dimension_numbers = #tpu.dot_dimension_numbers<[1], [0], [0], [1], [0, 0, 1, 1], [], []>} : vector<9x16xf32>, vector<16x128xf32>, vector<9x128xf32> -> vector<9x128xf32>
    %163 = arith.addf %156, %162 : vector<9x128xf32>
    %c2_191 = arith.constant 2 : index
    %c0_192 = arith.constant 0 : index
    %c0_193 = arith.constant 0 : index
    %164 = vector.load %arg13[%c2_191, %c0_192, %c0_193] : memref<4x32x128xf32, #tpu.memory_space<vmem>>, vector<1x32x128xf32>
    %165 = vector.shape_cast %164 : vector<1x32x128xf32> to vector<32x128xf32>
    %cst_194 = arith.constant dense<0.000000e+00> : vector<16x128xf32>
    %166 = tpu.matmul %150, %165, %cst_194 {dimension_numbers = #tpu.dot_dimension_numbers<[1], [0], [0], [1], [0, 0, 1, 1], [], []>} : vector<16x32xf32>, vector<32x128xf32>, vector<16x128xf32> -> vector<16x128xf32>
    %c2_195 = arith.constant 2 : index
    %c0_196 = arith.constant 0 : index
    %c0_197 = arith.constant 0 : index
    %167 = vector.load %arg12[%c2_195, %c0_196, %c0_197] : memref<4x9x16xf32, #tpu.memory_space<vmem>>, vector<1x9x16xf32>
    %168 = vector.shape_cast %167 : vector<1x9x16xf32> to vector<9x16xf32>
    %cst_198 = arith.constant dense<0.000000e+00> : vector<9x128xf32>
    %169 = tpu.matmul %168, %166, %cst_198 {dimension_numbers = #tpu.dot_dimension_numbers<[1], [0], [0], [1], [0, 0, 1, 1], [], []>} : vector<9x16xf32>, vector<16x128xf32>, vector<9x128xf32> -> vector<9x128xf32>
    %170 = arith.addf %163, %169 : vector<9x128xf32>
    %c3_199 = arith.constant 3 : index
    %c0_200 = arith.constant 0 : index
    %c0_201 = arith.constant 0 : index
    %171 = vector.load %arg13[%c3_199, %c0_200, %c0_201] : memref<4x32x128xf32, #tpu.memory_space<vmem>>, vector<1x32x128xf32>
    %172 = vector.shape_cast %171 : vector<1x32x128xf32> to vector<32x128xf32>
    %cst_202 = arith.constant dense<0.000000e+00> : vector<16x128xf32>
    %173 = tpu.matmul %150, %172, %cst_202 {dimension_numbers = #tpu.dot_dimension_numbers<[1], [0], [0], [1], [0, 0, 1, 1], [], []>} : vector<16x32xf32>, vector<32x128xf32>, vector<16x128xf32> -> vector<16x128xf32>
    %c3_203 = arith.constant 3 : index
    %c0_204 = arith.constant 0 : index
    %c0_205 = arith.constant 0 : index
    %174 = vector.load %arg12[%c3_203, %c0_204, %c0_205] : memref<4x9x16xf32, #tpu.memory_space<vmem>>, vector<1x9x16xf32>
    %175 = vector.shape_cast %174 : vector<1x9x16xf32> to vector<9x16xf32>
    %cst_206 = arith.constant dense<0.000000e+00> : vector<9x128xf32>
    %176 = tpu.matmul %175, %173, %cst_206 {dimension_numbers = #tpu.dot_dimension_numbers<[1], [0], [0], [1], [0, 0, 1, 1], [], []>} : vector<9x16xf32>, vector<16x128xf32>, vector<9x128xf32> -> vector<9x128xf32>
    %177 = arith.addf %170, %176 : vector<9x128xf32>
    %178 = vector.shape_cast %177 : vector<9x128xf32> to vector<1x3x3x128xf32>
    %c0_207 = arith.constant 0 : index
    %c0_208 = arith.constant 0 : index
    %c0_209 = arith.constant 0 : index
    %c0_210 = arith.constant 0 : index
    %179 = vector.load %arg23[%c0_207, %c0_208, %c0_209, %c0_210] : memref<1x3x3x128xf32, #tpu.memory_space<vmem>>, vector<1x3x3x128xf32>
    tpu.vector_store %arg23[%c0_207, %c0_208, %c0_209, %c0_210], %178 {strides = array<i32>} : memref<1x3x3x128xf32, #tpu.memory_space<vmem>>, vector<1x3x3x128xf32>,
    %c0_211 = arith.constant 0 : index
    %c0_212 = arith.constant 0 : index
    %c0_213 = arith.constant 0 : index
    %c0_214 = arith.constant 0 : index
    %180 = vector.load %arg23[%c0_211, %c0_212, %c0_213, %c0_214] : memref<1x3x3x128xf32, #tpu.memory_space<vmem>>, vector<1x2x2x128xf32>
    %181 = vector.shape_cast %180 : vector<1x2x2x128xf32> to vector<4x128xf32>
    %c0_215 = arith.constant 0 : index
    %c0_216 = arith.constant 0 : index
    %c0_217 = arith.constant 0 : index
    %182 = vector.load %arg14[%c0_215, %c0_216, %c0_217] : memref<4x128x64xf32, #tpu.memory_space<vmem>>, vector<1x128x64xf32>
    %183 = vector.shape_cast %182 : vector<1x128x64xf32> to vector<128x64xf32>
    %cst_218 = arith.constant dense<0.000000e+00> : vector<4x64xf32>
    %184 = tpu.matmul %181, %183, %cst_218 {dimension_numbers = #tpu.dot_dimension_numbers<[1], [0], [0], [1], [0, 0, 1, 1], [], []>} : vector<4x128xf32>, vector<128x64xf32>, vector<4x64xf32> -> vector<4x64xf32>
    %c0_219 = arith.constant 0 : index
    %c0_220 = arith.constant 0 : index
    %c1_221 = arith.constant 1 : index
    %c0_222 = arith.constant 0 : index
    %185 = vector.load %arg23[%c0_219, %c0_220, %c1_221, %c0_222] : memref<1x3x3x128xf32, #tpu.memory_space<vmem>>, vector<1x2x2x128xf32>
    %186 = vector.shape_cast %185 : vector<1x2x2x128xf32> to vector<4x128xf32>
    %c1_223 = arith.constant 1 : index
    %c0_224 = arith.constant 0 : index
    %c0_225 = arith.constant 0 : index
    %187 = vector.load %arg14[%c1_223, %c0_224, %c0_225] : memref<4x128x64xf32, #tpu.memory_space<vmem>>, vector<1x128x64xf32>
    %188 = vector.shape_cast %187 : vector<1x128x64xf32> to vector<128x64xf32>
    %cst_226 = arith.constant dense<0.000000e+00> : vector<4x64xf32>
    %189 = tpu.matmul %186, %188, %cst_226 {dimension_numbers = #tpu.dot_dimension_numbers<[1], [0], [0], [1], [0, 0, 1, 1], [], []>} : vector<4x128xf32>, vector<128x64xf32>, vector<4x64xf32> -> vector<4x64xf32>
    %190 = arith.addf %184, %189 : vector<4x64xf32>
    %c0_227 = arith.constant 0 : index
    %c1_228 = arith.constant 1 : index
    %c0_229 = arith.constant 0 : index
    %c0_230 = arith.constant 0 : index
    %191 = vector.load %arg23[%c0_227, %c1_228, %c0_229, %c0_230] : memref<1x3x3x128xf32, #tpu.memory_space<vmem>>, vector<1x2x2x128xf32>
    %192 = vector.shape_cast %191 : vector<1x2x2x128xf32> to vector<4x128xf32>
    %c2_231 = arith.constant 2 : index
    %c0_232 = arith.constant 0 : index
    %c0_233 = arith.constant 0 : index
    %193 = vector.load %arg14[%c2_231, %c0_232, %c0_233] : memref<4x128x64xf32, #tpu.memory_space<vmem>>, vector<1x128x64xf32>
    %194 = vector.shape_cast %193 : vector<1x128x64xf32> to vector<128x64xf32>
    %cst_234 = arith.constant dense<0.000000e+00> : vector<4x64xf32>
    %195 = tpu.matmul %192, %194, %cst_234 {dimension_numbers = #tpu.dot_dimension_numbers<[1], [0], [0], [1], [0, 0, 1, 1], [], []>} : vector<4x128xf32>, vector<128x64xf32>, vector<4x64xf32> -> vector<4x64xf32>
    %196 = arith.addf %190, %195 : vector<4x64xf32>
    %c0_235 = arith.constant 0 : index
    %c1_236 = arith.constant 1 : index
    %c1_237 = arith.constant 1 : index
    %c0_238 = arith.constant 0 : index
    %197 = vector.load %arg23[%c0_235, %c1_236, %c1_237, %c0_238] : memref<1x3x3x128xf32, #tpu.memory_space<vmem>>, vector<1x2x2x128xf32>
    %198 = vector.shape_cast %197 : vector<1x2x2x128xf32> to vector<4x128xf32>
    %c3_239 = arith.constant 3 : index
    %c0_240 = arith.constant 0 : index
    %c0_241 = arith.constant 0 : index
    %199 = vector.load %arg14[%c3_239, %c0_240, %c0_241] : memref<4x128x64xf32, #tpu.memory_space<vmem>>, vector<1x128x64xf32>
    %200 = vector.shape_cast %199 : vector<1x128x64xf32> to vector<128x64xf32>
    %cst_242 = arith.constant dense<0.000000e+00> : vector<4x64xf32>
    %201 = tpu.matmul %198, %200, %cst_242 {dimension_numbers = #tpu.dot_dimension_numbers<[1], [0], [0], [1], [0, 0, 1, 1], [], []>} : vector<4x128xf32>, vector<128x64xf32>, vector<4x64xf32> -> vector<4x64xf32>
    %202 = arith.addf %196, %201 : vector<4x64xf32>
    %c0_243 = arith.constant 0 : index
    %c0_244 = arith.constant 0 : index
    %203 = vector.load %arg15[%c0_243, %c0_244] : memref<1x64xf32, #tpu.memory_space<vmem>>, vector<1x64xf32>
    %204 = vector.broadcast %203 : vector<1x64xf32> to vector<4x64xf32>
    %205 = arith.addf %202, %204 : vector<4x64xf32>
    %cst_245 = arith.constant 0.000000e+00 : f32
    %206 = vector.broadcast %cst_245 : f32 to vector<4x64xf32>
    %207 = arith.cmpf oge, %205, %206 : vector<4x64xf32>
    %cst_246 = arith.constant 2.000000e-01 : f32
    %208 = vector.broadcast %cst_246 : f32 to vector<4x64xf32>
    %209 = arith.mulf %208, %205 : vector<4x64xf32>
    %210 = arith.select %207, %205, %209 : vector<4x64xi1>, vector<4x64xf32>
    %c0_247 = arith.constant 0 : index
    %c0_248 = arith.constant 0 : index
    %c0_249 = arith.constant 0 : index
    %211 = vector.load %arg17[%c0_247, %c0_248, %c0_249] : memref<4x64x256xf32, #tpu.memory_space<vmem>>, vector<1x64x256xf32>
    %212 = vector.shape_cast %211 : vector<1x64x256xf32> to vector<64x256xf32>
    %cst_250 = arith.constant dense<0.000000e+00> : vector<4x256xf32>
    %213 = tpu.matmul %210, %212, %cst_250 {dimension_numbers = #tpu.dot_dimension_numbers<[1], [0], [0], [1], [0, 0, 1, 1], [], []>} : vector<4x64xf32>, vector<64x256xf32>, vector<4x256xf32> -> vector<4x256xf32>
    %c0_251 = arith.constant 0 : index
    %c0_252 = arith.constant 0 : index
    %c0_253 = arith.constant 0 : index
    %214 = vector.load %arg16[%c0_251, %c0_252, %c0_253] : memref<4x4x4xf32, #tpu.memory_space<vmem>>, vector<1x4x4xf32>
    %215 = vector.shape_cast %214 : vector<1x4x4xf32> to vector<4x4xf32>
    %cst_254 = arith.constant dense<0.000000e+00> : vector<4x256xf32>
    %216 = tpu.matmul %215, %213, %cst_254 {dimension_numbers = #tpu.dot_dimension_numbers<[1], [0], [0], [1], [0, 0, 1, 1], [], []>} : vector<4x4xf32>, vector<4x256xf32>, vector<4x256xf32> -> vector<4x256xf32>
    %c1_255 = arith.constant 1 : index
    %c0_256 = arith.constant 0 : index
    %c0_257 = arith.constant 0 : index
    %217 = vector.load %arg17[%c1_255, %c0_256, %c0_257] : memref<4x64x256xf32, #tpu.memory_space<vmem>>, vector<1x64x256xf32>
    %218 = vector.shape_cast %217 : vector<1x64x256xf32> to vector<64x256xf32>
    %cst_258 = arith.constant dense<0.000000e+00> : vector<4x256xf32>
    %219 = tpu.matmul %210, %218, %cst_258 {dimension_numbers = #tpu.dot_dimension_numbers<[1], [0], [0], [1], [0, 0, 1, 1], [], []>} : vector<4x64xf32>, vector<64x256xf32>, vector<4x256xf32> -> vector<4x256xf32>
    %c1_259 = arith.constant 1 : index
    %c0_260 = arith.constant 0 : index
    %c0_261 = arith.constant 0 : index
    %220 = vector.load %arg16[%c1_259, %c0_260, %c0_261] : memref<4x4x4xf32, #tpu.memory_space<vmem>>, vector<1x4x4xf32>
    %221 = vector.shape_cast %220 : vector<1x4x4xf32> to vector<4x4xf32>
    %cst_262 = arith.constant dense<0.000000e+00> : vector<4x256xf32>
    %222 = tpu.matmul %221, %219, %cst_262 {dimension_numbers = #tpu.dot_dimension_numbers<[1], [0], [0], [1], [0, 0, 1, 1], [], []>} : vector<4x4xf32>, vector<4x256xf32>, vector<4x256xf32> -> vector<4x256xf32>
    %223 = arith.addf %216, %222 : vector<4x256xf32>
    %c2_263 = arith.constant 2 : index
    %c0_264 = arith.constant 0 : index
    %c0_265 = arith.constant 0 : index
    %224 = vector.load %arg17[%c2_263, %c0_264, %c0_265] : memref<4x64x256xf32, #tpu.memory_space<vmem>>, vector<1x64x256xf32>
    %225 = vector.shape_cast %224 : vector<1x64x256xf32> to vector<64x256xf32>
    %cst_266 = arith.constant dense<0.000000e+00> : vector<4x256xf32>
    %226 = tpu.matmul %210, %225, %cst_266 {dimension_numbers = #tpu.dot_dimension_numbers<[1], [0], [0], [1], [0, 0, 1, 1], [], []>} : vector<4x64xf32>, vector<64x256xf32>, vector<4x256xf32> -> vector<4x256xf32>
    %c2_267 = arith.constant 2 : index
    %c0_268 = arith.constant 0 : index
    %c0_269 = arith.constant 0 : index
    %227 = vector.load %arg16[%c2_267, %c0_268, %c0_269] : memref<4x4x4xf32, #tpu.memory_space<vmem>>, vector<1x4x4xf32>
    %228 = vector.shape_cast %227 : vector<1x4x4xf32> to vector<4x4xf32>
    %cst_270 = arith.constant dense<0.000000e+00> : vector<4x256xf32>
    %229 = tpu.matmul %228, %226, %cst_270 {dimension_numbers = #tpu.dot_dimension_numbers<[1], [0], [0], [1], [0, 0, 1, 1], [], []>} : vector<4x4xf32>, vector<4x256xf32>, vector<4x256xf32> -> vector<4x256xf32>
    %230 = arith.addf %223, %229 : vector<4x256xf32>
    %c3_271 = arith.constant 3 : index
    %c0_272 = arith.constant 0 : index
    %c0_273 = arith.constant 0 : index
    %231 = vector.load %arg17[%c3_271, %c0_272, %c0_273] : memref<4x64x256xf32, #tpu.memory_space<vmem>>, vector<1x64x256xf32>
    %232 = vector.shape_cast %231 : vector<1x64x256xf32> to vector<64x256xf32>
    %cst_274 = arith.constant dense<0.000000e+00> : vector<4x256xf32>
    %233 = tpu.matmul %210, %232, %cst_274 {dimension_numbers = #tpu.dot_dimension_numbers<[1], [0], [0], [1], [0, 0, 1, 1], [], []>} : vector<4x64xf32>, vector<64x256xf32>, vector<4x256xf32> -> vector<4x256xf32>
    %c3_275 = arith.constant 3 : index
    %c0_276 = arith.constant 0 : index
    %c0_277 = arith.constant 0 : index
    %234 = vector.load %arg16[%c3_275, %c0_276, %c0_277] : memref<4x4x4xf32, #tpu.memory_space<vmem>>, vector<1x4x4xf32>
    %235 = vector.shape_cast %234 : vector<1x4x4xf32> to vector<4x4xf32>
    %cst_278 = arith.constant dense<0.000000e+00> : vector<4x256xf32>
    %236 = tpu.matmul %235, %233, %cst_278 {dimension_numbers = #tpu.dot_dimension_numbers<[1], [0], [0], [1], [0, 0, 1, 1], [], []>} : vector<4x4xf32>, vector<4x256xf32>, vector<4x256xf32> -> vector<4x256xf32>
    %237 = arith.addf %230, %236 : vector<4x256xf32>
    %238 = vector.shape_cast %237 : vector<4x256xf32> to vector<1x2x2x256xf32>
    %c0_279 = arith.constant 0 : index
    %c0_280 = arith.constant 0 : index
    %c0_281 = arith.constant 0 : index
    %c0_282 = arith.constant 0 : index
    %239 = vector.load %arg24[%c0_279, %c0_280, %c0_281, %c0_282] : memref<1x2x2x256xf32, #tpu.memory_space<vmem>>, vector<1x2x2x256xf32>
    tpu.vector_store %arg24[%c0_279, %c0_280, %c0_281, %c0_282], %238 {strides = array<i32>} : memref<1x2x2x256xf32, #tpu.memory_space<vmem>>, vector<1x2x2x256xf32>,
    %c0_283 = arith.constant 0 : index
    %c0_284 = arith.constant 0 : index
    %c0_285 = arith.constant 0 : index
    %c0_286 = arith.constant 0 : index
    %240 = vector.load %arg24[%c0_283, %c0_284, %c0_285, %c0_286] : memref<1x2x2x256xf32, #tpu.memory_space<vmem>>, vector<1x1x1x256xf32>
    %241 = vector.shape_cast %240 : vector<1x1x1x256xf32> to vector<1x256xf32>
    %c0_287 = arith.constant 0 : index
    %c0_288 = arith.constant 0 : index
    %c0_289 = arith.constant 0 : index
    %242 = vector.load %arg18[%c0_287, %c0_288, %c0_289] : memref<4x256x1xf32, #tpu.memory_space<vmem>>, vector<1x256x1xf32>
    %243 = vector.shape_cast %242 : vector<1x256x1xf32> to vector<256x1xf32>
    %cst_290 = arith.constant dense<0.000000e+00> : vector<1x1xf32>
    %244 = tpu.matmul %241, %243, %cst_290 {dimension_numbers = #tpu.dot_dimension_numbers<[1], [0], [0], [1], [0, 0, 1, 1], [], []>} : vector<1x256xf32>, vector<256x1xf32>, vector<1x1xf32> -> vector<1x1xf32>
    %c0_291 = arith.constant 0 : index
    %c0_292 = arith.constant 0 : index
    %c1_293 = arith.constant 1 : index
    %c0_294 = arith.constant 0 : index
    %245 = vector.load %arg24[%c0_291, %c0_292, %c1_293, %c0_294] : memref<1x2x2x256xf32, #tpu.memory_space<vmem>>, vector<1x1x1x256xf32>
    %246 = vector.shape_cast %245 : vector<1x1x1x256xf32> to vector<1x256xf32>
    %c1_295 = arith.constant 1 : index
    %c0_296 = arith.constant 0 : index
    %c0_297 = arith.constant 0 : index
    %247 = vector.load %arg18[%c1_295, %c0_296, %c0_297] : memref<4x256x1xf32, #tpu.memory_space<vmem>>, vector<1x256x1xf32>
    %248 = vector.shape_cast %247 : vector<1x256x1xf32> to vector<256x1xf32>
    %cst_298 = arith.constant dense<0.000000e+00> : vector<1x1xf32>
    %249 = tpu.matmul %246, %248, %cst_298 {dimension_numbers = #tpu.dot_dimension_numbers<[1], [0], [0], [1], [0, 0, 1, 1], [], []>} : vector<1x256xf32>, vector<256x1xf32>, vector<1x1xf32> -> vector<1x1xf32>
    %250 = arith.addf %244, %249 : vector<1x1xf32>
    %c0_299 = arith.constant 0 : index
    %c1_300 = arith.constant 1 : index
    %c0_301 = arith.constant 0 : index
    %c0_302 = arith.constant 0 : index
    %251 = vector.load %arg24[%c0_299, %c1_300, %c0_301, %c0_302] : memref<1x2x2x256xf32, #tpu.memory_space<vmem>>, vector<1x1x1x256xf32>
    %252 = vector.shape_cast %251 : vector<1x1x1x256xf32> to vector<1x256xf32>
    %c2_303 = arith.constant 2 : index
    %c0_304 = arith.constant 0 : index
    %c0_305 = arith.constant 0 : index
    %253 = vector.load %arg18[%c2_303, %c0_304, %c0_305] : memref<4x256x1xf32, #tpu.memory_space<vmem>>, vector<1x256x1xf32>
    %254 = vector.shape_cast %253 : vector<1x256x1xf32> to vector<256x1xf32>
    %cst_306 = arith.constant dense<0.000000e+00> : vector<1x1xf32>
    %255 = tpu.matmul %252, %254, %cst_306 {dimension_numbers = #tpu.dot_dimension_numbers<[1], [0], [0], [1], [0, 0, 1, 1], [], []>} : vector<1x256xf32>, vector<256x1xf32>, vector<1x1xf32> -> vector<1x1xf32>
    %256 = arith.addf %250, %255 : vector<1x1xf32>
    %c0_307 = arith.constant 0 : index
    %c1_308 = arith.constant 1 : index
    %c1_309 = arith.constant 1 : index
    %c0_310 = arith.constant 0 : index
    %257 = vector.load %arg24[%c0_307, %c1_308, %c1_309, %c0_310] : memref<1x2x2x256xf32, #tpu.memory_space<vmem>>, vector<1x1x1x256xf32>
    %258 = vector.shape_cast %257 : vector<1x1x1x256xf32> to vector<1x256xf32>
    %c3_311 = arith.constant 3 : index
    %c0_312 = arith.constant 0 : index
    %c0_313 = arith.constant 0 : index
    %259 = vector.load %arg18[%c3_311, %c0_312, %c0_313] : memref<4x256x1xf32, #tpu.memory_space<vmem>>, vector<1x256x1xf32>
    %260 = vector.shape_cast %259 : vector<1x256x1xf32> to vector<256x1xf32>
    %cst_314 = arith.constant dense<0.000000e+00> : vector<1x1xf32>
    %261 = tpu.matmul %258, %260, %cst_314 {dimension_numbers = #tpu.dot_dimension_numbers<[1], [0], [0], [1], [0, 0, 1, 1], [], []>} : vector<1x256xf32>, vector<256x1xf32>, vector<1x1xf32> -> vector<1x1xf32>
    %262 = arith.addf %256, %261 : vector<1x1xf32>
    %c0_315 = arith.constant 0 : index
    %c0_316 = arith.constant 0 : index
    %263 = vector.load %arg19[%c0_315, %c0_316] : memref<1x1xf32, #tpu.memory_space<vmem>>, vector<1x1xf32>
    %264 = arith.addf %262, %263 : vector<1x1xf32>
    %265 = vector.shape_cast %264 : vector<1x1xf32> to vector<1x1x1x1xf32>
    %c0_317 = arith.constant 0 : index
    %c0_318 = arith.constant 0 : index
    %c0_319 = arith.constant 0 : index
    %c0_320 = arith.constant 0 : index
    %266 = vector.load %arg20[%c0_317, %c0_318, %c0_319, %c0_320] : memref<1x1x1x1xf32, #tpu.memory_space<vmem>>, vector<1x1x1x1xf32>
    tpu.vector_store %arg20[%c0_317, %c0_318, %c0_319, %c0_320], %265 {strides = array<i32>} : memref<1x1x1x1xf32, #tpu.memory_space<vmem>>, vector<1x1x1x1xf32>,
    return
  }
  func.func @transform_0(%arg0: i32) -> (i32, i32, i32, i32) {
    %c0_i32 = arith.constant 0 : i32
    %c0_i32_0 = arith.constant 0 : i32
    %c0_i32_1 = arith.constant 0 : i32
    %c0_i32_2 = arith.constant 0 : i32
    return %arg0, %c0_i32, %c0_i32_0, %c0_i32_1 : i32, i32, i32, i32
  }
  func.func @transform_1(%arg0: i32) -> (i32, i32, i32) {
    %c0_i32 = arith.constant 0 : i32
    %c0_i32_0 = arith.constant 0 : i32
    %c0_i32_1 = arith.constant 0 : i32
    %c0_i32_2 = arith.constant 0 : i32
    return %c0_i32, %c0_i32_0, %c0_i32_1 : i32, i32, i32
  }
  func.func @transform_2(%arg0: i32) -> (i32, i32) {
    %c0_i32 = arith.constant 0 : i32
    %c0_i32_0 = arith.constant 0 : i32
    %c0_i32_1 = arith.constant 0 : i32
    return %c0_i32, %c0_i32_0 : i32, i32
  }
  func.func @transform_3(%arg0: i32) -> (i32, i32, i32) {
    %c0_i32 = arith.constant 0 : i32
    %c0_i32_0 = arith.constant 0 : i32
    %c0_i32_1 = arith.constant 0 : i32
    %c0_i32_2 = arith.constant 0 : i32
    return %c0_i32, %c0_i32_0, %c0_i32_1 : i32, i32, i32
  }
  func.func @transform_4(%arg0: i32) -> (i32, i32, i32) {
    %c0_i32 = arith.constant 0 : i32
    %c0_i32_0 = arith.constant 0 : i32
    %c0_i32_1 = arith.constant 0 : i32
    %c0_i32_2 = arith.constant 0 : i32
    return %c0_i32, %c0_i32_0, %c0_i32_1 : i32, i32, i32
  }
  func.func @transform_5(%arg0: i32) -> (i32, i32, i32) {
    %c0_i32 = arith.constant 0 : i32
    %c0_i32_0 = arith.constant 0 : i32
    %c0_i32_1 = arith.constant 0 : i32
    %c0_i32_2 = arith.constant 0 : i32
    return %c0_i32, %c0_i32_0, %c0_i32_1 : i32, i32, i32
  }
  func.func @transform_6(%arg0: i32) -> (i32, i32) {
    %c0_i32 = arith.constant 0 : i32
    %c0_i32_0 = arith.constant 0 : i32
    %c0_i32_1 = arith.constant 0 : i32
    return %c0_i32, %c0_i32_0 : i32, i32
  }
  func.func @transform_7(%arg0: i32) -> (i32, i32, i32) {
    %c0_i32 = arith.constant 0 : i32
    %c0_i32_0 = arith.constant 0 : i32
    %c0_i32_1 = arith.constant 0 : i32
    %c0_i32_2 = arith.constant 0 : i32
    return %c0_i32, %c0_i32_0, %c0_i32_1 : i32, i32, i32
  }
  func.func @transform_8(%arg0: i32) -> (i32, i32, i32) {
    %c0_i32 = arith.constant 0 : i32
    %c0_i32_0 = arith.constant 0 : i32
    %c0_i32_1 = arith.constant 0 : i32
    %c0_i32_2 = arith.constant 0 : i32
    return %c0_i32, %c0_i32_0, %c0_i32_1 : i32, i32, i32
  }
  func.func @transform_9(%arg0: i32) -> (i32, i32, i32) {
    %c0_i32 = arith.constant 0 : i32
    %c0_i32_0 = arith.constant 0 : i32
    %c0_i32_1 = arith.constant 0 : i32
    %c0_i32_2 = arith.constant 0 : i32
    return %c0_i32, %c0_i32_0, %c0_i32_1 : i32, i32, i32
  }
  func.func @transform_10(%arg0: i32) -> (i32, i32) {
    %c0_i32 = arith.constant 0 : i32
    %c0_i32_0 = arith.constant 0 : i32
    %c0_i32_1 = arith.constant 0 : i32
    return %c0_i32, %c0_i32_0 : i32, i32
  }
  func.func @transform_11(%arg0: i32) -> (i32, i32, i32) {
    %c0_i32 = arith.constant 0 : i32
    %c0_i32_0 = arith.constant 0 : i32
    %c0_i32_1 = arith.constant 0 : i32
    %c0_i32_2 = arith.constant 0 : i32
    return %c0_i32, %c0_i32_0, %c0_i32_1 : i32, i32, i32
  }
  func.func @transform_12(%arg0: i32) -> (i32, i32, i32) {
    %c0_i32 = arith.constant 0 : i32
    %c0_i32_0 = arith.constant 0 : i32
    %c0_i32_1 = arith.constant 0 : i32
    %c0_i32_2 = arith.constant 0 : i32
    return %c0_i32, %c0_i32_0, %c0_i32_1 : i32, i32, i32
  }
  func.func @transform_13(%arg0: i32) -> (i32, i32, i32) {
    %c0_i32 = arith.constant 0 : i32
    %c0_i32_0 = arith.constant 0 : i32
    %c0_i32_1 = arith.constant 0 : i32
    %c0_i32_2 = arith.constant 0 : i32
    return %c0_i32, %c0_i32_0, %c0_i32_1 : i32, i32, i32
  }
  func.func @transform_14(%arg0: i32) -> (i32, i32) {
    %c0_i32 = arith.constant 0 : i32
    %c0_i32_0 = arith.constant 0 : i32
    %c0_i32_1 = arith.constant 0 : i32
    return %c0_i32, %c0_i32_0 : i32, i32
  }
  func.func @transform_15(%arg0: i32) -> (i32, i32, i32) {
    %c0_i32 = arith.constant 0 : i32
    %c0_i32_0 = arith.constant 0 : i32
    %c0_i32_1 = arith.constant 0 : i32
    %c0_i32_2 = arith.constant 0 : i32
    return %c0_i32, %c0_i32_0, %c0_i32_1 : i32, i32, i32
  }
  func.func @transform_16(%arg0: i32) -> (i32, i32, i32) {
    %c0_i32 = arith.constant 0 : i32
    %c0_i32_0 = arith.constant 0 : i32
    %c0_i32_1 = arith.constant 0 : i32
    %c0_i32_2 = arith.constant 0 : i32
    return %c0_i32, %c0_i32_0, %c0_i32_1 : i32, i32, i32
  }
  func.func @transform_17(%arg0: i32) -> (i32, i32, i32) {
    %c0_i32 = arith.constant 0 : i32
    %c0_i32_0 = arith.constant 0 : i32
    %c0_i32_1 = arith.constant 0 : i32
    %c0_i32_2 = arith.constant 0 : i32
    return %c0_i32, %c0_i32_0, %c0_i32_1 : i32, i32, i32
  }
  func.func @transform_18(%arg0: i32) -> (i32, i32) {
    %c0_i32 = arith.constant 0 : i32
    %c0_i32_0 = arith.constant 0 : i32
    %c0_i32_1 = arith.constant 0 : i32
    return %c0_i32, %c0_i32_0 : i32, i32
  }
  func.func @transform_19(%arg0: i32) -> (i32, i32, i32, i32) {
    %c0_i32 = arith.constant 0 : i32
    %c0_i32_0 = arith.constant 0 : i32
    %c0_i32_1 = arith.constant 0 : i32
    %c0_i32_2 = arith.constant 0 : i32
    return %arg0, %c0_i32, %c0_i32_0, %c0_i32_1 : i32, i32, i32, i32
  }
}

</mosaic_0001>

<bundles_post_ra>
// kernel: discriminator_forward.1
= control target key start
LH: loop header
LB: loop body
LE: loop exit
PB: predicated region body
PF: predicated region fallthrough
CT: control target
= control target key end

     0   :  { %s13297_s20 = smov 0   ;;  %s16182_s0 = inlined_call_operand.vmem [shape: f32[2,17,17,16], index: 0, kind: input, shape index: {}]   ;;  %s16183_s1 = inlined_call_operand.vmem [shape: f32[4,16,8], index: 1, kind: input, shape index: {}]   ;;  %s16184_s2 = inlined_call_operand.vmem [shape: f32[1,8], index: 2, kind: input, shape index: {}]   ;;  %s16185_s3 = inlined_call_operand.vmem [shape: f32[4,81,256], index: 3, kind: input, shape index: {}]   ;;  %s16186_s4 = inlined_call_operand.vmem [shape: f32[4,8,32], index: 4, kind: input, shape index: {}]   ;;  %s16187_s5 = inlined_call_operand.vmem [shape: f32[4,32,16], index: 5, kind: input, shape index: {}]   ;;  %s16188_s6 = inlined_call_operand.vmem [shape: f32[1,16], index: 6, kind: input, shape index: {}]   ;;  %s16189_s7 = inlined_call_operand.vmem [shape: f32[4,25,64], index: 7, kind: input, shape index: {}]   ;;  %s16190_s8 = inlined_call_operand.vmem [shape: f32[4,16,64], index: 8, kind: input, shape index: {}]   ;;  %s16191_s9 = inlined_call_operand.vmem [shape: f32[4,64,32], index: 9, kind: input, shape index: {}]   ;;  %s16192_s10 = inlined_call_operand.vmem [shape: f32[1,32], index: 10, kind: input, shape index: {}]   ;;  %s16193_s11 = inlined_call_operand.vmem [shape: f32[4,9,16], index: 11, kind: input, shape index: {}]   ;;  %s16194_s12 = inlined_call_operand.vmem [shape: f32[4,32,128], index: 12, kind: input, shape index: {}]   ;;  %s16195_s13 = inlined_call_operand.vmem [shape: f32[4,128,64], index: 13, kind: input, shape index: {}]   ;;  %s16196_s14 = inlined_call_operand.vmem [shape: f32[1,64], index: 14, kind: input, shape index: {}]   ;;  %s16197_s15 = inlined_call_operand.vmem [shape: f32[4,4,4], index: 15, kind: input, shape index: {}]   ;;  %s16198_s16 = inlined_call_operand.vmem [shape: f32[4,64,256], index: 16, kind: input, shape index: {}]   ;;  %s16199_s17 = inlined_call_operand.vmem [shape: f32[4,256,1], index: 17, kind: input, shape index: {}]   ;;  %s16200_s18 = inlined_call_operand.<no memory space> [shape: f32[1,1], index: 18, kind: input, shape index: {}]   ;;  %s16201_s19 = inlined_call_operand.vmem [shape: f32[2,1,1,1], index: 19, kind: output, shape index: {}]  }
   0x1   :  { %16252 = sst [smem:[#allocation31_spill]] %s16182_s0  ;;  %v24_v0 = vstv %s16200_s18 }
   0x2   :  { %16253 = sst [smem:[#allocation32_spill]] %s16183_s1  ;;  %25 = vst [vmem:[#allocation6] sm:$0x1] %v24_v0 }
   0x3   :  { %16254 = sst [smem:[#allocation33_spill]] %s16184_s2 }
   0x4   :  { %16255 = sst [smem:[#allocation34_spill]] %s16185_s3 }
   0x5 LB: > { %s9653_s21 = sadd.s32 4294967295, %s13187_s20   ;;  %p9657_p0 = scmp.ge.s32.totalorder %s13187_s20, 1  ;;  %s13187_s20 = sphi %s13297_s20, %s31_s20  }
   0x6   : > { %p539_p1 = scmp.lt.s32.totalorder %s13187_s20, 3 }
   0x8   : > { %p540_p2 = pnand %p9657_p0, %p539_p1 }
   0xa   : > { %543 = sbr.rel (%p540_p2) target bundleno = 4912 (0x1330), region = 96 }
  0x11   : > { %s16256_s2 = sld [smem:[#allocation32_spill]]  ;;  %p593_p3 = scmp.lt.s32.totalorder %s9653_s21, 1  ;;  %vm670_vm0 = vcmask 130048   ;;  %vm2226_vm3 = vcmask 64512  }
  0x12   : > { %s16257_s18 = sld [smem:[#allocation31_spill]]  ;;  %s16258_s22 = sld [smem:[#allocation33_spill]] }
  0x13   : > { %s16325_s21 = smov (!%p593_p3, %s9653_s21), 1  ;;  %s16283_s24 = sld [smem:[#allocation34_spill]] }
  0x14   : > { %s13151_s27 = smul.u32 408, %s16325_s21 }
  0x17   : > { %v9659_v1 = vld [vmem:[%s16256_s2 + $0x10] sm:$0xff]  ;;  %v9660_v2 = vld [vmem:[%s16256_s2 + $0x18] sm:$0xff]  ;;  %v633_v3 = vld [vmem:[%s16256_s2] sm:$0xff] }
  0x18   : > { %v12345_v4 = vpack.c.bf16 %v9660_v2, %v9659_v1  ;;  %v634_v5 = vld [vmem:[%s16256_s2 + $0x8] sm:$0xff]  ;;  %v9757_v7 = vld [vmem:[%s16256_s2 + $0x20] sm:$0xff]  ;;  %s13329_s23 = scalar_lea.vmem %s16257_s18, %s13151_s27  ;;  %v9823_v43 = vld [vmem:[%s16256_s2 + $0x30] sm:$0xff]  ;;  %s600_s18 = scalar_lea.vmem %s16201_s19, %s16325_s21 }
  0x19   : > { %v12349_v6 = vpack.c.bf16 %v634_v5, %v633_v3  ;;  %v9758_v8 = vld [vmem:[%s16256_s2 + $0x28] sm:$0xff]  ;;  %v13334_v11 = vld [vmem:[%s13329_s23 + $0x19] sm:$0xff]  ;;  %v13346_v14 = vld [vmem:[%s13329_s23 + $0x31] sm:$0xff] }
  0x1a   : > { %12346 = vmatprep.subr.bf16.mxu0 %v12345_v4  ;;  %v635_v9 = vld [vmem:[%s13329_s23 + $0x1] sm:$0xff]  ;;  %v636_v10 = vld [vmem:[%s13329_s23 + $0x9] sm:$0xff]  ;;  %v13336_v12 = vpack.c.bf16 %v9758_v8, %v9757_v7  ;;  %v13354_v15 = vld [vmem:[%s13329_s23 + $0x39] sm:$0xff] }
  0x1b   : > { %12348 = vmatpush3.bf16.msra.mxu0 %v12345_v4  ;;  %11421 = vmatprep.mubr.msk.f32.mxu0 %vm670_vm0, %v635_v9  ;;  %v13343_v13 = vld [vmem:[%s13329_s23 + $0x21] sm:$0xff]  ;;  %v13357_v16 = vld [vmem:[%s13329_s23 + $0x49] sm:$0xff]  ;;  %v13364_v17 = vld [vmem:[%s13329_s23 + $0x51] sm:$0xff] }
  0x1c   : > { %12350 = vmatprep.subr.bf16.mxu0 %v12349_v6  ;;  %v13367_v18 = vld [vmem:[%s13329_s23 + $0x61] sm:$0xff]  ;;  %v13374_v19 = vld [vmem:[%s13329_s23 + $0x69] sm:$0xff]  ;;  %v13377_v20 = vld [vmem:[%s13329_s23 + $0x79] sm:$0xff] }
  0x1d   : > { %v13384_v21 = vld [vmem:[%s13329_s23 + $0x81] sm:$0xff]  ;;  %v13387_v22 = vld [vmem:[%s13329_s23 + $0x91] sm:$0xff]  ;;  %v13394_v23 = vld [vmem:[%s13329_s23 + $0x99] sm:$0xff] }
  0x1e   : > { %11422 = vmatmul.mubr.msk.f32.vlgmr.msra.gmra.mrb[0].mxu0 %vm670_vm0, %v636_v10  ;;  %v13397_v24 = vld [vmem:[%s13329_s23 + $0xa9] sm:$0xff]  ;;  %v13404_v25 = vld [vmem:[%s13329_s23 + $0xb1] sm:$0xff]  ;;  %v13407_v26 = vld [vmem:[%s13329_s23 + $0xc1] sm:$0xff] }
  0x1f   : > { %11424 = vmatprep.mubr.msk.f32.mxu0 %vm670_vm0, %v13334_v11  ;;  %12352 = vmatpush3.bf16.msra.mxu0 %v12349_v6  ;;  %v13414_v27 = vld [vmem:[%s13329_s23 + $0xc9] sm:$0xff]  ;;  %v13417_v28 = vld [vmem:[%s13329_s23 + $0xd9] sm:$0xff]  ;;  %v13424_v29 = vld [vmem:[%s13329_s23 + $0xe1] sm:$0xff] }
  0x20   : > { %12354 = vmatprep.subr.bf16.mxu0 %v13336_v12  ;;  %v13427_v30 = vld [vmem:[%s13329_s23 + $0xf1] sm:$0xff]  ;;  %v13434_v31 = vld [vmem:[%s13329_s23 + $0xf9] sm:$0xff]  ;;  %v13437_v32 = vld [vmem:[%s13329_s23 + $0x109] sm:$0xff] }
  0x21   : > { %v13444_v33 = vld [vmem:[%s13329_s23 + $0x111] sm:$0xff]  ;;  %v13447_v34 = vld [vmem:[%s13329_s23 + $0x121] sm:$0xff]  ;;  %v13454_v35 = vld [vmem:[%s13329_s23 + $0x129] sm:$0xff] }
  0x22   : > { %11425 = vmatmul.mubr.msk.f32.gmra.mrb[2].mxu0 %vm670_vm0, %v13343_v13  ;;  %v13457_v36 = vld [vmem:[%s13329_s23 + $0x139] sm:$0xff]  ;;  %v13464_v37 = vld [vmem:[%s13329_s23 + $0x141] sm:$0xff]  ;;  %v13467_v38 = vld [vmem:[%s13329_s23 + $0x151] sm:$0xff] }
  0x23   : > { %11427 = vmatprep.mubr.msk.f32.mxu0 %vm670_vm0, %v13346_v14  ;;  %v13474_v39 = vld [vmem:[%s13329_s23 + $0x159] sm:$0xff]  ;;  %v13477_v40 = vld [vmem:[%s13329_s23 + $0x169] sm:$0xff]  ;;  %v13484_v41 = vld [vmem:[%s13329_s23 + $0x171] sm:$0xff] }
  0x24   : > { %v601_v42 = vld [vmem:[%s13329_s23] sm:$0xff]  ;;  %v9824_v44 = vld [vmem:[%s16256_s2 + $0x38] sm:$0xff]  ;;  %v602_v45 = vld [vmem:[%s13329_s23 + $0x8] sm:$0xff] }
  0x25   : > { %v13498_v46 = vld [vmem:[%s13329_s23 + $0x18] sm:$0xff]  ;;  %v13500_v47 = vpack.c.bf16 %v9824_v44, %v9823_v43  ;;  %v604_v48 = vld [vmem:[%s13329_s23 + $0x20] sm:$0xff]  ;;  %v605_v49 = vld [vmem:[%s13329_s23 + $0x30] sm:$0xff] }
  0x26   : > { %11428 = vmatmul.mubr.msk.f32.gmra.mrb[4].mxu0 %vm670_vm0, %v13354_v15  ;;  %v606_v50 = vld [vmem:[%s13329_s23 + $0x38] sm:$0xff]  ;;  %v607_v51 = vld [vmem:[%s13329_s23 + $0x48] sm:$0xff]  ;;  %v608_v52 = vld [vmem:[%s13329_s23 + $0x50] sm:$0xff] }
  0x27   : > { %11430 = vmatprep.mubr.msk.f32.mxu0 %vm670_vm0, %v13357_v16  ;;  %v609_v53 = vld [vmem:[%s13329_s23 + $0x60] sm:$0xff]  ;;  %v610_v54 = vld [vmem:[%s13329_s23 + $0x68] sm:$0xff]  ;;  %v611_v55 = vld [vmem:[%s13329_s23 + $0x78] sm:$0xff] }
  0x28   : > { %v612_v56 = vld [vmem:[%s13329_s23 + $0x80] sm:$0xff]  ;;  %v613_v57 = vld [vmem:[%s13329_s23 + $0x90] sm:$0xff]  ;;  %v614_v58 = vld [vmem:[%s13329_s23 + $0x98] sm:$0xff] }
  0x29   : > { %v615_v59 = vld [vmem:[%s13329_s23 + $0xa8] sm:$0xff]  ;;  %v616_v60 = vld [vmem:[%s13329_s23 + $0xb0] sm:$0xff]  ;;  %v617_v61 = vld [vmem:[%s13329_s23 + $0xc0] sm:$0xff] }
  0x2a   : > { %11431 = vmatmul.mubr.msk.f32.gmra.mrb[6].mxu0 %vm670_vm0, %v13364_v17  ;;  %v618_v62 = vld [vmem:[%s13329_s23 + $0xc8] sm:$0xff]  ;;  %v619_v63 = vld [vmem:[%s13329_s23 + $0xd8] sm:$0xff]  ;;  %v620_v0 = vld [vmem:[%s13329_s23 + $0xe0] sm:$0xff] }
  0x2b   : > { %11433 = vmatprep.mubr.msk.f32.mxu0 %vm670_vm0, %v13367_v18  ;;  %v621_v1 = vld [vmem:[%s13329_s23 + $0xf0] sm:$0xff]  ;;  %v622_v2 = vld [vmem:[%s13329_s23 + $0xf8] sm:$0xff]  ;;  %v623_v3 = vld [vmem:[%s13329_s23 + $0x108] sm:$0xff] }
  0x2c   : > { %v624_v4 = vld [vmem:[%s13329_s23 + $0x110] sm:$0xff]  ;;  %v625_v5 = vld [vmem:[%s13329_s23 + $0x120] sm:$0xff]  ;;  %v626_v6 = vld [vmem:[%s13329_s23 + $0x128] sm:$0xff] }
  0x2d   : > { %v627_v7 = vld [vmem:[%s13329_s23 + $0x138] sm:$0xff]  ;;  %v628_v8 = vld [vmem:[%s13329_s23 + $0x140] sm:$0xff]  ;;  %v629_v9 = vld [vmem:[%s13329_s23 + $0x150] sm:$0xff] }
  0x2e   : > { %11434 = vmatmul.mubr.msk.f32.gmra.mrb[8].mxu0 %vm670_vm0, %v13374_v19  ;;  %v630_v10 = vld [vmem:[%s13329_s23 + $0x158] sm:$0xff]  ;;  %v9755_v43 = vld [vmem:[%s13329_s23 + $0x180] sm:$0xff]  ;;  %v9756_v44 = vld [vmem:[%s13329_s23 + $0x188] sm:$0xff] }
  0x2f   : > { %11436 = vmatprep.mubr.msk.f32.mxu0 %vm670_vm0, %v13377_v20 }
  0x32   : > { %11437 = vmatmul.mubr.msk.f32.gmra.mrb[10].mxu0 %vm670_vm0, %v13384_v21 }
  0x33   : > { %11439 = vmatprep.mubr.msk.f32.mxu0 %vm670_vm0, %v13387_v22 }
  0x36   : > { %11440 = vmatmul.mubr.msk.f32.gmra.mrb[12].mxu0 %vm670_vm0, %v13394_v23 }
  0x37   : > { %11442 = vmatprep.mubr.msk.f32.mxu0 %vm670_vm0, %v13397_v24 }
  0x3a   : > { %11443 = vmatmul.mubr.msk.f32.gmra.mrb[14].mxu0 %vm670_vm0, %v13404_v25 }
  0x3b   : > { %11445 = vmatprep.mubr.msk.f32.mxu0 %vm670_vm0, %v13407_v26 }
  0x3e   : > { %11446 = vmatmul.mubr.msk.f32.gmra.mrb[16].mxu0 %vm670_vm0, %v13414_v27 }
  0x3f   : > { %11448 = vmatprep.mubr.msk.f32.mxu0 %vm670_vm0, %v13417_v28 }
  0x42   : > { %11449 = vmatmul.mubr.msk.f32.gmra.mrb[18].mxu0 %vm670_vm0, %v13424_v29 }
  0x43   : > { %11451 = vmatprep.mubr.msk.f32.mxu0 %vm670_vm0, %v13427_v30 }
  0x46   : > { %11452 = vmatmul.mubr.msk.f32.gmra.mrb[20].mxu0 %vm670_vm0, %v13434_v31 }
  0x47   : > { %11454 = vmatprep.mubr.msk.f32.mxu0 %vm670_vm0, %v13437_v32 }
  0x4a   : > { %11455 = vmatmul.mubr.msk.f32.gmra.mrb[22].mxu0 %vm670_vm0, %v13444_v33 }
  0x4b   : > { %11457 = vmatprep.mubr.msk.f32.mxu0 %vm670_vm0, %v13447_v34 }
  0x4e   : > { %11458 = vmatmul.mubr.msk.f32.gmra.mrb[24].mxu0 %vm670_vm0, %v13454_v35 }
  0x4f   : > { %11460 = vmatprep.mubr.msk.f32.mxu0 %vm670_vm0, %v13457_v36 }
  0x52   : > { %11461 = vmatmul.mubr.msk.f32.gmra.mrb[26].mxu0 %vm670_vm0, %v13464_v37 }
  0x53   : > { %11463 = vmatprep.mubr.msk.f32.mxu0 %vm670_vm0, %v13467_v38 }
  0x56   : > { %11464 = vmatmul.mubr.msk.f32.gmra.mrb[28].mxu0 %vm670_vm0, %v13474_v39 }
  0x57   : > { %11466 = vmatprep.mubr.msk.f32.mxu0 %vm670_vm0, %v13477_v40 }
  0x5a   : > { %11467 = vmatmul.mubr.msk.f32.gmra.mrb[30].mxu0 %vm670_vm0, %v13484_v41 }
  0x5b   : > { %11473 = vmatprep.mubr.msk.f32.mxu0 %vm670_vm0, %v601_v42  ;;  %v632_v42 = vld [vmem:[%s13329_s23 + $0x170] sm:$0xff] }
  0x5e   : > { %11474 = vmatmul.mubr.msk.f32.vlgmr.msra.gmra.mrb[0].mxu0 %vm670_vm0, %v602_v45 }
  0x5f   : > { %11476 = vmatprep.mubr.msk.f32.mxu0 %vm670_vm0, %v13498_v46  ;;  %12356 = vmatpush3.bf16.msra.mxu0 %v13336_v12  ;;  %v631_v12 = vld [vmem:[%s13329_s23 + $0x168] sm:$0xff] }
  0x60   : > { %12358 = vmatprep.subr.bf16.mxu0 %v13500_v47 }
  0x62   : > { %11477 = vmatmul.mubr.msk.f32.gmra.mrb[2].mxu0 %vm670_vm0, %v604_v48 }
  0x63   : > { %11479 = vmatprep.mubr.msk.f32.mxu0 %vm670_vm0, %v605_v49 }
  0x66   : > { %11480 = vmatmul.mubr.msk.f32.gmra.mrb[4].mxu0 %vm670_vm0, %v606_v50 }
  0x67   : > { %11482 = vmatprep.mubr.msk.f32.mxu0 %vm670_vm0, %v607_v51 }
  0x6a   : > { %11483 = vmatmul.mubr.msk.f32.gmra.mrb[6].mxu0 %vm670_vm0, %v608_v52 }
  0x6b   : > { %11485 = vmatprep.mubr.msk.f32.mxu0 %vm670_vm0, %v609_v53 }
  0x6e   : > { %11486 = vmatmul.mubr.msk.f32.gmra.mrb[8].mxu0 %vm670_vm0, %v610_v54 }
  0x6f   : > { %11488 = vmatprep.mubr.msk.f32.mxu0 %vm670_vm0, %v611_v55 }
  0x72   : > { %11489 = vmatmul.mubr.msk.f32.gmra.mrb[10].mxu0 %vm670_vm0, %v612_v56 }
  0x73   : > { %11491 = vmatprep.mubr.msk.f32.mxu0 %vm670_vm0, %v613_v57 }
  0x76   : > { %11492 = vmatmul.mubr.msk.f32.gmra.mrb[12].mxu0 %vm670_vm0, %v614_v58 }
  0x77   : > { %11494 = vmatprep.mubr.msk.f32.mxu0 %vm670_vm0, %v615_v59 }
  0x7a   : > { %11495 = vmatmul.mubr.msk.f32.gmra.mrb[14].mxu0 %vm670_vm0, %v616_v60 }
  0x7b   : > { %11497 = vmatprep.mubr.msk.f32.mxu0 %vm670_vm0, %v617_v61 }
  0x7e   : > { %11498 = vmatmul.mubr.msk.f32.gmra.mrb[16].mxu0 %vm670_vm0, %v618_v62 }
  0x7f   : > { %11500 = vmatprep.mubr.msk.f32.mxu0 %vm670_vm0, %v619_v63 }
  0x82   : > { %11501 = vmatmul.mubr.msk.f32.gmra.mrb[18].mxu0 %vm670_vm0, %v620_v0 }
  0x83   : > { %11503 = vmatprep.mubr.msk.f32.mxu0 %vm670_vm0, %v621_v1 }
  0x86   : > { %11504 = vmatmul.mubr.msk.f32.gmra.mrb[20].mxu0 %vm670_vm0, %v622_v2 }
  0x87   : > { %11506 = vmatprep.mubr.msk.f32.mxu0 %vm670_vm0, %v623_v3 }
  0x8a   : > { %11507 = vmatmul.mubr.msk.f32.gmra.mrb[22].mxu0 %vm670_vm0, %v624_v4 }
  0x8b   : > { %11509 = vmatprep.mubr.msk.f32.mxu0 %vm670_vm0, %v625_v5 }
  0x8e   : > { %11510 = vmatmul.mubr.msk.f32.gmra.mrb[24].mxu0 %vm670_vm0, %v626_v6 }
  0x8f   : > { %11512 = vmatprep.mubr.msk.f32.mxu0 %vm670_vm0, %v627_v7 }
  0x92   : > { %11513 = vmatmul.mubr.msk.f32.gmra.mrb[26].mxu0 %vm670_vm0, %v628_v8 }
  0x93   : > { %11515 = vmatprep.mubr.msk.f32.mxu0 %vm670_vm0, %v629_v9 }
  0x96   : > { %11516 = vmatmul.mubr.msk.f32.gmra.mrb[28].mxu0 %vm670_vm0, %v630_v10 }
  0x97   : > { %11518 = vmatprep.mubr.msk.f32.mxu0 %vm670_vm0, %v631_v12 }
  0x9a   : > { %11519 = vmatmul.mubr.msk.f32.gmra.mrb[30].mxu0 %vm670_vm0, %v632_v42 }
  0x9b   : > { %11525 = vmatprep.mubr.msk.f32.mxu0 %vm670_vm0, %v13498_v46 }
  0x9e   : > { %11526 = vmatmul.mubr.msk.f32.vlgmr.msra.gmra.mrb[0].mxu0 %vm670_vm0, %v604_v48 }
  0x9f   : > { %11528 = vmatprep.mubr.msk.f32.mxu0 %vm670_vm0, %v605_v49  ;;  %12360 = vmatpush3.bf16.msra.mxu0 %v13500_v47 }
  0xa2   : > { %11529 = vmatmul.mubr.msk.f32.gmra.mrb[2].mxu0 %vm670_vm0, %v606_v50 }
  0xa3   : > { %11531 = vmatprep.mubr.msk.f32.mxu0 %vm670_vm0, %v607_v51 }
  0xa6   : > { %11532 = vmatmul.mubr.msk.f32.gmra.mrb[4].mxu0 %vm670_vm0, %v608_v52 }
  0xa7   : > { %11534 = vmatprep.mubr.msk.f32.mxu0 %vm670_vm0, %v609_v53 }
  0xaa   : > { %11535 = vmatmul.mubr.msk.f32.gmra.mrb[6].mxu0 %vm670_vm0, %v610_v54 }
  0xab   : > { %11537 = vmatprep.mubr.msk.f32.mxu0 %vm670_vm0, %v611_v55 }
  0xae   : > { %11538 = vmatmul.mubr.msk.f32.gmra.mrb[8].mxu0 %vm670_vm0, %v612_v56 }
  0xaf   : > { %11540 = vmatprep.mubr.msk.f32.mxu0 %vm670_vm0, %v613_v57 }
  0xb2   : > { %11541 = vmatmul.mubr.msk.f32.gmra.mrb[10].mxu0 %vm670_vm0, %v614_v58 }
  0xb3   : > { %11543 = vmatprep.mubr.msk.f32.mxu0 %vm670_vm0, %v615_v59 }
  0xb6   : > { %11544 = vmatmul.mubr.msk.f32.gmra.mrb[12].mxu0 %vm670_vm0, %v616_v60 }
  0xb7   : > { %11546 = vmatprep.mubr.msk.f32.mxu0 %vm670_vm0, %v617_v61 }
  0xba   : > { %11547 = vmatmul.mubr.msk.f32.gmra.mrb[14].mxu0 %vm670_vm0, %v618_v62 }
  0xbb   : > { %11549 = vmatprep.mubr.msk.f32.mxu0 %vm670_vm0, %v619_v63 }
  0xbe   : > { %11550 = vmatmul.mubr.msk.f32.gmra.mrb[16].mxu0 %vm670_vm0, %v620_v0 }
  0xbf   : > { %11552 = vmatprep.mubr.msk.f32.mxu0 %vm670_vm0, %v621_v1 }
  0xc2   : > { %11553 = vmatmul.mubr.msk.f32.gmra.mrb[18].mxu0 %vm670_vm0, %v622_v2 }
  0xc3   : > { %11555 = vmatprep.mubr.msk.f32.mxu0 %vm670_vm0, %v623_v3 }
  0xc6   : > { %11556 = vmatmul.mubr.msk.f32.gmra.mrb[20].mxu0 %vm670_vm0, %v624_v4 }
  0xc7   : > { %11558 = vmatprep.mubr.msk.f32.mxu0 %vm670_vm0, %v625_v5 }
  0xca   : > { %11559 = vmatmul.mubr.msk.f32.gmra.mrb[22].mxu0 %vm670_vm0, %v626_v6 }
  0xcb   : > { %11561 = vmatprep.mubr.msk.f32.mxu0 %vm670_vm0, %v627_v7 }
  0xce   : > { %11562 = vmatmul.mubr.msk.f32.gmra.mrb[24].mxu0 %vm670_vm0, %v628_v8 }
  0xcf   : > { %11564 = vmatprep.mubr.msk.f32.mxu0 %vm670_vm0, %v629_v9 }
  0xd2   : > { %11565 = vmatmul.mubr.msk.f32.gmra.mrb[26].mxu0 %vm670_vm0, %v630_v10 }
  0xd3   : > { %11567 = vmatprep.mubr.msk.f32.mxu0 %vm670_vm0, %v631_v12 }
  0xd6   : > { %11568 = vmatmul.mubr.msk.f32.gmra.mrb[28].mxu0 %vm670_vm0, %v632_v42 }
  0xd7   : > { %11570 = vmatprep.mubr.msk.f32.mxu0 %vm670_vm0, %v9755_v43 }
  0xda   : > { %11571 = vmatmul.mubr.msk.f32.gmra.mrb[30].mxu0 %vm670_vm0, %v9756_v44 }
  0xdb   : > { %11577 = vmatprep.mubr.msk.f32.mxu0 %vm670_vm0, %v13334_v11  ;;  %v9821_v11 = vld [vmem:[%s13329_s23 + $0x181] sm:$0xff] }
  0xde   : > { %11578 = vmatmul.mubr.msk.f32.vlgmr.msra.gmra.mrb[0].mxu0 %vm670_vm0, %v13343_v13  ;;  %v9822_v13 = vld [vmem:[%s13329_s23 + $0x189] sm:$0xff] }
  0xdf   : > { %11580 = vmatprep.mubr.msk.f32.mxu0 %vm670_vm0, %v13346_v14  ;;  %v2225_v14 = vld [vmem:[%s16186_s4] sm:$0xff] }
  0xe0   : > { %11625 = vmatprep.subr.mxu1 %v2225_v14 }
  0xe1   : > { %11626 = vmatpush3.msra.mxu1 %v2225_v14 }
  0xe2   : > { %11581 = vmatmul.mubr.msk.f32.gmra.mrb[2].mxu0 %vm670_vm0, %v13354_v15  ;;  %v9890_v15 = vld [vmem:[%s16186_s4 + $0x8] sm:$0xff] }
  0xe3   : > { %11583 = vmatprep.mubr.msk.f32.mxu0 %vm670_vm0, %v13357_v16  ;;  %11675 = vmatprep.subr.mxu1 %v9890_v15  ;;  %v13674_v16 = vld [vmem:[%s16258_s22] ss:$0 sm:$0xff] }
  0xe6   : > { %11584 = vmatmul.mubr.msk.f32.gmra.mrb[4].mxu0 %vm670_vm0, %v13364_v17 }
  0xe7   : > { %11586 = vmatprep.mubr.msk.f32.mxu0 %vm670_vm0, %v13367_v18 }
  0xea   : > { %11587 = vmatmul.mubr.msk.f32.gmra.mrb[6].mxu0 %vm670_vm0, %v13374_v19 }
  0xeb   : > { %11589 = vmatprep.mubr.msk.f32.mxu0 %vm670_vm0, %v13377_v20 }
  0xee   : > { %11590 = vmatmul.mubr.msk.f32.gmra.mrb[8].mxu0 %vm670_vm0, %v13384_v21 }
  0xef   : > { %11592 = vmatprep.mubr.msk.f32.mxu0 %vm670_vm0, %v13387_v22 }
  0xf2   : > { %11593 = vmatmul.mubr.msk.f32.gmra.mrb[10].mxu0 %vm670_vm0, %v13394_v23 }
  0xf3   : > { %11595 = vmatprep.mubr.msk.f32.mxu0 %vm670_vm0, %v13397_v24 }
  0xf6   : > { %11596 = vmatmul.mubr.msk.f32.gmra.mrb[12].mxu0 %vm670_vm0, %v13404_v25 }
  0xf7   : > { %11598 = vmatprep.mubr.msk.f32.mxu0 %vm670_vm0, %v13407_v26 }
  0xfa   : > { %11599 = vmatmul.mubr.msk.f32.gmra.mrb[14].mxu0 %vm670_vm0, %v13414_v27 }
  0xfb   : > { %11601 = vmatprep.mubr.msk.f32.mxu0 %vm670_vm0, %v13417_v28 }
  0xfe   : > { %11602 = vmatmul.mubr.msk.f32.gmra.mrb[16].mxu0 %vm670_vm0, %v13424_v29 }
  0xff   : > { %11604 = vmatprep.mubr.msk.f32.mxu0 %vm670_vm0, %v13427_v30 }
 0x102   : > { %11605 = vmatmul.mubr.msk.f32.gmra.mrb[18].mxu0 %vm670_vm0, %v13434_v31 }
 0x103   : > { %11607 = vmatprep.mubr.msk.f32.mxu0 %vm670_vm0, %v13437_v32 }
 0x106   : > { %11608 = vmatmul.mubr.msk.f32.gmra.mrb[20].mxu0 %vm670_vm0, %v13444_v33 }
 0x107   : > { %11610 = vmatprep.mubr.msk.f32.mxu0 %vm670_vm0, %v13447_v34 }
 0x10a   : > { %11611 = vmatmul.mubr.msk.f32.gmra.mrb[22].mxu0 %vm670_vm0, %v13454_v35 }
 0x10b   : > { %11613 = vmatprep.mubr.msk.f32.mxu0 %vm670_vm0, %v13457_v36 }
 0x10e   : > { %11614 = vmatmul.mubr.msk.f32.gmra.mrb[24].mxu0 %vm670_vm0, %v13464_v37 }
 0x10f   : > { %11616 = vmatprep.mubr.msk.f32.mxu0 %vm670_vm0, %v13467_v38 }
 0x112   : > { %11617 = vmatmul.mubr.msk.f32.gmra.mrb[26].mxu0 %vm670_vm0, %v13474_v39 }
 0x113   : > { %11619 = vmatprep.mubr.msk.f32.mxu0 %vm670_vm0, %v13477_v40 }
 0x116   : > { %11620 = vmatmul.mubr.msk.f32.gmra.mrb[28].mxu0 %vm670_vm0, %v13484_v41 }
 0x117   : > { %11622 = vmatprep.mubr.msk.f32.mxu0 %vm670_vm0, %v9821_v11 }
 0x11a   : > { %11623 = vmatmul.mubr.msk.f32.gmra.mrb[30].mxu0 %vm670_vm0, %v9822_v13 }
 0x1b1   : > { %v11579_v17 = vpop.f32.mrb[0].mxu0 }
 0x1b2   : > { %v2098_v18 = vadd.f32 %v11579_v17, %v13674_v16  ;;  %v1899_v19 = vpop.f32.mrb[1].mxu0 }
 0x1b3   : > { %v2097_v20 = vadd.f32 %v13674_v16, %v1899_v19 }
 0x1b4   : > { %v2162_v21 = vmul.f32 0.2, %v2098_v18  ;;  %vm2130_vm1 = vcmp.ge.f32.partialorder %v2098_v18, 0.0 }
 0x1b5   : > { %vm2129_vm2 = vcmp.ge.f32.partialorder %v2097_v20, 0.0  ;;  %v2161_v22 = vmul.f32 0.2, %v2097_v20  ;;  %v11582_v23 = vpop.f32.mrb[2].mxu0 }
 0x1b6   : > { %v2100_v24 = vadd.f32 %v11582_v23, %v13674_v16  ;;  %v1909_v25 = vpop.f32.mrb[3].mxu0  ;;  %v13684_v29 = vsel %vm2130_vm1, %v2098_v18, %v2162_v21 }
 0x1b7   : > { %v2099_v26 = vadd.f32 %v13674_v16, %v1909_v25  ;;  %v13680_v27 = vsel %vm2129_vm2, %v2097_v20, %v2161_v22 }
 0x1b8   : > { %v2164_v28 = vmul.f32 0.2, %v2100_v24  ;;  %11627 = vmatprep.mubr.msk.f32.mxu1 %vm2226_vm3, %v13680_v27  ;;  %vm2132_vm4 = vcmp.ge.f32.partialorder %v2100_v24, 0.0 }
 0x1b9   : > { %vm2131_vm5 = vcmp.ge.f32.partialorder %v2099_v26, 0.0  ;;  %v2163_v30 = vmul.f32 0.2, %v2099_v26  ;;  %v11585_v31 = vpop.f32.mrb[4].mxu0  ;;  %11628 = vmatmul.mubr.msk.f32.vlgmr.msra.gmra.mrb[0].mxu1 %vm2226_vm3, %v13684_v29 }
 0x1ba   : > { %v2102_v32 = vadd.f32 %v11585_v31, %v13674_v16  ;;  %v1919_v33 = vpop.f32.mrb[5].mxu0  ;;  %11676 = vmatpush3.msra.mxu1 %v9890_v15  ;;  %v13694_v37 = vsel %vm2132_vm4, %v2100_v24, %v2164_v28 }
 0x1bb   : > { %v2101_v34 = vadd.f32 %v13674_v16, %v1919_v33  ;;  %v13690_v35 = vsel %vm2131_vm5, %v2099_v26, %v2163_v30 }
 0x1bc   : > { %v2166_v36 = vmul.f32 0.2, %v2102_v32  ;;  %11630 = vmatprep.mubr.msk.f32.mxu1 %vm2226_vm3, %v13690_v35  ;;  %vm2134_vm6 = vcmp.ge.f32.partialorder %v2102_v32, 0.0 }
 0x1bd   : > { %vm2133_vm7 = vcmp.ge.f32.partialorder %v2101_v34, 0.0  ;;  %v2165_v38 = vmul.f32 0.2, %v2101_v34  ;;  %v11588_v39 = vpop.f32.mrb[6].mxu0  ;;  %11631 = vmatmul.mubr.msk.f32.gmra.mrb[2].mxu1 %vm2226_vm3, %v13694_v37 }
 0x1be   : > { %v2104_v40 = vadd.f32 %v11588_v39, %v13674_v16  ;;  %v1929_v41 = vpop.f32.mrb[7].mxu0  ;;  %v13704_v48 = vsel %vm2134_vm6, %v2102_v32, %v2166_v36 }
 0x1bf   : > { %v2103_v45 = vadd.f32 %v13674_v16, %v1929_v41  ;;  %v13700_v46 = vsel %vm2133_vm7, %v2101_v34, %v2165_v38 }
 0x1c0   : > { %v2168_v47 = vmul.f32 0.2, %v2104_v40  ;;  %11633 = vmatprep.mubr.msk.f32.mxu1 %vm2226_vm3, %v13700_v46  ;;  %vm2136_vm8 = vcmp.ge.f32.partialorder %v2104_v40, 0.0 }
 0x1c1   : > { %vm2135_vm9 = vcmp.ge.f32.partialorder %v2103_v45, 0.0  ;;  %v2167_v49 = vmul.f32 0.2, %v2103_v45  ;;  %v11591_v50 = vpop.f32.mrb[8].mxu0  ;;  %11634 = vmatmul.mubr.msk.f32.gmra.mrb[4].mxu1 %vm2226_vm3, %v13704_v48 }
 0x1c2   : > { %v2106_v51 = vadd.f32 %v11591_v50, %v13674_v16  ;;  %v1939_v52 = vpop.f32.mrb[9].mxu0  ;;  %v13714_v56 = vsel %vm2136_vm8, %v2104_v40, %v2168_v47 }
 0x1c3   : > { %v2105_v53 = vadd.f32 %v13674_v16, %v1939_v52  ;;  %v13710_v54 = vsel %vm2135_vm9, %v2103_v45, %v2167_v49 }
 0x1c4   : > { %v2170_v55 = vmul.f32 0.2, %v2106_v51  ;;  %11636 = vmatprep.mubr.msk.f32.mxu1 %vm2226_vm3, %v13710_v54  ;;  %vm2138_vm10 = vcmp.ge.f32.partialorder %v2106_v51, 0.0 }
 0x1c5   : > { %vm2137_vm11 = vcmp.ge.f32.partialorder %v2105_v53, 0.0  ;;  %v2169_v57 = vmul.f32 0.2, %v2105_v53  ;;  %v11594_v58 = vpop.f32.mrb[10].mxu0  ;;  %11637 = vmatmul.mubr.msk.f32.gmra.mrb[6].mxu1 %vm2226_vm3, %v13714_v56 }
 0x1c6   : > { %v2108_v59 = vadd.f32 %v11594_v58, %v13674_v16  ;;  %v1949_v60 = vpop.f32.mrb[11].mxu0  ;;  %v13724_v0 = vsel %vm2138_vm10, %v2106_v51, %v2170_v55 }
 0x1c7   : > { %v2107_v61 = vadd.f32 %v13674_v16, %v1949_v60  ;;  %v13720_v62 = vsel %vm2137_vm11, %v2105_v53, %v2169_v57  ;;  %16260 = vst [vmem:[#allocation8_spill] sm:$0xff] %v13724_v0 }
 0x1c8   : > { %16259 = vst [vmem:[#allocation7_spill] sm:$0xff] %v13720_v62  ;;  %v2172_v63 = vmul.f32 0.2, %v2108_v59  ;;  %11639 = vmatprep.mubr.msk.f32.mxu1 %vm2226_vm3, %v13720_v62  ;;  %vm2140_vm12 = vcmp.ge.f32.partialorder %v2108_v59, 0.0 }
 0x1c9   : > { %vm2139_vm13 = vcmp.ge.f32.partialorder %v2107_v61, 0.0  ;;  %v2171_v1 = vmul.f32 0.2, %v2107_v61  ;;  %v11597_v2 = vpop.f32.mrb[12].mxu0  ;;  %11640 = vmatmul.mubr.msk.f32.gmra.mrb[8].mxu1 %vm2226_vm3, %v13724_v0 }
 0x1ca   : > { %v2110_v3 = vadd.f32 %v11597_v2, %v13674_v16  ;;  %v1959_v4 = vpop.f32.mrb[13].mxu0  ;;  %v13734_v8 = vsel %vm2140_vm12, %v2108_v59, %v2172_v63 }
 0x1cb   : > { %v2109_v5 = vadd.f32 %v13674_v16, %v1959_v4  ;;  %v13730_v6 = vsel %vm2139_vm13, %v2107_v61, %v2171_v1  ;;  %16262 = vst [vmem:[#allocation10_spill] sm:$0xff] %v13734_v8 }
 0x1cc   : > { %16261 = vst [vmem:[#allocation9_spill] sm:$0xff] %v13730_v6  ;;  %v2174_v7 = vmul.f32 0.2, %v2110_v3  ;;  %11642 = vmatprep.mubr.msk.f32.mxu1 %vm2226_vm3, %v13730_v6  ;;  %vm2142_vm14 = vcmp.ge.f32.partialorder %v2110_v3, 0.0 }
 0x1cd   : > { %vm2141_vm15 = vcmp.ge.f32.partialorder %v2109_v5, 0.0  ;;  %v2173_v9 = vmul.f32 0.2, %v2109_v5  ;;  %v11600_v10 = vpop.f32.mrb[14].mxu0  ;;  %11643 = vmatmul.mubr.msk.f32.gmra.mrb[10].mxu1 %vm2226_vm3, %v13734_v8 }
 0x1ce   : > { %v2112_v12 = vadd.f32 %v11600_v10, %v13674_v16  ;;  %v1969_v42 = vpop.f32.mrb[15].mxu0  ;;  %v13744_v13 = vsel %vm2142_vm14, %v2110_v3, %v2174_v7 }
 0x1cf   : > { %v2111_v43 = vadd.f32 %v13674_v16, %v1969_v42  ;;  %v13740_v44 = vsel %vm2141_vm15, %v2109_v5, %v2173_v9  ;;  %16264 = vst [vmem:[#allocation12_spill] sm:$0xff] %v13744_v13 }
 0x1d0   : > { %16263 = vst [vmem:[#allocation11_spill] sm:$0xff] %v13740_v44  ;;  %v2176_v11 = vmul.f32 0.2, %v2112_v12  ;;  %11645 = vmatprep.mubr.msk.f32.mxu1 %vm2226_vm3, %v13740_v44  ;;  %vm2144_vm1 = vcmp.ge.f32.partialorder %v2112_v12, 0.0 }
 0x1d1   : > { %vm2143_vm2 = vcmp.ge.f32.partialorder %v2111_v43, 0.0  ;;  %v2175_v14 = vmul.f32 0.2, %v2111_v43  ;;  %v11603_v15 = vpop.f32.mrb[16].mxu0  ;;  %11646 = vmatmul.mubr.msk.f32.gmra.mrb[12].mxu1 %vm2226_vm3, %v13744_v13 }
 0x1d2   : > { %v2114_v17 = vadd.f32 %v11603_v15, %v13674_v16  ;;  %v1979_v18 = vpop.f32.mrb[17].mxu0  ;;  %v13754_v22 = vsel %vm2144_vm1, %v2112_v12, %v2176_v11 }
 0x1d3   : > { %v2113_v19 = vadd.f32 %v13674_v16, %v1979_v18  ;;  %v13750_v20 = vsel %vm2143_vm2, %v2111_v43, %v2175_v14  ;;  %16266 = vst [vmem:[#allocation14_spill] sm:$0xff] %v13754_v22 }
 0x1d4   : > { %16265 = vst [vmem:[#allocation13_spill] sm:$0xff] %v13750_v20  ;;  %v2178_v21 = vmul.f32 0.2, %v2114_v17  ;;  %11648 = vmatprep.mubr.msk.f32.mxu1 %vm2226_vm3, %v13750_v20  ;;  %vm2146_vm4 = vcmp.ge.f32.partialorder %v2114_v17, 0.0 }
 0x1d5   : > { %vm2145_vm5 = vcmp.ge.f32.partialorder %v2113_v19, 0.0  ;;  %v2177_v23 = vmul.f32 0.2, %v2113_v19  ;;  %v11606_v24 = vpop.f32.mrb[18].mxu0  ;;  %11649 = vmatmul.mubr.msk.f32.gmra.mrb[14].mxu1 %vm2226_vm3, %v13754_v22 }
 0x1d6   : > { %v2116_v25 = vadd.f32 %v11606_v24, %v13674_v16  ;;  %v1989_v26 = vpop.f32.mrb[19].mxu0  ;;  %v13764_v32 = vsel %vm2146_vm4, %v2114_v17, %v2178_v21 }
 0x1d7   : > { %v2115_v28 = vadd.f32 %v13674_v16, %v1989_v26  ;;  %v13760_v30 = vsel %vm2145_vm5, %v2113_v19, %v2177_v23  ;;  %16268 = vst [vmem:[#allocation16_spill] sm:$0xff] %v13764_v32 }
 0x1d8   : > { %16267 = vst [vmem:[#allocation15_spill] sm:$0xff] %v13760_v30  ;;  %v2180_v31 = vmul.f32 0.2, %v2116_v25  ;;  %11651 = vmatprep.mubr.msk.f32.mxu1 %vm2226_vm3, %v13760_v30  ;;  %vm2148_vm6 = vcmp.ge.f32.partialorder %v2116_v25, 0.0 }
 0x1d9   : > { %vm2147_vm7 = vcmp.ge.f32.partialorder %v2115_v28, 0.0  ;;  %v2179_v33 = vmul.f32 0.2, %v2115_v28  ;;  %v11609_v34 = vpop.f32.mrb[20].mxu0  ;;  %11652 = vmatmul.mubr.msk.f32.gmra.mrb[16].mxu1 %vm2226_vm3, %v13764_v32 }
 0x1da   : > { %v2118_v36 = vadd.f32 %v11609_v34, %v13674_v16  ;;  %v1999_v38 = vpop.f32.mrb[21].mxu0  ;;  %v13774_v45 = vsel %vm2148_vm6, %v2116_v25, %v2180_v31  ;;  %vm4922_vm6 = vcmask 261120  }
 0x1db   : > { %v2117_v39 = vadd.f32 %v13674_v16, %v1999_v38  ;;  %v13770_v40 = vsel %vm2147_vm7, %v2115_v28, %v2179_v33  ;;  %16270 = vst [vmem:[#allocation18_spill] sm:$0xff] %v13774_v45 }
 0x1dc   : > { %16269 = vst [vmem:[#allocation17_spill] sm:$0xff] %v13770_v40  ;;  %v2182_v41 = vmul.f32 0.2, %v2118_v36  ;;  %11654 = vmatprep.mubr.msk.f32.mxu1 %vm2226_vm3, %v13770_v40  ;;  %vm2150_vm8 = vcmp.ge.f32.partialorder %v2118_v36, 0.0 }
 0x1dd   : > { %vm2149_vm9 = vcmp.ge.f32.partialorder %v2117_v39, 0.0  ;;  %v2181_v47 = vmul.f32 0.2, %v2117_v39  ;;  %v11612_v49 = vpop.f32.mrb[22].mxu0  ;;  %11655 = vmatmul.mubr.msk.f32.gmra.mrb[18].mxu1 %vm2226_vm3, %v13774_v45 }
 0x1de   : > { %v2120_v50 = vadd.f32 %v11612_v49, %v13674_v16  ;;  %v2009_v51 = vpop.f32.mrb[23].mxu0  ;;  %v13784_v57 = vsel %vm2150_vm8, %v2118_v36, %v2182_v41 }
 0x1df   : > { %v2119_v52 = vadd.f32 %v13674_v16, %v2009_v51  ;;  %v13780_v53 = vsel %vm2149_vm9, %v2117_v39, %v2181_v47  ;;  %16272 = vst [vmem:[#allocation20_spill] sm:$0xff] %v13784_v57 }
 0x1e0   : > { %16271 = vst [vmem:[#allocation19_spill] sm:$0xff] %v13780_v53  ;;  %v2184_v55 = vmul.f32 0.2, %v2120_v50  ;;  %11657 = vmatprep.mubr.msk.f32.mxu1 %vm2226_vm3, %v13780_v53  ;;  %vm2152_vm10 = vcmp.ge.f32.partialorder %v2120_v50, 0.0 }
 0x1e1   : > { %vm2151_vm11 = vcmp.ge.f32.partialorder %v2119_v52, 0.0  ;;  %v2183_v58 = vmul.f32 0.2, %v2119_v52  ;;  %v11615_v59 = vpop.f32.mrb[24].mxu0  ;;  %11658 = vmatmul.mubr.msk.f32.gmra.mrb[20].mxu1 %vm2226_vm3, %v13784_v57 }
 0x1e2   : > { %v2122_v60 = vadd.f32 %v11615_v59, %v13674_v16  ;;  %v2019_v61 = vpop.f32.mrb[25].mxu0  ;;  %v13794_v3 = vsel %vm2152_vm10, %v2120_v50, %v2184_v55  ;;  %v9924_v50 = vld [vmem:[%s16283_s24 + $0xb8] sm:$0xff] }
 0x1e3   : > { %v2121_v63 = vadd.f32 %v13674_v16, %v2019_v61  ;;  %v13790_v1 = vsel %vm2151_vm11, %v2119_v52, %v2183_v58  ;;  %16274 = vst [vmem:[#allocation22_spill] sm:$0xff] %v13794_v3 }
 0x1e4   : > { %16273 = vst [vmem:[#allocation21_spill] sm:$0xff] %v13790_v1  ;;  %v2186_v2 = vmul.f32 0.2, %v2122_v60  ;;  %11660 = vmatprep.mubr.msk.f32.mxu1 %vm2226_vm3, %v13790_v1  ;;  %vm2154_vm12 = vcmp.ge.f32.partialorder %v2122_v60, 0.0 }
 0x1e5   : > { %vm2153_vm13 = vcmp.ge.f32.partialorder %v2121_v63, 0.0  ;;  %v2185_v4 = vmul.f32 0.2, %v2121_v63  ;;  %v11618_v5 = vpop.f32.mrb[26].mxu0  ;;  %11661 = vmatmul.mubr.msk.f32.gmra.mrb[22].mxu1 %vm2226_vm3, %v13794_v3 }
 0x1e6   : > { %v2124_v7 = vadd.f32 %v11618_v5, %v13674_v16  ;;  %v2029_v9 = vpop.f32.mrb[27].mxu0  ;;  %v13804_v43 = vsel %vm2154_vm12, %v2122_v60, %v2186_v2 }
 0x1e7   : > { %v2123_v10 = vadd.f32 %v13674_v16, %v2029_v9  ;;  %v13800_v12 = vsel %vm2153_vm13, %v2121_v63, %v2185_v4  ;;  %16276 = vst [vmem:[#allocation24_spill] sm:$0xff] %v13804_v43 }
 0x1e8   : > { %16275 = vst [vmem:[#allocation23_spill] sm:$0xff] %v13800_v12  ;;  %v2188_v42 = vmul.f32 0.2, %v2124_v7  ;;  %11663 = vmatprep.mubr.msk.f32.mxu1 %vm2226_vm3, %v13800_v12  ;;  %vm2156_vm14 = vcmp.ge.f32.partialorder %v2124_v7, 0.0 }
 0x1e9   : > { %vm2155_vm15 = vcmp.ge.f32.partialorder %v2123_v10, 0.0  ;;  %v2187_v11 = vmul.f32 0.2, %v2123_v10  ;;  %v11621_v14 = vpop.f32.mrb[28].mxu0  ;;  %11664 = vmatmul.mubr.msk.f32.gmra.mrb[24].mxu1 %vm2226_vm3, %v13804_v43 }
 0x1ea   : > { %v2126_v15 = vadd.f32 %v11621_v14, %v13674_v16  ;;  %v2039_v17 = vpop.f32.mrb[29].mxu0  ;;  %v13814_v23 = vsel %vm2156_vm14, %v2124_v7, %v2188_v42 }
 0x1eb   : > { %v2125_v18 = vadd.f32 %v13674_v16, %v2039_v17  ;;  %v13810_v19 = vsel %vm2155_vm15, %v2123_v10, %v2187_v11  ;;  %16278 = vst [vmem:[#allocation26_spill] sm:$0xff] %v13814_v23  ;;  %vm5813_vm15 = vcmask 523264  }
 0x1ec   : > { %16277 = vst [vmem:[#allocation25_spill] sm:$0xff] %v13810_v19  ;;  %v2190_v21 = vmul.f32 0.2, %v2126_v15  ;;  %11666 = vmatprep.mubr.msk.f32.mxu1 %vm2226_vm3, %v13810_v19  ;;  %vm2158_vm1 = vcmp.ge.f32.partialorder %v2126_v15, 0.0 }
 0x1ed   : > { %vm2157_vm2 = vcmp.ge.f32.partialorder %v2125_v18, 0.0  ;;  %v2189_v24 = vmul.f32 0.2, %v2125_v18  ;;  %v11624_v25 = vpop.f32.mrb[30].mxu0  ;;  %11667 = vmatmul.mubr.msk.f32.gmra.mrb[26].mxu1 %vm2226_vm3, %v13814_v23 }
 0x1ee   : > { %v2128_v26 = vadd.f32 %v11624_v25, %v13674_v16  ;;  %v2049_v28 = vpop.f32.mrb[31].mxu0  ;;  %v13824_v36 = vsel %vm2158_vm1, %v2126_v15, %v2190_v21  ;;  %vm6801_vm1 = vcmask 520192  }
 0x1ef   : > { %v2127_v31 = vadd.f32 %v13674_v16, %v2049_v28  ;;  %v13820_v33 = vsel %vm2157_vm2, %v2125_v18, %v2189_v24  ;;  %16280 = vst [vmem:[#allocation28_spill] sm:$0xff] %v13824_v36 }
 0x1f0   : > { %16279 = vst [vmem:[#allocation27_spill] sm:$0xff] %v13820_v33  ;;  %v2192_v34 = vmul.f32 0.2, %v2128_v26  ;;  %11669 = vmatprep.mubr.msk.f32.mxu1 %vm2226_vm3, %v13820_v33  ;;  %vm2160_vm4 = vcmp.ge.f32.partialorder %v2128_v26, 0.0 }
 0x1f1   : > { %vm2159_vm5 = vcmp.ge.f32.partialorder %v2127_v31, 0.0  ;;  %v2191_v38 = vmul.f32 0.2, %v2127_v31  ;;  %11670 = vmatmul.mubr.msk.f32.gmra.mrb[28].mxu1 %vm2226_vm3, %v13824_v36 }
 0x1f2   : > { %v13832_v16 = vsel %vm2160_vm4, %v2128_v26, %v2192_v34 }
 0x1f3   : > { %v13828_v39 = vsel %vm2159_vm5, %v2127_v31, %v2191_v38  ;;  %16282 = vst [vmem:[#allocation30_spill] sm:$0xff] %v13832_v16 }
 0x1f4   : > { %16281 = vst [vmem:[#allocation29_spill] sm:$0xff] %v13828_v39  ;;  %11672 = vmatprep.mubr.msk.f32.mxu1 %vm2226_vm3, %v13828_v39 }
 0x1f5   : > { %11673 = vmatmul.mubr.msk.f32.gmra.mrb[30].mxu1 %vm2226_vm3, %v13832_v16 }
 0x1f6   : > { %11677 = vmatprep.mubr.msk.f32.mxu1 %vm2226_vm3, %v13680_v27 }
 0x1f9   : > { %11678 = vmatmul.mubr.msk.f32.vlgmr.msra.gmra.mrb[32].mxu1 %vm2226_vm3, %v13684_v29 }
 0x1fa   : > { %11680 = vmatprep.mubr.msk.f32.mxu1 %vm2226_vm3, %v13690_v35 }
 0x1fd   : > { %11681 = vmatmul.mubr.msk.f32.gmra.mrb[34].mxu1 %vm2226_vm3, %v13694_v37 }
 0x1fe   : > { %11683 = vmatprep.mubr.msk.f32.mxu1 %vm2226_vm3, %v13700_v46 }
 0x201   : > { %11684 = vmatmul.mubr.msk.f32.gmra.mrb[36].mxu1 %vm2226_vm3, %v13704_v48 }
 0x202   : > { %11686 = vmatprep.mubr.msk.f32.mxu1 %vm2226_vm3, %v13710_v54 }
 0x205   : > { %11687 = vmatmul.mubr.msk.f32.gmra.mrb[38].mxu1 %vm2226_vm3, %v13714_v56 }
 0x206   : > { %11689 = vmatprep.mubr.msk.f32.mxu1 %vm2226_vm3, %v13720_v62 }
 0x209   : > { %11690 = vmatmul.mubr.msk.f32.gmra.mrb[40].mxu1 %vm2226_vm3, %v13724_v0 }
 0x20a   : > { %11692 = vmatprep.mubr.msk.f32.mxu1 %vm2226_vm3, %v13730_v6 }
 0x20d   : > { %11693 = vmatmul.mubr.msk.f32.gmra.mrb[42].mxu1 %vm2226_vm3, %v13734_v8 }
 0x20e   : > { %11695 = vmatprep.mubr.msk.f32.mxu1 %vm2226_vm3, %v13740_v44 }
 0x211   : > { %11696 = vmatmul.mubr.msk.f32.gmra.mrb[44].mxu1 %vm2226_vm3, %v13744_v13 }
 0x212   : > { %11698 = vmatprep.mubr.msk.f32.mxu1 %vm2226_vm3, %v13750_v20 }
 0x215   : > { %11699 = vmatmul.mubr.msk.f32.gmra.mrb[46].mxu1 %vm2226_vm3, %v13754_v22 }
 0x216   : > { %11701 = vmatprep.mubr.msk.f32.mxu1 %vm2226_vm3, %v13760_v30 }
 0x219   : > { %11702 = vmatmul.mubr.msk.f32.gmra.mrb[48].mxu1 %vm2226_vm3, %v13764_v32 }
 0x21a   : > { %11704 = vmatprep.mubr.msk.f32.mxu1 %vm2226_vm3, %v13770_v40 }
 0x21d   : > { %11705 = vmatmul.mubr.msk.f32.gmra.mrb[50].mxu1 %vm2226_vm3, %v13774_v45 }
 0x21e   : > { %11707 = vmatprep.mubr.msk.f32.mxu1 %vm2226_vm3, %v13780_v53 }
 0x221   : > { %11708 = vmatmul.mubr.msk.f32.gmra.mrb[52].mxu1 %vm2226_vm3, %v13784_v57 }
 0x222   : > { %11710 = vmatprep.mubr.msk.f32.mxu1 %vm2226_vm3, %v13790_v1 }
 0x225   : > { %11711 = vmatmul.mubr.msk.f32.gmra.mrb[54].mxu1 %vm2226_vm3, %v13794_v3 }
 0x226   : > { %11713 = vmatprep.mubr.msk.f32.mxu1 %vm2226_vm3, %v13800_v12 }
 0x229   : > { %11714 = vmatmul.mubr.msk.f32.gmra.mrb[56].mxu1 %vm2226_vm3, %v13804_v43 }
 0x22a   : > { %11716 = vmatprep.mubr.msk.f32.mxu1 %vm2226_vm3, %v13810_v19 }
 0x22d   : > { %11717 = vmatmul.mubr.msk.f32.gmra.mrb[58].mxu1 %vm2226_vm3, %v13814_v23 }
 0x22e   : > { %11719 = vmatprep.mubr.msk.f32.mxu1 %vm2226_vm3, %v13820_v33 }
 0x231   : > { %11720 = vmatmul.mubr.msk.f32.gmra.mrb[60].mxu1 %vm2226_vm3, %v13824_v36 }
 0x232   : > { %11722 = vmatprep.mubr.msk.f32.mxu1 %vm2226_vm3, %v13828_v39 }
 0x235   : > { %11723 = vmatmul.mubr.msk.f32.gmra.mrb[62].mxu1 %vm2226_vm3, %v13832_v16 }
 0x236   : > { %2884 = vmatprep.mubr.f32.mxu1 %v9924_v50 }
 0x28c   : > { %v13900_v41 = vpop.f32.mrb[0].mxu1 }
 0x28d   : > { %v13902_v47 = vpop.f32.mrb[1].mxu1 }
 0x290   : > { %v13909_v51 = vpop.f32.mrb[2].mxu1 }
 0x291   : > { %v13911_v52 = vpop.f32.mrb[3].mxu1 }
 0x294   : > { %v13915_v58 = vpop.f32.mrb[4].mxu1 }
 0x295   : > { %v13917_v59 = vpop.f32.mrb[5].mxu1 }
 0x298   : > { %v13921_v61 = vpop.f32.mrb[6].mxu1 }
 0x299   : > { %v13923_v63 = vpop.f32.mrb[7].mxu1 }
 0x29c   : > { %v13927_v4 = vpop.f32.mrb[8].mxu1 }
 0x29d   : > { %v13929_v5 = vpop.f32.mrb[9].mxu1 }
 0x2a0   : > { %v13933_v9 = vpop.f32.mrb[10].mxu1 }
 0x2a1   : > { %v13935_v10 = vpop.f32.mrb[11].mxu1 }
 0x2a4   : > { %v13939_v11 = vpop.f32.mrb[12].mxu1 }
 0x2a5   : > { %v13941_v14 = vpop.f32.mrb[13].mxu1 }
 0x2a8   : > { %v13945_v17 = vpop.f32.mrb[14].mxu1 }
 0x2a9   : > { %v13947_v18 = vpop.f32.mrb[15].mxu1 }
 0x2ac   : > { %v13951_v24 = vpop.f32.mrb[16].mxu1 }
 0x2ad   : > { %v13953_v25 = vpop.f32.mrb[17].mxu1 }
 0x2b0   : > { %v13957_v28 = vpop.f32.mrb[18].mxu1 }
 0x2b1   : > { %v13959_v31 = vpop.f32.mrb[19].mxu1 }
 0x2b4   : > { %v13963_v38 = vpop.f32.mrb[20].mxu1 }
 0x2b5   : > { %v13965_v50 = vpop.f32.mrb[21].mxu1 }
 0x2b8   : > { %v13969_v15 = vpop.f32.mrb[22].mxu1 }
 0x2b9   : > { %v13971_v42 = vpop.f32.mrb[23].mxu1 }
 0x2bc   : > { %v13975_v2 = vpop.f32.mrb[24].mxu1 }
 0x2bd   : > { %v13977_v60 = vpop.f32.mrb[25].mxu1 }
 0x2c0   : > { %v13981_v34 = vpop.f32.mrb[26].mxu1 }
 0x2c1   : > { %v13983_v49 = vpop.f32.mrb[27].mxu1 }
 0x2c4   : > { %v13987_v26 = vpop.f32.mrb[28].mxu1 }
 0x2c5   : > { %v13989_v16 = vpop.f32.mrb[29].mxu1 }
 0x2c8   : > { %v13993_v39 = vpop.f32.mrb[30].mxu1 }
 0x2c9   : > { %v13995_v36 = vpop.f32.mrb[31].mxu1 }
 0x2cc   : > { %v11679_v33 = vpop.f32.mrb[32].mxu1 }
 0x2cd   : > { %v2638_v23 = vpop.f32.mrb[33].mxu1 }
 0x2ce   : > { %v12363_v19 = vpack.c.bf16 %v11679_v33, %v2638_v23 }
 0x2d0   : > { %v11682_v43 = vpop.f32.mrb[34].mxu1 }
 0x2d1   : > { %v2648_v12 = vpop.f32.mrb[35].mxu1 }
 0x2d2   : > { %v12367_v21 = vpack.c.bf16 %v11682_v43, %v2648_v12 }
 0x2d4   : > { %v11685_v3 = vpop.f32.mrb[36].mxu1 }
 0x2d5   : > { %v2658_v1 = vpop.f32.mrb[37].mxu1 }
 0x2d6   : > { %v12371_v57 = vpack.c.bf16 %v11685_v3, %v2658_v1 }
 0x2d8   : > { %v11688_v53 = vpop.f32.mrb[38].mxu1 }
 0x2d9   : > { %v2668_v45 = vpop.f32.mrb[39].mxu1 }
 0x2da   : > { %v12375_v40 = vpack.c.bf16 %v11688_v53, %v2668_v45 }
 0x2dc   : > { %v11691_v7 = vpop.f32.mrb[40].mxu1 }
 0x2dd   : > { %v2678_v32 = vpop.f32.mrb[41].mxu1 }
 0x2de   : > { %v12379_v30 = vpack.c.bf16 %v11691_v7, %v2678_v32 }
 0x2e0   : > { %v11694_v22 = vpop.f32.mrb[42].mxu1 }
 0x2e1   : > { %v2688_v20 = vpop.f32.mrb[43].mxu1 }
 0x2e2   : > { %v12383_v13 = vpack.c.bf16 %v11694_v22, %v2688_v20 }
 0x2e4   : > { %v11697_v44 = vpop.f32.mrb[44].mxu1 }
 0x2e5   : > { %v2698_v55 = vpop.f32.mrb[45].mxu1 }
 0x2e6   : > { %v12387_v8 = vpack.c.bf16 %v11697_v44, %v2698_v55 }
 0x2e8   : > { %v11700_v6 = vpop.f32.mrb[46].mxu1 }
 0x2e9   : > { %v2708_v23 = vpop.f32.mrb[47].mxu1 }
 0x2ea   : > { %v12391_v33 = vpack.c.bf16 %v11700_v6, %v2708_v23 }
 0x2ec   : > { %v11703_v0 = vpop.f32.mrb[48].mxu1 }
 0x2ed   : > { %v2718_v12 = vpop.f32.mrb[49].mxu1 }
 0x2ee   : > { %v12361_v43 = vpack.c.bf16 %v11703_v0, %v2718_v12 }
 0x2f0   : > { %v11706_v62 = vpop.f32.mrb[50].mxu1  ;;  %12362 = vmatprep.subr.bf16.mxu1 %v12361_v43 }
 0x2f1   : > { %v2728_v1 = vpop.f32.mrb[51].mxu1  ;;  %12364 = vmatpush3.bf16.msra.mxu1 %v12363_v19 }
 0x2f2   : > { %v12365_v45 = vpack.c.bf16 %v11706_v62, %v2728_v1 }
 0x2f4   : > { %v11709_v53 = vpop.f32.mrb[52].mxu1  ;;  %12366 = vmatprep.subr.bf16.mxu1 %v12365_v45  ;;  %v16285_v45 = vpack.c.bf16 %v13900_v41, %v13902_v47  ;;  %v9927_v41 = vld [vmem:[%s16283_s24 + $0xd0] sm:$0xff]  ;;  %v16288_v47 = vpack.c.bf16 %v13963_v38, %v13965_v50  ;;  %v9932_v38 = vld [vmem:[%s16283_s24 + $0xf8] sm:$0xff]  ;;  %v16291_v50 = vpack.c.bf16 %v13921_v61, %v13923_v63  ;;  %v9933_v61 = vld [vmem:[%s16283_s24 + $0x100] sm:$0xff]  ;;  %v16294_v63 = vpack.c.bf16 %v13981_v34, %v13983_v49 }
 0x2f5   : > { %v2738_v32 = vpop.f32.mrb[53].mxu1  ;;  %12368 = vmatpush3.bf16.msra.mxu1 %v12367_v21  ;;  %v9938_v49 = vld [vmem:[%s16283_s24 + $0x128] sm:$0xff]  ;;  %v16297_v34 = vpack.c.bf16 %v13939_v11, %v13941_v14  ;;  %v16299_v11 = vpack.c.bf16 %v13945_v17, %v13947_v18  ;;  %v9939_v14 = vld [vmem:[%s16283_s24 + $0x130] sm:$0xff]  ;;  %v9944_v17 = vld [vmem:[%s16283_s24 + $0x158] sm:$0x1] }
 0x2f6   : > { %v12369_v3 = vpack.c.bf16 %v11709_v53, %v2738_v32  ;;  %v9943_v18 = vld [vmem:[%s16283_s24 + $0x150] sm:$0x1]  ;;  %v2549_v53 = vld [vmem:[%s16283_s24 + $0x8] sm:$0xff]  ;;  %v2548_v32 = vld [vmem:[%s16283_s24] sm:$0xff] }
 0x2f8   : > { %v11712_v20 = vpop.f32.mrb[54].mxu1  ;;  %12370 = vmatprep.subr.bf16.mxu1 %v12369_v3  ;;  %v2551_v3 = vld [vmem:[%s16283_s24 + $0x18] sm:$0xff] }
 0x2f9   : > { %v2748_v22 = vpop.f32.mrb[55].mxu1  ;;  %12372 = vmatpush3.bf16.msra.mxu1 %v12371_v57 }
 0x2fa   : > { %v12373_v44 = vpack.c.bf16 %v11712_v20, %v2748_v22  ;;  %v10000_v20 = vld [vmem:[%s16186_s4 + $0x18] sm:$0xff]  ;;  %v2550_v22 = vld [vmem:[%s16283_s24 + $0x10] sm:$0xff] }
 0x2fc   : > { %v11715_v55 = vpop.f32.mrb[56].mxu1  ;;  %12374 = vmatprep.subr.bf16.mxu1 %v12373_v44  ;;  %v2553_v44 = vld [vmem:[%s16283_s24 + $0x28] sm:$0xff] }
 0x2fd   : > { %v2758_v6 = vpop.f32.mrb[57].mxu1  ;;  %12376 = vmatpush3.bf16.msra.mxu1 %v12375_v40  ;;  %v9923_v40 = vld [vmem:[%s16283_s24 + $0xb0] sm:$0xff] }
 0x2fe   : > { %v12377_v0 = vpack.c.bf16 %v11715_v55, %v2758_v6  ;;  %v2552_v55 = vld [vmem:[%s16283_s24 + $0x20] sm:$0xff]  ;;  %v2555_v6 = vld [vmem:[%s16283_s24 + $0x38] sm:$0xff] }
 0x300   : > { %v11718_v7 = vpop.f32.mrb[58].mxu1  ;;  %12378 = vmatprep.subr.bf16.mxu1 %v12377_v0  ;;  %v2554_v0 = vld [vmem:[%s16283_s24 + $0x30] sm:$0xff] }
 0x301   : > { %v2768_v23 = vpop.f32.mrb[59].mxu1  ;;  %12380 = vmatpush3.bf16.msra.mxu1 %v12379_v30  ;;  %v16284_v30 = vpack.c.bf16 %v13951_v24, %v13953_v25  ;;  %v9928_v24 = vld [vmem:[%s16283_s24 + $0xd8] sm:$0xff]  ;;  %v16287_v25 = vpack.c.bf16 %v13909_v51, %v13911_v52  ;;  %v9929_v51 = vld [vmem:[%s16283_s24 + $0xe0] sm:$0xff]  ;;  %v16290_v52 = vpack.c.bf16 %v13969_v15, %v13971_v42  ;;  %v9934_v42 = vld [vmem:[%s16283_s24 + $0x108] sm:$0xff]  ;;  %v16293_v15 = vpack.c.bf16 %v13927_v4, %v13929_v5 }
 0x302   : > { %v12381_v62 = vpack.c.bf16 %v11718_v7, %v2768_v23  ;;  %v9935_v4 = vld [vmem:[%s16283_s24 + $0x110] sm:$0xff]  ;;  %v16296_v5 = vpack.c.bf16 %v13987_v26, %v13989_v16  ;;  %v9940_v16 = vld [vmem:[%s16283_s24 + $0x138] sm:$0xff]  ;;  %v2557_v7 = vld [vmem:[%s16283_s24 + $0x48] sm:$0xff] }
 0x303   : > { %v9945_v26 = vld [vmem:[%s16186_s4 + $0x10] sm:$0xff]  ;;  %v2556_v23 = vld [vmem:[%s16283_s24 + $0x40] sm:$0xff] }
 0x304   : > { %v11721_v19 = vpop.f32.mrb[60].mxu1  ;;  %12382 = vmatprep.subr.bf16.mxu1 %v12381_v62  ;;  %v2559_v62 = vld [vmem:[%s16283_s24 + $0x58] sm:$0xff] }
 0x305   : > { %v2778_v12 = vpop.f32.mrb[61].mxu1  ;;  %12384 = vmatpush3.bf16.msra.mxu1 %v12383_v13  ;;  %v9926_v13 = vld [vmem:[%s16283_s24 + $0xc8] sm:$0xff] }
 0x306   : > { %v12385_v21 = vpack.c.bf16 %v11721_v19, %v2778_v12  ;;  %v2558_v19 = vld [vmem:[%s16283_s24 + $0x50] sm:$0xff]  ;;  %v2561_v12 = vld [vmem:[%s16283_s24 + $0x68] sm:$0xff] }
 0x308   : > { %v11724_v43 = vpop.f32.mrb[62].mxu1  ;;  %12386 = vmatprep.subr.bf16.mxu1 %v12385_v21  ;;  %v2560_v21 = vld [vmem:[%s16283_s24 + $0x60] sm:$0xff] }
 0x309   : > { %v2788_v1 = vpop.f32.mrb[63].mxu1  ;;  %12388 = vmatpush3.bf16.msra.mxu1 %v12387_v8  ;;  %v9925_v8 = vld [vmem:[%s16283_s24 + $0xc0] sm:$0xff] }
 0x30a   : > { %v12389_v57 = vpack.c.bf16 %v11724_v43, %v2788_v1  ;;  %v2563_v43 = vld [vmem:[%s16283_s24 + $0x78] sm:$0xff]  ;;  %v2562_v1 = vld [vmem:[%s16283_s24 + $0x70] sm:$0xff] }
 0x30c   : > { %12390 = vmatprep.subr.bf16.mxu1 %v12389_v57  ;;  %v2565_v57 = vld [vmem:[%s16283_s24 + $0x88] sm:$0xff] }
 0x30d   : > { %12392 = vmatpush3.bf16.msra.mxu1 %v12391_v33  ;;  %v16286_v33 = vpack.c.bf16 %v13957_v28, %v13959_v31  ;;  %v9930_v28 = vld [vmem:[%s16283_s24 + $0xe8] sm:$0xff]  ;;  %v16289_v31 = vpack.c.bf16 %v13915_v58, %v13917_v59  ;;  %v9931_v58 = vld [vmem:[%s16283_s24 + $0xf0] sm:$0xff]  ;;  %v16292_v59 = vpack.c.bf16 %v13975_v2, %v13977_v60  ;;  %v9936_v60 = vld [vmem:[%s16283_s24 + $0x118] sm:$0xff]  ;;  %v16295_v2 = vpack.c.bf16 %v13933_v9, %v13935_v10 }
 0x30e   : > { %12394 = vmatprep.subr.bf16.mxu1 %v16284_v30  ;;  %v9937_v9 = vld [vmem:[%s16283_s24 + $0x120] sm:$0xff]  ;;  %v16298_v10 = vpack.c.bf16 %v13993_v39, %v13995_v36  ;;  %v9942_v36 = vld [vmem:[%s16283_s24 + $0x148] sm:$0xff]  ;;  %v2567_v30 = vld [vmem:[%s16283_s24 + $0x98] sm:$0xff] }
 0x30f   : > { %v9941_v39 = vld [vmem:[%s16283_s24 + $0x140] sm:$0xff] }
 0x310   : > { %2885 = vmatmul.mubr.f32.vlgmr.msra.gmra.mrb[64].mxu1 %v9923_v40  ;;  %v2564_v40 = vld [vmem:[%s16283_s24 + $0x80] sm:$0xff] }
 0x311   : > { %12396 = vmatpush3.bf16.msra.mxu1 %v16285_v45  ;;  %2889 = vmatprep.mubr.f32.mxu1 %v9926_v13  ;;  %v2566_v13 = vld [vmem:[%s16283_s24 + $0x90] sm:$0xff]  ;;  %v2569_v45 = vld [vmem:[%s16283_s24 + $0xa8] sm:$0x1] }
 0x312   : > { %12398 = vmatprep.subr.bf16.mxu1 %v16286_v33  ;;  %v16300_v33 = vld [vmem:[#allocation7_spill] sm:$0xff] }
 0x314   : > { %2890 = vmatmul.mubr.f32.gmra.mrb[66].mxu1 %v9925_v8  ;;  %v2568_v8 = vld [vmem:[%s16283_s24 + $0xa0] sm:$0x1] }
 0x315   : > { %12400 = vmatpush3.bf16.msra.mxu1 %v16287_v25  ;;  %2894 = vmatprep.mubr.f32.mxu1 %v9928_v24  ;;  %v16301_v24 = vld [vmem:[#allocation8_spill] sm:$0xff]  ;;  %v16302_v25 = vld [vmem:[#allocation9_spill] sm:$0xff] }
 0x316   : > { %12402 = vmatprep.subr.bf16.mxu1 %v16288_v47  ;;  %v16304_v47 = vld [vmem:[#allocation11_spill] sm:$0xff] }
 0x318   : > { %2895 = vmatmul.mubr.f32.gmra.mrb[68].mxu1 %v9927_v41  ;;  %v16303_v41 = vld [vmem:[#allocation10_spill] sm:$0xff] }
 0x319   : > { %12404 = vmatpush3.bf16.msra.mxu1 %v16289_v31  ;;  %2899 = vmatprep.mubr.f32.mxu1 %v9930_v28  ;;  %v16305_v28 = vld [vmem:[#allocation12_spill] sm:$0xff]  ;;  %v16306_v31 = vld [vmem:[#allocation13_spill] sm:$0xff] }
 0x31a   : > { %12406 = vmatprep.subr.bf16.mxu1 %v16290_v52  ;;  %v16308_v52 = vld [vmem:[#allocation15_spill] sm:$0xff] }
 0x31c   : > { %2900 = vmatmul.mubr.f32.gmra.mrb[70].mxu1 %v9929_v51  ;;  %v16307_v51 = vld [vmem:[#allocation14_spill] sm:$0xff] }
 0x31d   : > { %12408 = vmatpush3.bf16.msra.mxu1 %v16291_v50  ;;  %2904 = vmatprep.mubr.f32.mxu1 %v9932_v38  ;;  %v16309_v38 = vld [vmem:[#allocation16_spill] sm:$0xff]  ;;  %v16310_v50 = vld [vmem:[#allocation17_spill] sm:$0xff] }
 0x31e   : > { %12410 = vmatprep.subr.bf16.mxu1 %v16292_v59  ;;  %v16312_v59 = vld [vmem:[#allocation19_spill] sm:$0xff] }
 0x320   : > { %2905 = vmatmul.mubr.f32.gmra.mrb[72].mxu1 %v9931_v58  ;;  %v16311_v58 = vld [vmem:[#allocation18_spill] sm:$0xff] }
 0x321   : > { %12412 = vmatpush3.bf16.msra.mxu1 %v16293_v15  ;;  %2909 = vmatprep.mubr.f32.mxu1 %v9934_v42  ;;  %v16313_v42 = vld [vmem:[#allocation20_spill] sm:$0xff]  ;;  %v16314_v15 = vld [vmem:[#allocation21_spill] sm:$0xff] }
 0x322   : > { %12414 = vmatprep.subr.bf16.mxu1 %v16294_v63  ;;  %v16316_v63 = vld [vmem:[#allocation23_spill] sm:$0xff] }
 0x324   : > { %2910 = vmatmul.mubr.f32.gmra.mrb[74].mxu1 %v9933_v61  ;;  %v16315_v61 = vld [vmem:[#allocation22_spill] sm:$0xff] }
 0x325   : > { %12416 = vmatpush3.bf16.msra.mxu1 %v16295_v2  ;;  %2914 = vmatprep.mubr.f32.mxu1 %v9936_v60  ;;  %v16317_v60 = vld [vmem:[#allocation24_spill] sm:$0xff]  ;;  %v16318_v2 = vld [vmem:[#allocation25_spill] sm:$0xff] }
 0x326   : > { %12418 = vmatprep.subr.bf16.mxu1 %v16296_v5  ;;  %v16320_v5 = vld [vmem:[#allocation27_spill] sm:$0xff] }
 0x328   : > { %2915 = vmatmul.mubr.f32.gmra.mrb[76].mxu1 %v9935_v4  ;;  %v16319_v4 = vld [vmem:[#allocation26_spill] sm:$0xff] }
 0x329   : > { %12420 = vmatpush3.bf16.msra.mxu1 %v16297_v34  ;;  %2919 = vmatprep.mubr.f32.mxu1 %v9938_v49  ;;  %v16321_v49 = vld [vmem:[#allocation28_spill] sm:$0xff]  ;;  %v16322_v34 = vld [vmem:[#allocation29_spill] sm:$0xff] }
 0x32a   : > { %12422 = vmatprep.subr.bf16.mxu1 %v16298_v10 }
 0x32c   : > { %2920 = vmatmul.mubr.f32.gmra.mrb[78].mxu1 %v9937_v9  ;;  %v16323_v9 = vld [vmem:[#allocation30_spill] sm:$0xff] }
 0x32d   : > { %12424 = vmatpush3.bf16.msra.mxu1 %v16299_v11  ;;  %2924 = vmatprep.mubr.f32.mxu1 %v9940_v16 }
 0x32e   : > { %11725 = vmatprep.subr.mxu1 %v9945_v26 }
 0x330   : > { %2925 = vmatmul.mubr.f32.gmra.mrb[80].mxu1 %v9939_v14 }
 0x331   : > { %2929 = vmatprep.mubr.f32.mxu1 %v9942_v36 }
 0x334   : > { %2930 = vmatmul.mubr.f32.gmra.mrb[82].mxu1 %v9941_v39 }
 0x335   : > { %2934 = vmatprep.mubr.f32.mxu1 %v9944_v17 }
 0x338   : > { %2935 = vmatmul.mubr.f32.gmra.mrb[84].mxu1 %v9943_v18 }
 0x339   : > { %3004 = vmatprep.mubr.f32.mxu1 %v2549_v53 }
 0x33c   : > { %3005 = vmatmul.mubr.f32.vlgmr.msra.gmra.mrb[86].mxu1 %v2548_v32 }
 0x33d   : > { %3009 = vmatprep.mubr.f32.mxu1 %v2551_v3  ;;  %11726 = vmatpush3.msra.mxu1 %v9945_v26 }
 0x33e   : > { %11775 = vmatprep.subr.mxu1 %v10000_v20 }
 0x340   : > { %3010 = vmatmul.mubr.f32.gmra.mrb[88].mxu1 %v2550_v22  ;;  %v9979_v22 = vld [vmem:[%s16283_s24 + $0x168] sm:$0xff] }
 0x341   : > { %3014 = vmatprep.mubr.f32.mxu1 %v2553_v44  ;;  %3374 = vmatprep.mubr.f32.mxu0 %v9979_v22 }
 0x344   : > { %3015 = vmatmul.mubr.f32.gmra.mrb[90].mxu1 %v2552_v55 }
 0x345   : > { %3019 = vmatprep.mubr.f32.mxu1 %v2555_v6 }
 0x348   : > { %3020 = vmatmul.mubr.f32.gmra.mrb[92].mxu1 %v2554_v0 }
 0x349   : > { %3024 = vmatprep.mubr.f32.mxu1 %v2557_v7 }
 0x34c   : > { %3025 = vmatmul.mubr.f32.gmra.mrb[94].mxu1 %v2556_v23 }
 0x34d   : > { %3029 = vmatprep.mubr.f32.mxu1 %v2559_v62 }
 0x350   : > { %3030 = vmatmul.mubr.f32.gmra.mrb[96].mxu1 %v2558_v19 }
 0x351   : > { %3034 = vmatprep.mubr.f32.mxu1 %v2561_v12 }
 0x354   : > { %3035 = vmatmul.mubr.f32.gmra.mrb[98].mxu1 %v2560_v21 }
 0x355   : > { %3039 = vmatprep.mubr.f32.mxu1 %v2563_v43 }
 0x358   : > { %3040 = vmatmul.mubr.f32.gmra.mrb[100].mxu1 %v2562_v1 }
 0x359   : > { %3044 = vmatprep.mubr.f32.mxu1 %v2565_v57 }
 0x35c   : > { %3045 = vmatmul.mubr.f32.gmra.mrb[102].mxu1 %v2564_v40 }
 0x35d   : > { %3049 = vmatprep.mubr.f32.mxu1 %v2567_v30 }
 0x360   : > { %3050 = vmatmul.mubr.f32.gmra.mrb[104].mxu1 %v2566_v13 }
 0x361   : > { %3054 = vmatprep.mubr.f32.mxu1 %v2569_v45 }
 0x364   : > { %3055 = vmatmul.mubr.f32.gmra.mrb[106].mxu1 %v2568_v8 }
 0x365   : > { %11727 = vmatprep.mubr.msk.f32.mxu1 %vm2226_vm3, %v13680_v27 }
 0x368   : > { %11728 = vmatmul.mubr.msk.f32.vlgmr.msra.gmra.mrb[108].mxu1 %vm2226_vm3, %v13684_v29 }
 0x369   : > { %11730 = vmatprep.mubr.msk.f32.mxu1 %vm2226_vm3, %v13690_v35  ;;  %11776 = vmatpush3.msra.mxu1 %v10000_v20 }
 0x36c   : > { %11731 = vmatmul.mubr.msk.f32.gmra.mrb[110].mxu1 %vm2226_vm3, %v13694_v37 }
 0x36d   : > { %11733 = vmatprep.mubr.msk.f32.mxu1 %vm2226_vm3, %v13700_v46 }
 0x370   : > { %11734 = vmatmul.mubr.msk.f32.gmra.mrb[112].mxu1 %vm2226_vm3, %v13704_v48 }
 0x371   : > { %11736 = vmatprep.mubr.msk.f32.mxu1 %vm2226_vm3, %v13710_v54 }
 0x374   : > { %11737 = vmatmul.mubr.msk.f32.gmra.mrb[114].mxu1 %vm2226_vm3, %v13714_v56 }
 0x375   : > { %11739 = vmatprep.mubr.msk.f32.mxu1 %vm2226_vm3, %v16300_v33 }
 0x378   : > { %11740 = vmatmul.mubr.msk.f32.gmra.mrb[116].mxu1 %vm2226_vm3, %v16301_v24 }
 0x379   : > { %11742 = vmatprep.mubr.msk.f32.mxu1 %vm2226_vm3, %v16302_v25 }
 0x37c   : > { %11743 = vmatmul.mubr.msk.f32.gmra.mrb[118].mxu1 %vm2226_vm3, %v16303_v41 }
 0x37d   : > { %11745 = vmatprep.mubr.msk.f32.mxu1 %vm2226_vm3, %v16304_v47 }
 0x380   : > { %11746 = vmatmul.mubr.msk.f32.gmra.mrb[120].mxu1 %vm2226_vm3, %v16305_v28 }
 0x381   : > { %11748 = vmatprep.mubr.msk.f32.mxu1 %vm2226_vm3, %v16306_v31 }
 0x384   : > { %11749 = vmatmul.mubr.msk.f32.gmra.mrb[122].mxu1 %vm2226_vm3, %v16307_v51 }
 0x385   : > { %11751 = vmatprep.mubr.msk.f32.mxu1 %vm2226_vm3, %v16308_v52 }
 0x388   : > { %11752 = vmatmul.mubr.msk.f32.gmra.mrb[124].mxu1 %vm2226_vm3, %v16309_v38 }
 0x389   : > { %11754 = vmatprep.mubr.msk.f32.mxu1 %vm2226_vm3, %v16310_v50 }
 0x38c   : > { %11755 = vmatmul.mubr.msk.f32.gmra.mrb[126].mxu1 %vm2226_vm3, %v16311_v58 }
 0x38d   : > { %11757 = vmatprep.mubr.msk.f32.mxu1 %vm2226_vm3, %v16312_v59 }
 0x390   : > { %11758 = vmatmul.mubr.msk.f32.gmra.mrb[128].mxu1 %vm2226_vm3, %v16313_v42 }
 0x391   : > { %11760 = vmatprep.mubr.msk.f32.mxu1 %vm2226_vm3, %v16314_v15 }
 0x394   : > { %11761 = vmatmul.mubr.msk.f32.gmra.mrb[130].mxu1 %vm2226_vm3, %v16315_v61 }
 0x395   : > { %11763 = vmatprep.mubr.msk.f32.mxu1 %vm2226_vm3, %v16316_v63 }
 0x398   : > { %11764 = vmatmul.mubr.msk.f32.gmra.mrb[132].mxu1 %vm2226_vm3, %v16317_v60 }
 0x399   : > { %11766 = vmatprep.mubr.msk.f32.mxu1 %vm2226_vm3, %v16318_v2 }
 0x39c   : > { %11767 = vmatmul.mubr.msk.f32.gmra.mrb[134].mxu1 %vm2226_vm3, %v16319_v4 }
 0x39d   : > { %11769 = vmatprep.mubr.msk.f32.mxu1 %vm2226_vm3, %v16320_v5 }
 0x3a0   : > { %11770 = vmatmul.mubr.msk.f32.gmra.mrb[136].mxu1 %vm2226_vm3, %v16321_v49 }
 0x3a1   : > { %11772 = vmatprep.mubr.msk.f32.mxu1 %vm2226_vm3, %v16322_v34 }
 0x3a4   : > { %11773 = vmatmul.mubr.msk.f32.gmra.mrb[138].mxu1 %vm2226_vm3, %v16323_v9 }
 0x3a5   : > { %11777 = vmatprep.mubr.msk.f32.mxu1 %vm2226_vm3, %v13680_v27 }
 0x3a8   : > { %11778 = vmatmul.mubr.msk.f32.vlgmr.msra.gmra.mrb[140].mxu1 %vm2226_vm3, %v13684_v29 }
 0x3a9   : > { %11780 = vmatprep.mubr.msk.f32.mxu1 %vm2226_vm3, %v13690_v35 }
 0x3ac   : > { %11781 = vmatmul.mubr.msk.f32.gmra.mrb[142].mxu1 %vm2226_vm3, %v13694_v37 }
 0x3ad   : > { %11783 = vmatprep.mubr.msk.f32.mxu1 %vm2226_vm3, %v13700_v46 }
 0x3b0   : > { %11784 = vmatmul.mubr.msk.f32.gmra.mrb[144].mxu1 %vm2226_vm3, %v13704_v48 }
 0x3b1   : > { %11786 = vmatprep.mubr.msk.f32.mxu1 %vm2226_vm3, %v13710_v54 }
 0x3b4   : > { %11787 = vmatmul.mubr.msk.f32.gmra.mrb[146].mxu1 %vm2226_vm3, %v13714_v56 }
 0x3b5   : > { %11789 = vmatprep.mubr.msk.f32.mxu1 %vm2226_vm3, %v16300_v33 }
 0x3b8   : > { %11790 = vmatmul.mubr.msk.f32.gmra.mrb[148].mxu1 %vm2226_vm3, %v16301_v24 }
 0x3b9   : > { %11792 = vmatprep.mubr.msk.f32.mxu1 %vm2226_vm3, %v16302_v25 }
 0x3bc   : > { %11793 = vmatmul.mubr.msk.f32.gmra.mrb[150].mxu1 %vm2226_vm3, %v16303_v41 }
 0x3bd   : > { %11795 = vmatprep.mubr.msk.f32.mxu1 %vm2226_vm3, %v16304_v47 }
 0x3c0   : > { %11796 = vmatmul.mubr.msk.f32.gmra.mrb[152].mxu1 %vm2226_vm3, %v16305_v28 }
 0x3c1   : > { %11798 = vmatprep.mubr.msk.f32.mxu1 %vm2226_vm3, %v16306_v31 }
 0x3c4   : > { %11799 = vmatmul.mubr.msk.f32.gmra.mrb[154].mxu1 %vm2226_vm3, %v16307_v51 }
 0x3c5   : > { %11801 = vmatprep.mubr.msk.f32.mxu1 %vm2226_vm3, %v16308_v52 }
 0x3c8   : > { %11802 = vmatmul.mubr.msk.f32.gmra.mrb[156].mxu1 %vm2226_vm3, %v16309_v38 }
 0x3c9   : > { %11804 = vmatprep.mubr.msk.f32.mxu1 %vm2226_vm3, %v16310_v50 }
 0x3cc   : > { %11805 = vmatmul.mubr.msk.f32.gmra.mrb[158].mxu1 %vm2226_vm3, %v16311_v58 }
 0x3cd   : > { %11807 = vmatprep.mubr.msk.f32.mxu1 %vm2226_vm3, %v16312_v59 }
 0x3d0   : > { %11808 = vmatmul.mubr.msk.f32.gmra.mrb[160].mxu1 %vm2226_vm3, %v16313_v42 }
 0x3d1   : > { %11810 = vmatprep.mubr.msk.f32.mxu1 %vm2226_vm3, %v16314_v15 }
 0x3d4   : > { %11811 = vmatmul.mubr.msk.f32.gmra.mrb[162].mxu1 %vm2226_vm3, %v16315_v61 }
 0x3d5   : > { %11813 = vmatprep.mubr.msk.f32.mxu1 %vm2226_vm3, %v16316_v63 }
 0x3d8   : > { %11814 = vmatmul.mubr.msk.f32.gmra.mrb[164].mxu1 %vm2226_vm3, %v16317_v60 }
 0x3d9   : > { %11816 = vmatprep.mubr.msk.f32.mxu1 %vm2226_vm3, %v16318_v2 }
 0x3dc   : > { %11817 = vmatmul.mubr.msk.f32.gmra.mrb[166].mxu1 %vm2226_vm3, %v16319_v4 }
 0x3dd   : > { %11819 = vmatprep.mubr.msk.f32.mxu1 %vm2226_vm3, %v16320_v5 }
 0x3e0   : > { %11820 = vmatmul.mubr.msk.f32.gmra.mrb[168].mxu1 %vm2226_vm3, %v16321_v49 }
 0x3e1   : > { %11822 = vmatprep.mubr.msk.f32.mxu1 %vm2226_vm3, %v16322_v34 }
 0x3e3   : > { %v10699_v27 = vpop.f32.mrb[64].mxu1 }
 0x3e4   : > { %11823 = vmatmul.mubr.msk.f32.gmra.mrb[170].mxu1 %vm2226_vm3, %v16323_v9  ;;  %v10700_v29 = vpop.f32.mrb[65].mxu1  ;;  %vm4924_vm3 = vcmask 253952  }
 0x3e5   : > { %v10701_v35 = vadd.f32 %v10700_v29, %v10699_v27 }
 0x3e7   : > { %v10702_v37 = vpop.f32.mrb[66].mxu1 }
 0x3e8   : > { %v10703_v46 = vpop.f32.mrb[67].mxu1 }
 0x3e9   : > { %v10704_v48 = vadd.f32 %v10703_v46, %v10702_v37 }
 0x3eb   : > { %v10705_v54 = vpop.f32.mrb[68].mxu1 }
 0x3ec   : > { %v10706_v56 = vpop.f32.mrb[69].mxu1 }
 0x3ed   : > { %v10707_v10 = vadd.f32 %v10706_v56, %v10705_v54 }
 0x3ef   : > { %v10708_v16 = vpop.f32.mrb[70].mxu1 }
 0x3f0   : > { %v10709_v26 = vpop.f32.mrb[71].mxu1 }
 0x3f1   : > { %v10710_v11 = vadd.f32 %v10709_v26, %v10708_v16 }
 0x3f3   : > { %v10711_v14 = vpop.f32.mrb[72].mxu1 }
 0x3f4   : > { %v10712_v36 = vpop.f32.mrb[73].mxu1 }
 0x3f5   : > { %v10713_v39 = vadd.f32 %v10712_v36, %v10711_v14 }
 0x3f7   : > { %v10714_v17 = vpop.f32.mrb[74].mxu1 }
 0x3f8   : > { %v10715_v18 = vpop.f32.mrb[75].mxu1 }
 0x3f9   : > { %v10716_v53 = vadd.f32 %v10715_v18, %v10714_v17 }
 0x3fb   : > { %v10717_v32 = vpop.f32.mrb[76].mxu1 }
 0x3fc   : > { %v10718_v3 = vpop.f32.mrb[77].mxu1 }
 0x3fd   : > { %v10719_v20 = vadd.f32 %v10718_v3, %v10717_v32 }
 0x3ff   : > { %v10720_v44 = vpop.f32.mrb[78].mxu1 }
 0x400   : > { %v10721_v55 = vpop.f32.mrb[79].mxu1 }
 0x401   : > { %v10722_v6 = vadd.f32 %v10721_v55, %v10720_v44 }
 0x403   : > { %v10723_v0 = vpop.f32.mrb[80].mxu1 }
 0x404   : > { %v10724_v7 = vpop.f32.mrb[81].mxu1 }
 0x405   : > { %v10725_v23 = vadd.f32 %v10724_v7, %v10723_v0 }
 0x407   : > { %v10726_v62 = vpop.f32.mrb[82].mxu1 }
 0x408   : > { %v10727_v19 = vpop.f32.mrb[83].mxu1 }
 0x409   : > { %v10728_v12 = vadd.f32 %v10727_v19, %v10726_v62 }
 0x40b   : > { %v10729_v21 = vpop.f32.mrb[84].mxu1 }
 0x40c   : > { %v10730_v43 = vpop.f32.mrb[85].mxu1 }
 0x40d   : > { %v10731_v1 = vadd.f32 %v10730_v43, %v10729_v21 }
 0x40f   : > { %v10764_v57 = vpop.f32.mrb[86].mxu1 }
 0x410   : > { %v10765_v40 = vpop.f32.mrb[87].mxu1 }
 0x411   : > { %v10766_v30 = vadd.f32 %v10765_v40, %v10764_v57 }
 0x413   : > { %v14313_v13 = vadd.f32 %v10766_v30, %v10701_v35  ;;  %v10767_v45 = vpop.f32.mrb[88].mxu1 }
 0x414   : > { %v10768_v8 = vpop.f32.mrb[89].mxu1 }
 0x415   : > { %v10769_v33 = vadd.f32 %v10768_v8, %v10767_v45 }
 0x417   : > { %v14315_v24 = vadd.f32 %v10769_v33, %v10704_v48  ;;  %v10770_v25 = vpop.f32.mrb[90].mxu1 }
 0x418   : > { %v10771_v41 = vpop.f32.mrb[91].mxu1 }
 0x419   : > { %v10772_v47 = vadd.f32 %v10771_v41, %v10770_v25 }
 0x41b   : > { %v14317_v28 = vadd.f32 %v10772_v47, %v10707_v10  ;;  %v10773_v31 = vpop.f32.mrb[92].mxu1 }
 0x41c   : > { %v10774_v51 = vpop.f32.mrb[93].mxu1 }
 0x41d   : > { %v10775_v52 = vadd.f32 %v10774_v51, %v10773_v31 }
 0x41f   : > { %v14319_v38 = vadd.f32 %v10775_v52, %v10710_v11  ;;  %v10776_v50 = vpop.f32.mrb[94].mxu1 }
 0x420   : > { %v10777_v58 = vpop.f32.mrb[95].mxu1 }
 0x421   : > { %v10778_v59 = vadd.f32 %v10777_v58, %v10776_v50 }
 0x423   : > { %v14321_v42 = vadd.f32 %v10778_v59, %v10713_v39  ;;  %v10779_v15 = vpop.f32.mrb[96].mxu1 }
 0x424   : > { %v10780_v61 = vpop.f32.mrb[97].mxu1 }
 0x425   : > { %v10781_v63 = vadd.f32 %v10780_v61, %v10779_v15 }
 0x427   : > { %v14323_v60 = vadd.f32 %v10781_v63, %v10716_v53  ;;  %v10782_v2 = vpop.f32.mrb[98].mxu1 }
 0x428   : > { %v10783_v4 = vpop.f32.mrb[99].mxu1 }
 0x429   : > { %v10784_v5 = vadd.f32 %v10783_v4, %v10782_v2 }
 0x42b   : > { %v14325_v49 = vadd.f32 %v10784_v5, %v10719_v20  ;;  %v10785_v34 = vpop.f32.mrb[100].mxu1 }
 0x42c   : > { %v10786_v9 = vpop.f32.mrb[101].mxu1 }
 0x42d   : > { %v10787_v27 = vadd.f32 %v10786_v9, %v10785_v34 }
 0x42f   : > { %v14327_v29 = vadd.f32 %v10787_v27, %v10722_v6  ;;  %v10788_v35 = vpop.f32.mrb[102].mxu1 }
 0x430   : > { %v10789_v37 = vpop.f32.mrb[103].mxu1 }
 0x431   : > { %v10790_v46 = vadd.f32 %v10789_v37, %v10788_v35 }
 0x433   : > { %v14329_v48 = vadd.f32 %v10790_v46, %v10725_v23  ;;  %v10791_v54 = vpop.f32.mrb[104].mxu1 }
 0x434   : > { %v10792_v56 = vpop.f32.mrb[105].mxu1 }
 0x435   : > { %v10793_v10 = vadd.f32 %v10792_v56, %v10791_v54 }
 0x437   : > { %v14331_v16 = vadd.f32 %v10793_v10, %v10728_v12  ;;  %v10794_v26 = vpop.f32.mrb[106].mxu1 }
 0x438   : > { %v10795_v11 = vpop.f32.mrb[107].mxu1 }
 0x439   : > { %v10796_v14 = vadd.f32 %v10795_v11, %v10794_v26  ;;  %v9978_v26 = vld [vmem:[%s16283_s24 + $0x160] sm:$0xff] }
 0x43b   : > { %v14333_v36 = vadd.f32 %v10796_v14, %v10731_v1  ;;  %v11729_v39 = vpop.f32.mrb[108].mxu1  ;;  %v9981_v14 = vld [vmem:[%s16283_s24 + $0x178] sm:$0xff] }
 0x43c   : > { %v3128_v17 = vpop.f32.mrb[109].mxu1 }
 0x43d   : > { %v12427_v18 = vpack.c.bf16 %v11729_v39, %v3128_v17 }
 0x43f   : > { %v11732_v53 = vpop.f32.mrb[110].mxu1 }
 0x440   : > { %v3138_v32 = vpop.f32.mrb[111].mxu1 }
 0x441   : > { %v12431_v3 = vpack.c.bf16 %v11732_v53, %v3138_v32  ;;  %v9983_v32 = vld [vmem:[%s16283_s24 + $0x188] sm:$0xff] }
 0x443   : > { %v11735_v20 = vpop.f32.mrb[112].mxu1 }
 0x444   : > { %v3148_v22 = vpop.f32.mrb[113].mxu1 }
 0x445   : > { %v12435_v44 = vpack.c.bf16 %v11735_v20, %v3148_v22  ;;  %v9982_v22 = vld [vmem:[%s16283_s24 + $0x180] sm:$0xff] }
 0x447   : > { %v11738_v55 = vpop.f32.mrb[114].mxu1 }
 0x448   : > { %v3158_v6 = vpop.f32.mrb[115].mxu1 }
 0x449   : > { %v12439_v0 = vpack.c.bf16 %v11738_v55, %v3158_v6  ;;  %v9985_v55 = vld [vmem:[%s16283_s24 + $0x198] sm:$0xff] }
 0x44b   : > { %v11741_v7 = vpop.f32.mrb[116].mxu1 }
 0x44c   : > { %v3168_v23 = vpop.f32.mrb[117].mxu1 }
 0x44d   : > { %v12443_v62 = vpack.c.bf16 %v11741_v7, %v3168_v23  ;;  %v9984_v7 = vld [vmem:[%s16283_s24 + $0x190] sm:$0xff] }
 0x44f   : > { %v11744_v19 = vpop.f32.mrb[118].mxu1 }
 0x450   : > { %v3178_v12 = vpop.f32.mrb[119].mxu1 }
 0x451   : > { %v12447_v21 = vpack.c.bf16 %v11744_v19, %v3178_v12 }
 0x453   : > { %v11747_v43 = vpop.f32.mrb[120].mxu1 }
 0x454   : > { %v3188_v1 = vpop.f32.mrb[121].mxu1 }
 0x455   : > { %v12451_v57 = vpack.c.bf16 %v11747_v43, %v3188_v1  ;;  %v9989_v1 = vld [vmem:[%s16283_s24 + $0x1b8] sm:$0xff] }
 0x457   : > { %v11750_v40 = vpop.f32.mrb[122].mxu1 }
 0x458   : > { %v3198_v30 = vpop.f32.mrb[123].mxu1 }
 0x459   : > { %v12455_v45 = vpack.c.bf16 %v11750_v40, %v3198_v30  ;;  %v9988_v30 = vld [vmem:[%s16283_s24 + $0x1b0] sm:$0xff] }
 0x45b   : > { %v11753_v8 = vpop.f32.mrb[124].mxu1 }
 0x45c   : > { %v3208_v33 = vpop.f32.mrb[125].mxu1 }
 0x45d   : > { %v12425_v25 = vpack.c.bf16 %v11753_v8, %v3208_v33  ;;  %v9991_v8 = vld [vmem:[%s16283_s24 + $0x1c8] sm:$0xff] }
 0x45f   : > { %v11756_v41 = vpop.f32.mrb[126].mxu1  ;;  %12426 = vmatprep.subr.bf16.mxu0 %v12425_v25 }
 0x460   : > { %v3218_v47 = vpop.f32.mrb[127].mxu1  ;;  %12428 = vmatpush3.bf16.msra.mxu0 %v12427_v18  ;;  %v9980_v18 = vld [vmem:[%s16283_s24 + $0x170] sm:$0xff] }
 0x461   : > { %v12429_v31 = vpack.c.bf16 %v11756_v41, %v3218_v47  ;;  %v9990_v41 = vld [vmem:[%s16283_s24 + $0x1c0] sm:$0xff] }
 0x463   : > { %v11759_v51 = vpop.f32.mrb[128].mxu1  ;;  %12430 = vmatprep.subr.bf16.mxu0 %v12429_v31  ;;  %v9993_v31 = vld [vmem:[%s16283_s24 + $0x1d8] sm:$0xff] }
 0x464   : > { %v3228_v52 = vpop.f32.mrb[129].mxu1  ;;  %12432 = vmatpush3.bf16.msra.mxu0 %v12431_v3 }
 0x465   : > { %v12433_v50 = vpack.c.bf16 %v11759_v51, %v3228_v52 }
 0x467   : > { %v11762_v58 = vpop.f32.mrb[130].mxu1  ;;  %12434 = vmatprep.subr.bf16.mxu0 %v12433_v50  ;;  %v9992_v50 = vld [vmem:[%s16283_s24 + $0x1d0] sm:$0xff] }
 0x468   : > { %v3238_v59 = vpop.f32.mrb[131].mxu1  ;;  %12436 = vmatpush3.bf16.msra.mxu0 %v12435_v44 }
 0x469   : > { %v12437_v15 = vpack.c.bf16 %v11762_v58, %v3238_v59  ;;  %v9995_v59 = vld [vmem:[%s16283_s24 + $0x1e8] sm:$0xff] }
 0x46b   : > { %v11765_v61 = vpop.f32.mrb[132].mxu1  ;;  %12438 = vmatprep.subr.bf16.mxu0 %v12437_v15 }
 0x46c   : > { %v3248_v63 = vpop.f32.mrb[133].mxu1  ;;  %12440 = vmatpush3.bf16.msra.mxu0 %v12439_v0 }
 0x46d   : > { %v12441_v2 = vpack.c.bf16 %v11765_v61, %v3248_v63  ;;  %v9994_v63 = vld [vmem:[%s16283_s24 + $0x1e0] sm:$0xff] }
 0x46f   : > { %v11768_v4 = vpop.f32.mrb[134].mxu1  ;;  %12442 = vmatprep.subr.bf16.mxu0 %v12441_v2 }
 0x470   : > { %v3258_v5 = vpop.f32.mrb[135].mxu1  ;;  %12444 = vmatpush3.bf16.msra.mxu0 %v12443_v62  ;;  %v9987_v62 = vld [vmem:[%s16283_s24 + $0x1a8] sm:$0xff] }
 0x471   : > { %v12445_v34 = vpack.c.bf16 %v11768_v4, %v3258_v5  ;;  %v9997_v4 = vld [vmem:[%s16283_s24 + $0x1f8] sm:$0xff] }
 0x473   : > { %v11771_v9 = vpop.f32.mrb[136].mxu1  ;;  %12446 = vmatprep.subr.bf16.mxu0 %v12445_v34 }
 0x474   : > { %v3268_v27 = vpop.f32.mrb[137].mxu1  ;;  %12448 = vmatpush3.bf16.msra.mxu0 %v12447_v21  ;;  %v9986_v21 = vld [vmem:[%s16283_s24 + $0x1a0] sm:$0xff] }
 0x475   : > { %v12449_v35 = vpack.c.bf16 %v11771_v9, %v3268_v27  ;;  %v9996_v9 = vld [vmem:[%s16283_s24 + $0x1f0] sm:$0xff] }
 0x477   : > { %v11774_v37 = vpop.f32.mrb[138].mxu1  ;;  %12450 = vmatprep.subr.bf16.mxu0 %v12449_v35  ;;  %v9999_v35 = vld [vmem:[%s16283_s24 + $0x208] sm:$0x1] }
 0x478   : > { %v3278_v46 = vpop.f32.mrb[139].mxu1  ;;  %12452 = vmatpush3.bf16.msra.mxu0 %v12451_v57 }
 0x479   : > { %v12453_v54 = vpack.c.bf16 %v11774_v37, %v3278_v46 }
 0x47b   : > { %12454 = vmatprep.subr.bf16.mxu0 %v12453_v54  ;;  %v14335_v56 = vpop.f32.mrb[140].mxu1  ;;  %v9998_v54 = vld [vmem:[%s16283_s24 + $0x200] sm:$0x1] }
 0x47c   : > { %12456 = vmatpush3.bf16.msra.mxu0 %v12455_v45  ;;  %v14337_v10 = vpop.f32.mrb[141].mxu1 }
 0x47d   : > { %v12459_v11 = vpack.c.bf16 %v14335_v56, %v14337_v10  ;;  %v10034_v10 = vld [vmem:[%s16283_s24 + $0x218] sm:$0xff] }
 0x47f   : > { %3375 = vmatmul.mubr.f32.vlgmr.msra.gmra.mrb[32].mxu0 %v9978_v26  ;;  %v14347_v39 = vpop.f32.mrb[142].mxu1 }
 0x480   : > { %v14349_v17 = vpop.f32.mrb[143].mxu1  ;;  %3379 = vmatprep.mubr.f32.mxu0 %v9981_v14 }
 0x481   : > { %v12463_v53 = vpack.c.bf16 %v14347_v39, %v14349_v17 }
 0x483   : > { %3380 = vmatmul.mubr.f32.gmra.mrb[34].mxu0 %v9980_v18  ;;  %v14359_v3 = vpop.f32.mrb[144].mxu1 }
 0x484   : > { %v14361_v20 = vpop.f32.mrb[145].mxu1  ;;  %3384 = vmatprep.mubr.f32.mxu0 %v9983_v32 }
 0x485   : > { %v12467_v44 = vpack.c.bf16 %v14359_v3, %v14361_v20 }
 0x487   : > { %3385 = vmatmul.mubr.f32.gmra.mrb[36].mxu0 %v9982_v22  ;;  %v14371_v6 = vpop.f32.mrb[146].mxu1 }
 0x488   : > { %v14373_v0 = vpop.f32.mrb[147].mxu1  ;;  %3389 = vmatprep.mubr.f32.mxu0 %v9985_v55 }
 0x489   : > { %v12471_v23 = vpack.c.bf16 %v14371_v6, %v14373_v0  ;;  %v10033_v6 = vld [vmem:[%s16283_s24 + $0x210] sm:$0xff]  ;;  %v10036_v0 = vld [vmem:[%s16283_s24 + $0x228] sm:$0xff] }
 0x48b   : > { %3390 = vmatmul.mubr.f32.gmra.mrb[38].mxu0 %v9984_v7  ;;  %v14383_v19 = vpop.f32.mrb[148].mxu1 }
 0x48c   : > { %v14385_v12 = vpop.f32.mrb[149].mxu1  ;;  %3394 = vmatprep.mubr.f32.mxu0 %v9987_v62 }
 0x48d   : > { %v12475_v43 = vpack.c.bf16 %v14383_v19, %v14385_v12  ;;  %v10038_v19 = vld [vmem:[%s16283_s24 + $0x238] sm:$0xff]  ;;  %v10037_v12 = vld [vmem:[%s16283_s24 + $0x230] sm:$0xff] }
 0x48f   : > { %3395 = vmatmul.mubr.f32.gmra.mrb[40].mxu0 %v9986_v21  ;;  %v14395_v57 = vpop.f32.mrb[150].mxu1  ;;  %v10040_v21 = vld [vmem:[%s16283_s24 + $0x248] sm:$0xff] }
 0x490   : > { %v14397_v40 = vpop.f32.mrb[151].mxu1  ;;  %3399 = vmatprep.mubr.f32.mxu0 %v9989_v1  ;;  %v10042_v1 = vld [vmem:[%s16283_s24 + $0x258] sm:$0xff] }
 0x491   : > { %v12479_v45 = vpack.c.bf16 %v14395_v57, %v14397_v40  ;;  %v10041_v57 = vld [vmem:[%s16283_s24 + $0x250] sm:$0xff]  ;;  %v10044_v40 = vld [vmem:[%s16283_s24 + $0x268] sm:$0xff] }
 0x493   : > { %3400 = vmatmul.mubr.f32.gmra.mrb[42].mxu0 %v9988_v30  ;;  %v14407_v33 = vpop.f32.mrb[152].mxu1  ;;  %v10043_v30 = vld [vmem:[%s16283_s24 + $0x260] sm:$0xff] }
 0x494   : > { %v3569_v25 = vpop.f32.mrb[153].mxu1  ;;  %3404 = vmatprep.mubr.f32.mxu0 %v9991_v8  ;;  %v10045_v8 = vld [vmem:[%s16283_s24 + $0x270] sm:$0xff] }
 0x495   : > { %v12483_v47 = vpack.c.bf16 %v14407_v33, %v3569_v25  ;;  %v10048_v33 = vld [vmem:[%s16283_s24 + $0x288] sm:$0xff]  ;;  %v10047_v25 = vld [vmem:[%s16283_s24 + $0x280] sm:$0xff] }
 0x497   : > { %3405 = vmatmul.mubr.f32.gmra.mrb[44].mxu0 %v9990_v41  ;;  %v11800_v51 = vpop.f32.mrb[154].mxu1  ;;  %v10050_v41 = vld [vmem:[%s16283_s24 + $0x298] sm:$0xff] }
 0x498   : > { %v3579_v52 = vpop.f32.mrb[155].mxu1  ;;  %3409 = vmatprep.mubr.f32.mxu0 %v9993_v31  ;;  %v10052_v31 = vld [vmem:[%s16283_s24 + $0x2a8] sm:$0xff] }
 0x499   : > { %v12487_v58 = vpack.c.bf16 %v11800_v51, %v3579_v52  ;;  %v10051_v51 = vld [vmem:[%s16283_s24 + $0x2a0] sm:$0xff]  ;;  %v10054_v52 = vld [vmem:[%s16283_s24 + $0x2b8] sm:$0x1] }
 0x49b   : > { %3410 = vmatmul.mubr.f32.gmra.mrb[46].mxu0 %v9992_v50  ;;  %v11803_v15 = vpop.f32.mrb[156].mxu1  ;;  %v10053_v50 = vld [vmem:[%s16283_s24 + $0x2b0] sm:$0x1] }
 0x49c   : > { %v3589_v61 = vpop.f32.mrb[157].mxu1  ;;  %3414 = vmatprep.mubr.f32.mxu0 %v9995_v59  ;;  %v10066_v59 = vld [vmem:[%s16187_s5 + $0x28] sm:$0xff] }
 0x49d   : > { %v12457_v2 = vpack.c.bf16 %v11803_v15, %v3589_v61  ;;  %v10067_v61 = vld [vmem:[%s16187_s5 + $0x30] sm:$0xff] }
 0x49f   : > { %3415 = vmatmul.mubr.f32.gmra.mrb[48].mxu0 %v9994_v63  ;;  %v11806_v5 = vpop.f32.mrb[158].mxu1  ;;  %12458 = vmatprep.subr.bf16.mxu0 %v12457_v2  ;;  %v10068_v63 = vld [vmem:[%s16187_s5 + $0x38] sm:$0xff] }
 0x4a0   : > { %v3599_v34 = vpop.f32.mrb[159].mxu1  ;;  %12460 = vmatpush3.bf16.msra.mxu0 %v12459_v11  ;;  %3419 = vmatprep.mubr.f32.mxu0 %v9997_v4  ;;  %v12493_v2 = vpack.c.bf16 %v10068_v63, %v10067_v61 }
 0x4a1   : > { %v12461_v27 = vpack.c.bf16 %v11806_v5, %v3599_v34 }
 0x4a3   : > { %3420 = vmatmul.mubr.f32.gmra.mrb[50].mxu0 %v9996_v9  ;;  %v11809_v37 = vpop.f32.mrb[160].mxu1  ;;  %12462 = vmatprep.subr.bf16.mxu0 %v12461_v27 }
 0x4a4   : > { %v3609_v46 = vpop.f32.mrb[161].mxu1  ;;  %12464 = vmatpush3.bf16.msra.mxu0 %v12463_v53  ;;  %3424 = vmatprep.mubr.f32.mxu0 %v9999_v35 }
 0x4a5   : > { %v12465_v56 = vpack.c.bf16 %v11809_v37, %v3609_v46 }
 0x4a7   : > { %3425 = vmatmul.mubr.f32.gmra.mrb[52].mxu0 %v9998_v54  ;;  %v11812_v26 = vpop.f32.mrb[162].mxu1  ;;  %12466 = vmatprep.subr.bf16.mxu0 %v12465_v56 }
 0x4a8   : > { %v3619_v11 = vpop.f32.mrb[163].mxu1  ;;  %12468 = vmatpush3.bf16.msra.mxu0 %v12467_v44  ;;  %3755 = vmatprep.mubr.f32.mxu0 %v10034_v10 }
 0x4a9   : > { %v12469_v14 = vpack.c.bf16 %v11812_v26, %v3619_v11 }
 0x4ab   : > { %v11815_v39 = vpop.f32.mrb[164].mxu1  ;;  %12470 = vmatprep.subr.bf16.mxu0 %v12469_v14 }
 0x4ac   : > { %v3629_v17 = vpop.f32.mrb[165].mxu1  ;;  %12472 = vmatpush3.bf16.msra.mxu0 %v12471_v23  ;;  %v10035_v23 = vld [vmem:[%s16283_s24 + $0x220] sm:$0xff] }
 0x4ad   : > { %v12473_v18 = vpack.c.bf16 %v11815_v39, %v3629_v17 }
 0x4af   : > { %v11818_v53 = vpop.f32.mrb[166].mxu1  ;;  %12474 = vmatprep.subr.bf16.mxu0 %v12473_v18 }
 0x4b0   : > { %v3639_v32 = vpop.f32.mrb[167].mxu1  ;;  %12476 = vmatpush3.bf16.msra.mxu0 %v12475_v43  ;;  %v10039_v43 = vld [vmem:[%s16283_s24 + $0x240] sm:$0xff] }
 0x4b1   : > { %v12477_v22 = vpack.c.bf16 %v11818_v53, %v3639_v32 }
 0x4b3   : > { %v11821_v55 = vpop.f32.mrb[168].mxu1  ;;  %12478 = vmatprep.subr.bf16.mxu0 %v12477_v22 }
 0x4b4   : > { %v3649_v7 = vpop.f32.mrb[169].mxu1  ;;  %12480 = vmatpush3.bf16.msra.mxu0 %v12479_v45  ;;  %v10046_v45 = vld [vmem:[%s16283_s24 + $0x278] sm:$0xff] }
 0x4b5   : > { %v12481_v3 = vpack.c.bf16 %v11821_v55, %v3649_v7 }
 0x4b7   : > { %v11824_v20 = vpop.f32.mrb[170].mxu1  ;;  %12482 = vmatprep.subr.bf16.mxu0 %v12481_v3 }
 0x4b8   : > { %v3659_v44 = vpop.f32.mrb[171].mxu1  ;;  %12484 = vmatpush3.bf16.msra.mxu0 %v12483_v47  ;;  %v10049_v47 = vld [vmem:[%s16283_s24 + $0x290] sm:$0xff] }
 0x4b9   : > { %v12485_v62 = vpack.c.bf16 %v11824_v20, %v3659_v44 }
 0x4bb   : > { %12486 = vmatprep.subr.bf16.mxu0 %v12485_v62 }
 0x4bc   : > { %12488 = vmatpush3.bf16.msra.mxu0 %v12487_v58  ;;  %v10065_v58 = vld [vmem:[%s16187_s5 + $0x20] sm:$0xff] }
 0x4bd   : > { %v12489_v15 = vpack.c.bf16 %v10066_v59, %v10065_v58 }
 0x4bf   : > { %3756 = vmatmul.mubr.f32.vlgmr.msra.gmra.mrb[54].mxu0 %v10033_v6  ;;  %12490 = vmatprep.subr.bf16.mxu1 %v12489_v15 }
 0x4c0   : > { %3760 = vmatprep.mubr.f32.mxu0 %v10036_v0  ;;  %12492 = vmatpush3.bf16.msra.mxu1 %v12489_v15  ;;  %v5566_v15 = vld [vmem:[%s16190_s8 + $0x8] sm:$0xff] }
 0x4c1   : > { %12494 = vmatprep.subr.bf16.mxu1 %v12493_v2 }
 0x4c3   : > { %3761 = vmatmul.mubr.f32.gmra.mrb[56].mxu0 %v10035_v23 }
 0x4c4   : > { %3765 = vmatprep.mubr.f32.mxu0 %v10038_v19  ;;  %12496 = vmatpush3.bf16.msra.mxu1 %v12493_v2 }
 0x4c7   : > { %3766 = vmatmul.mubr.f32.gmra.mrb[58].mxu0 %v10037_v12 }
 0x4c8   : > { %3770 = vmatprep.mubr.f32.mxu0 %v10040_v21 }
 0x4cb   : > { %3771 = vmatmul.mubr.f32.gmra.mrb[60].mxu0 %v10039_v43 }
 0x4cc   : > { %3775 = vmatprep.mubr.f32.mxu0 %v10042_v1 }
 0x4cf   : > { %3776 = vmatmul.mubr.f32.gmra.mrb[62].mxu0 %v10041_v57 }
 0x4d0   : > { %3780 = vmatprep.mubr.f32.mxu0 %v10044_v40 }
 0x4d3   : > { %3781 = vmatmul.mubr.f32.gmra.mrb[64].mxu0 %v10043_v30 }
 0x4d4   : > { %3785 = vmatprep.mubr.f32.mxu0 %v10046_v45 }
 0x4d7   : > { %3786 = vmatmul.mubr.f32.gmra.mrb[66].mxu0 %v10045_v8 }
 0x4d8   : > { %3790 = vmatprep.mubr.f32.mxu0 %v10048_v33 }
 0x4db   : > { %3791 = vmatmul.mubr.f32.gmra.mrb[68].mxu0 %v10047_v25 }
 0x4dc   : > { %3795 = vmatprep.mubr.f32.mxu0 %v10050_v41  ;;  %v3837_v41 = vlaneseq }
 0x4df   : > { %3796 = vmatmul.mubr.f32.gmra.mrb[70].mxu0 %v10049_v47 }
 0x4e0   : > { %3800 = vmatprep.mubr.f32.mxu0 %v10052_v31  ;;  %v14562_v31 = vshrl.u32 %v3837_v41, 7 }
 0x4e3   : > { %3801 = vmatmul.mubr.f32.gmra.mrb[72].mxu0 %v10051_v51 }
 0x4e4   : > { %3805 = vmatprep.mubr.f32.mxu0 %v10054_v52 }
 0x4e7   : > { %3806 = vmatmul.mubr.f32.gmra.mrb[74].mxu0 %v10053_v50 }
 0x552   : > { %v10862_v4 = vpop.f32.mrb[32].mxu0 }
 0x553   : > { %v10863_v5 = vpop.f32.mrb[33].mxu0 }
 0x554   : > { %v10864_v34 = vadd.f32 %v10863_v5, %v10862_v4 }
 0x556   : > { %v3430_v9 = vadd.f32 %v10864_v34, %v14313_v13  ;;  %v10865_v27 = vpop.f32.mrb[34].mxu0  ;;  %v4950_v13 = vld [vmem:[%s16187_s5] sm:$0xff] }
 0x557   : > { %v10866_v35 = vpop.f32.mrb[35].mxu0 }
 0x558   : > { %v10867_v37 = vadd.f32 %v10866_v35, %v10865_v27 }
 0x55a   : > { %v3431_v46 = vadd.f32 %v10867_v37, %v14315_v24  ;;  %v10868_v54 = vpop.f32.mrb[36].mxu0  ;;  %v4951_v24 = vld [vmem:[%s16187_s5 + $0x8] sm:$0xff] }
 0x55b   : > { %v10869_v56 = vpop.f32.mrb[37].mxu0  ;;  %v14538_v22 = vpack.c.bf16 %v4951_v24, %v4950_v13 }
 0x55c   : > { %v10870_v10 = vadd.f32 %v10869_v56, %v10868_v54 }
 0x55d   : > { %12498 = vmatprep.subr.bf16.mxu1 %v14538_v22 }
 0x55e   : > { %v14527_v26 = vadd.f32 %v10870_v10, %v14317_v28  ;;  %v10871_v11 = vpop.f32.mrb[38].mxu0 }
 0x55f   : > { %v10872_v14 = vpop.f32.mrb[39].mxu0 }
 0x560   : > { %v10873_v39 = vadd.f32 %v10872_v14, %v10871_v11  ;;  %v4952_v11 = vld [vmem:[%s16187_s5 + $0x10] sm:$0xff]  ;;  %v4953_v14 = vld [vmem:[%s16187_s5 + $0x18] sm:$0xff] }
 0x562   : > { %v14530_v17 = vadd.f32 %v10873_v39, %v14319_v38  ;;  %v10874_v18 = vpop.f32.mrb[40].mxu0 }
 0x563   : > { %v10875_v53 = vpop.f32.mrb[41].mxu0 }
 0x564   : > { %v10876_v32 = vadd.f32 %v10875_v53, %v10874_v18 }
 0x566   : > { %v14541_v28 = vadd.f32 %v10876_v32, %v14321_v42  ;;  %v10877_v55 = vpop.f32.mrb[42].mxu0 }
 0x567   : > { %v10878_v38 = vpop.f32.mrb[43].mxu0 }
 0x568   : > { %v10879_v7 = vadd.f32 %v10878_v38, %v10877_v55 }
 0x56a   : > { %v14545_v3 = vadd.f32 %v10879_v7, %v14323_v60  ;;  %v10880_v20 = vpop.f32.mrb[44].mxu0 }
 0x56b   : > { %v10881_v44 = vpop.f32.mrb[45].mxu0 }
 0x56c   : > { %v10882_v62 = vadd.f32 %v10881_v44, %v10880_v20 }
 0x56e   : > { %v14548_v6 = vadd.f32 %v10882_v62, %v14325_v49  ;;  %v10883_v0 = vpop.f32.mrb[46].mxu0  ;;  %v14589_v62 = vpack.c.bf16 %v4953_v14, %v4952_v11 }
 0x56f   : > { %v10884_v23 = vpop.f32.mrb[47].mxu0 }
 0x570   : > { %v10885_v19 = vadd.f32 %v10884_v23, %v10883_v0 }
 0x572   : > { %v14551_v42 = vadd.f32 %v10885_v19, %v14327_v29  ;;  %v10886_v12 = vpop.f32.mrb[48].mxu0  ;;  %v13189_v29 = vmov 1966171168  }
 0x573   : > { %v10887_v21 = vpop.f32.mrb[49].mxu0  ;;  %v3835_v25 = vunpack.c.l.s4 %v13189_v29 }
 0x574   : > { %v10888_v43 = vadd.f32 %v10887_v21, %v10886_v12 }
 0x575   : > { %v3836_v47 = vunpack.c.0.s8 %v3835_v25 }
 0x576   : > { %v14554_v1 = vadd.f32 %v10888_v43, %v14329_v48  ;;  %v10889_v60 = vpop.f32.mrb[50].mxu0 }
 0x577   : > { %v10890_v57 = vpop.f32.mrb[51].mxu0  ;;  %v14565_v50 = vsub.s32 %v3836_v47, %v14562_v31 }
 0x578   : > { %v10891_v40 = vadd.f32 %v10890_v57, %v10889_v60 }
 0x57a   : > { %v14557_v30 = vadd.f32 %v10891_v40, %v14331_v16  ;;  %v10892_v49 = vpop.f32.mrb[52].mxu0  ;;  %v10085_v40 = vld [vmem:[%s16187_s5 + $0x40] sm:$0xff] }
 0x57b   : > { %v10893_v45 = vpop.f32.mrb[53].mxu0 }
 0x57c   : > { %v10894_v8 = vadd.f32 %v10893_v45, %v10892_v49 }
 0x57e   : > { %v14560_v33 = vadd.f32 %v10894_v8, %v14333_v36  ;;  %v5565_v36 = vld [vmem:[%s16190_s8] sm:$0xff] }
 0x57f   : > { %v12521_v4 = vpack.c.bf16 %v5566_v15, %v5565_v36 }
 0x581   : > { %12522 = vmatprep.subr.bf16.mxu0 %v12521_v4 }
 0x582   : > { %12524 = vmatpush3.bf16.msra.mxu0 %v12521_v4 }
 0x592   : > { %v10960_v48 = vpop.f32.mrb[54].mxu0 }
 0x593   : > { %v10961_v51 = vpop.f32.mrb[55].mxu0 }
 0x594   : > { %v10962_v52 = vadd.f32 %v10961_v51, %v10960_v48 }
 0x596   : > { %v3811_v16 = vadd.f32 %v10962_v52, %v3430_v9  ;;  %v10963_v58 = vpop.f32.mrb[56].mxu0 }
 0x597   : > { %v10964_v59 = vpop.f32.mrb[57].mxu0 }
 0x598   : > { %v3833_v61 = vcombine.high %v3811_v16, %v3811_v16  ;;  %v3840_v63 = vrot.slane %v3811_v16, %v14565_v50  ;;  %v10965_v2 = vadd.f32 %v10964_v59, %v10963_v58 }
 0x59a   : > { %v3847_v5 = vrot.slane %v3833_v61, %v14565_v50  ;;  %v3848_v34 = vcombine.high %v3840_v63, %v3840_v63  ;;  %v3812_v27 = vadd.f32 %v10965_v2, %v3431_v46  ;;  %v10966_v9 = vpop.f32.mrb[58].mxu0  ;;  %v3856_v54 = vrot.slane %v3840_v63, %v14565_v50 }
 0x59b   : > { %v10967_v35 = vpop.f32.mrb[59].mxu0 }
 0x59c   : > { %v3849_v37 = vcombine.high %v3847_v5, %v3847_v5  ;;  %v3870_v56 = vrot.slane %v3848_v34, %v14565_v50  ;;  %v3882_v10 = vcombine.high %v3812_v27, %v3812_v27  ;;  %v3863_v46 = vrot.slane %v3847_v5, %v14565_v50 }
 0x59d   : > { %v3889_v39 = vrot.slane %v3812_v27, %v14565_v50  ;;  %v10968_v18 = vadd.f32 %v10967_v35, %v10966_v9 }
 0x59e   : > { %v3877_v53 = vrot.slane %v3849_v37, %v14565_v50  ;;  %v4337_v13 = vcombine.low %v3856_v54, %v3870_v56  ;;  %v10055_v24 = vcombine.high %v3856_v54, %v3870_v56  ;;  %v3896_v32 = vrot.slane %v3882_v10, %v14565_v50  ;;  %v10969_v55 = vpop.f32.mrb[60].mxu0 }
 0x59f   : > { %v3897_v38 = vcombine.high %v3889_v39, %v3889_v39  ;;  %v3905_v7 = vrot.slane %v3889_v39, %v14565_v50  ;;  %v3813_v20 = vadd.f32 %v10968_v18, %v14527_v26  ;;  %v10970_v44 = vpop.f32.mrb[61].mxu0  ;;  %v10086_v26 = vld [vmem:[%s16187_s5 + $0x48] sm:$0xff] }
 0x5a0   : > { %v4339_v0 = vcombine.low %v3863_v46, %v3877_v53  ;;  %v10056_v23 = vcombine.high %v3863_v46, %v3877_v53  ;;  %v4347_v19 = vrot.slane %v4337_v13, %v14565_v50  ;;  %v4354_v12 = vrot.slane %v10055_v24, %v14565_v50 }
 0x5a1   : > { %v3898_v21 = vcombine.high %v3896_v32, %v3896_v32  ;;  %v3912_v43 = vrot.slane %v3896_v32, %v14565_v50  ;;  %v3919_v60 = vrot.slane %v3897_v38, %v14565_v50  ;;  %v3927_v57 = vcombine.high %v3905_v7, %v3905_v7 }
 0x5a2   : > { %v4361_v49 = vrot.slane %v4339_v0, %v14565_v50  ;;  %v4368_v45 = vrot.slane %v10056_v23, %v14565_v50  ;;  %v4369_v8 = vcombine.low %v4347_v19, %v4354_v12  ;;  %v4392_v29 = vrot.slane %v3905_v7, %v14565_v50  ;;  %v10972_v25 = vpop.f32.mrb[62].mxu0 }
 0x5a3   : > { %v3926_v41 = vrot.slane %v3898_v21, %v14565_v50  ;;  %v3928_v47 = vcombine.high %v3912_v43, %v3912_v43  ;;  %v3929_v48 = vcombine.high %v3919_v60, %v3919_v60  ;;  %v4400_v51 = vcombine.low %v3919_v60, %v3927_v57  ;;  %v10973_v52 = vpop.f32.mrb[63].mxu0 }
 0x5a4   : > { %v4370_v16 = vcombine.low %v4361_v49, %v4368_v45  ;;  %v4399_v58 = vrot.slane %v4392_v29, %v14565_v50  ;;  %v3931_v59 = vcombine.high %v3813_v20, %v3813_v20  ;;  %v14606_v36 = vpack.c.bf16 %v10086_v26, %v10085_v40 }
 0x5a5   : > { %v4377_v15 = vrot.slane %v4369_v8, %v14565_v50  ;;  %v4401_v61 = vcombine.low %v3929_v48, %v3912_v43  ;;  %v4402_v63 = vcombine.low %v3926_v41, %v3928_v47  ;;  %v3930_v2 = vcombine.high %v3926_v41, %v3926_v41 }
 0x5a6   : > { %v4384_v4 = vrot.slane %v4370_v16, %v14565_v50  ;;  %4925 = vst.msk [vmem:[#allocation2 + $0x8] sm:$0x1] %vm4924_vm3, %v4399_v58  ;;  %v3938_v5 = vrot.slane %v3813_v20, %v14565_v50  ;;  %v3945_v34 = vrot.slane %v3931_v59, %v14565_v50  ;;  %v10971_v27 = vadd.f32 %v10970_v44, %v10969_v55  ;;  %v10975_v9 = vpop.f32.mrb[64].mxu0 }
 0x5a7   : > { %v4410_v35 = vrot.slane %v4400_v51, %v14565_v50  ;;  %v4417_v37 = vrot.slane %v4401_v61, %v14565_v50  ;;  %v4424_v54 = vrot.slane %v4402_v63, %v14565_v50  ;;  %v10974_v56 = vadd.f32 %v10973_v52, %v10972_v25  ;;  %v10976_v10 = vpop.f32.mrb[65].mxu0 }
 0x5a8   : > { %v4385_v11 = vcombine.low %v4377_v15, %v4384_v4  ;;  %v3946_v14 = vcombine.high %v3938_v5, %v3938_v5  ;;  %v3947_v46 = vcombine.high %v3945_v34, %v3945_v34  ;;  %v3954_v39 = vrot.slane %v3938_v5, %v14565_v50 }
 0x5a9   : > { %v4432_v18 = vcombine.low %v4410_v35, %v4417_v37  ;;  %v3961_v53 = vrot.slane %v3945_v34, %v14565_v50  ;;  %v3814_v13 = vadd.f32 %v10971_v27, %v14530_v17  ;;  %v3815_v24 = vadd.f32 %v10974_v56, %v14541_v28 }
 0x5aa   : > { %4923 = vst.msk [vmem:[#allocation2] sm:$0xff] %vm4922_vm6, %v4385_v11  ;;  %v3968_v32 = vrot.slane %v3946_v14, %v14565_v50  ;;  %v3975_v55 = vrot.slane %v3947_v46, %v14565_v50  ;;  %v4403_v38 = vcombine.low %v3930_v2, %v3954_v39  ;;  %v14623_v7 = vadd.f32 %v10976_v10, %v10975_v9  ;;  %v14625_v20 = vpop.f32.mrb[66].mxu0 }
 0x5ab   : > { %v4440_v44 = vrot.slane %v4432_v18, %v14565_v50  ;;  %v3980_v0 = vcombine.high %v3814_v13, %v3814_v13  ;;  %v3987_v23 = vrot.slane %v3814_v13, %v14565_v50  ;;  %v4029_v19 = vcombine.high %v3815_v24, %v3815_v24  ;;  %v10979_v17 = vpop.f32.mrb[67].mxu0 }
 0x5ac   : > { %v4431_v28 = vrot.slane %v4403_v38, %v14565_v50  ;;  %v4455_v12 = vrot.slane %v3968_v32, %v14565_v50  ;;  %v10057_v21 = vcombine.high %v3954_v39, %v3968_v32  ;;  %v4464_v43 = vcombine.low %v3961_v53, %v3975_v55 }
 0x5ad   : > { %v10058_v60 = vcombine.high %v3961_v53, %v3975_v55  ;;  %v3994_v57 = vrot.slane %v3980_v0, %v14565_v50  ;;  %v3995_v40 = vcombine.high %v3987_v23, %v3987_v23  ;;  %v4003_v26 = vrot.slane %v3987_v23, %v14565_v50 }
 0x5ae   : > { %v4433_v49 = vcombine.low %v4424_v54, %v4431_v28  ;;  %v4462_v45 = vrot.slane %v4455_v12, %v14565_v50  ;;  %v4473_v8 = vrot.slane %v10057_v21, %v14565_v50  ;;  %v4480_v29 = vrot.slane %v4464_v43, %v14565_v50  ;;  %v14636_v25 = vpop.f32.mrb[68].mxu0 }
 0x5af   : > { %v4487_v41 = vrot.slane %v10058_v60, %v14565_v50  ;;  %v3996_v47 = vcombine.high %v3994_v57, %v3994_v57  ;;  %v4010_v48 = vrot.slane %v3994_v57, %v14565_v50  ;;  %v4017_v51 = vrot.slane %v3995_v40, %v14565_v50  ;;  %v10982_v52 = vpop.f32.mrb[69].mxu0 }
 0x5b0   : > { %v4447_v16 = vrot.slane %v4433_v49, %v14565_v50  ;;  %v4495_v58 = vcombine.low %v4473_v8, %v4480_v29  ;;  %4927 = vst.msk [vmem:[#allocation2 + $0x18] sm:$0x1] %vm4924_vm3, %v4462_v45  ;;  %v4025_v59 = vcombine.high %v4003_v26, %v4003_v26  ;;  %v4036_v15 = vrot.slane %v3815_v24, %v14565_v50 }
 0x5b1   : > { %v4024_v61 = vrot.slane %v3996_v47, %v14565_v50  ;;  %v4026_v63 = vcombine.high %v4010_v48, %v4010_v48  ;;  %v4027_v2 = vcombine.high %v4017_v51, %v4017_v51  ;;  %v4466_v4 = vcombine.low %v4003_v26, %v4017_v51  ;;  %v4954_v5 = vld [vmem:[#allocation2 + $0x1] sm:$0xff] }
 0x5b2   : > { %v4448_v34 = vcombine.low %v4440_v44, %v4447_v16  ;;  %v4503_v27 = vrot.slane %v4495_v58, %v14565_v50  ;;  %v4518_v9 = vrot.slane %v4025_v59, %v14565_v50  ;;  %v4043_v35 = vrot.slane %v4029_v19, %v14565_v50  ;;  %v14648_v37 = vpop.f32.mrb[70].mxu0  ;;  %11833 = vmatprep.mubr.msk.f32.mxu1 %vm4922_vm6, %v4954_v5 }
 0x5b3   : > { %v4494_v54 = vrot.slane %v4466_v4, %v14565_v50  ;;  %v4526_v56 = vcombine.low %v4027_v2, %v4010_v48  ;;  %v4527_v10 = vcombine.low %v4024_v61, %v4026_v63  ;;  %v4028_v11 = vcombine.high %v4024_v61, %v4024_v61  ;;  %v14652_v14 = vpop.f32.mrb[71].mxu0 }
 0x5b4   : > { %4926 = vst.msk [vmem:[#allocation2 + $0x10] sm:$0xff] %vm4922_vm6, %v4448_v34  ;;  %v4525_v46 = vrot.slane %v4518_v9, %v14565_v50  ;;  %v4044_v39 = vcombine.high %v4036_v15, %v4036_v15  ;;  %v4045_v18 = vcombine.high %v4043_v35, %v4043_v35  ;;  %v4052_v53 = vrot.slane %v4036_v15, %v14565_v50 }
 0x5b5   : > { %v4496_v13 = vcombine.low %v4487_v41, %v4494_v54  ;;  %v4536_v24 = vrot.slane %v4526_v56, %v14565_v50  ;;  %v4543_v32 = vrot.slane %v4527_v10, %v14565_v50  ;;  %v4059_v55 = vrot.slane %v4043_v35, %v14565_v50 }
 0x5b6   : > { %4929 = vst.msk [vmem:[#allocation2 + $0x28] sm:$0x1] %vm4924_vm3, %v4525_v46  ;;  %v4066_v38 = vrot.slane %v4044_v39, %v14565_v50  ;;  %v4073_v44 = vrot.slane %v4045_v18, %v14565_v50  ;;  %v4074_v0 = vcombine.high %v4052_v53, %v4052_v53  ;;  %v4528_v23 = vcombine.low %v4028_v11, %v4052_v53  ;;  %v14663_v19 = vpop.f32.mrb[72].mxu0 }
 0x5b7   : > { %v4510_v28 = vrot.slane %v4496_v13, %v14565_v50  ;;  %v4558_v12 = vcombine.low %v4536_v24, %v4543_v32  ;;  %v3816_v21 = vadd.f32 %v14623_v7, %v14545_v3  ;;  %v10980_v43 = vadd.f32 %v10979_v17, %v14625_v20  ;;  %v14669_v60 = vpop.f32.mrb[73].mxu0 }
 0x5b8   : > { %v4076_v57 = vcombine.high %v4066_v38, %v4066_v38  ;;  %v4529_v40 = vcombine.low %v4066_v38, %v4074_v0  ;;  %v4550_v26 = vrot.slane %v4528_v23, %v14565_v50  ;;  %v4589_v49 = vcombine.low %v4059_v55, %v4073_v44 }
 0x5b9   : > { %v4511_v45 = vcombine.low %v4503_v27, %v4510_v28  ;;  %v4566_v8 = vrot.slane %v4558_v12, %v14565_v50  ;;  %v10059_v29 = vcombine.high %v4059_v55, %v4073_v44  ;;  %v4078_v41 = vcombine.high %v3816_v21, %v3816_v21 }
 0x5ba   : > { %v4557_v47 = vrot.slane %v4529_v40, %v14565_v50  ;;  %v4581_v48 = vrot.slane %v4076_v57, %v14565_v50  ;;  %v4599_v3 = vrot.slane %v4589_v49, %v14565_v50  ;;  %v4085_v7 = vrot.slane %v3816_v21, %v14565_v50  ;;  %v14677_v20 = vpop.f32.mrb[74].mxu0 }
 0x5bb   : > { %4928 = vst.msk [vmem:[#allocation2 + $0x20] sm:$0xff] %vm4922_vm6, %v4511_v45  ;;  %v4606_v17 = vrot.slane %v10059_v29, %v14565_v50  ;;  %v4092_v51 = vrot.slane %v4078_v41, %v14565_v50  ;;  %v3817_v16 = vadd.f32 %v10980_v43, %v14548_v6  ;;  %v10983_v58 = vadd.f32 %v10982_v52, %v14636_v25  ;;  %v14684_v59 = vld [vmem:[#allocation2 + $0x11] sm:$0xff]  ;;  %v14686_v15 = vpop.f32.mrb[75].mxu0 }
 0x5bc   : > { %v4559_v61 = vcombine.low %v4550_v26, %v4557_v47  ;;  %v4588_v63 = vrot.slane %v4581_v48, %v14565_v50  ;;  %v4093_v2 = vcombine.high %v4085_v7, %v4085_v7  ;;  %v4101_v4 = vrot.slane %v4085_v7, %v14565_v50  ;;  %11834 = vmatmul.mubr.msk.f32.vlgmr.msra.gmra.mrb[172].mxu1 %vm4922_vm6, %v14684_v59 }
 0x5bd   : > { %v4621_v5 = vcombine.low %v4599_v3, %v4606_v17  ;;  %v4094_v34 = vcombine.high %v4092_v51, %v4092_v51  ;;  %v4108_v27 = vrot.slane %v4092_v51, %v14565_v50  ;;  %v4127_v6 = vcombine.high %v3817_v16, %v3817_v16  ;;  %12500 = vmatpush3.bf16.msra.mxu1 %v14538_v22 }
 0x5be   : > { %v4573_v25 = vrot.slane %v4559_v61, %v14565_v50  ;;  %4931 = vst.msk [vmem:[#allocation2 + $0x38] sm:$0x1] %vm4924_vm3, %v4588_v63  ;;  %v4115_v52 = vrot.slane %v4093_v2, %v14565_v50  ;;  %v4134_v9 = vrot.slane %v3817_v16, %v14565_v50  ;;  %v3818_v35 = vadd.f32 %v10983_v58, %v14551_v42 }
 0x5bf   : > { %12502 = vmatprep.subr.bf16.mxu1 %v14589_v62  ;;  %v4629_v54 = vrot.slane %v4621_v5, %v14565_v50  ;;  %v4122_v56 = vrot.slane %v4094_v34, %v14565_v50  ;;  %v4124_v10 = vcombine.high %v4108_v27, %v4108_v27  ;;  %v4644_v11 = vrot.slane %v4108_v27, %v14565_v50 }
 0x5c0   : > { %v4574_v22 = vcombine.low %v4566_v8, %v4573_v25  ;;  %v4591_v46 = vcombine.low %v4101_v4, %v4115_v52  ;;  %v10060_v39 = vcombine.high %v4101_v4, %v4115_v52  ;;  %v4141_v18 = vrot.slane %v4127_v6, %v14565_v50 }
 0x5c1   : > { %v4651_v53 = vrot.slane %v4644_v11, %v14565_v50  ;;  %v4652_v13 = vcombine.low %v4122_v56, %v4124_v10  ;;  %v4126_v24 = vcombine.high %v4122_v56, %v4122_v56  ;;  %v4142_v32 = vcombine.high %v4134_v9, %v4134_v9  ;;  %12504 = vmatpush3.bf16.msra.mxu1 %v14589_v62 }
 0x5c2   : > { %4930 = vst.msk [vmem:[#allocation2 + $0x30] sm:$0xff] %vm4922_vm6, %v4574_v22  ;;  %v4613_v42 = vrot.slane %v4591_v46, %v14565_v50  ;;  %v4620_v55 = vrot.slane %v10060_v39, %v14565_v50  ;;  %v4143_v38 = vcombine.high %v4141_v18, %v4141_v18  ;;  %v4150_v44 = vrot.slane %v4134_v9, %v14565_v50  ;;  %v14710_v0 = vld [vmem:[#allocation2 + $0x21] sm:$0xff] }
 0x5c3   : > { %12506 = vmatprep.subr.bf16.mxu1 %v14606_v36  ;;  %4933 = vst.msk [vmem:[#allocation2 + $0x48] sm:$0x1] %vm4924_vm3, %v4651_v53  ;;  %v4157_v23 = vrot.slane %v4141_v18, %v14565_v50  ;;  %v4164_v28 = vrot.slane %v4142_v32, %v14565_v50  ;;  %v4662_v62 = vrot.slane %v4652_v13, %v14565_v50 }
 0x5c4   : > { %v4176_v12 = vcombine.high %v3818_v35, %v3818_v35  ;;  %11836 = vmatprep.mubr.msk.f32.mxu1 %vm4922_vm6, %v14710_v0  ;;  %v4622_v21 = vcombine.low %v4613_v42, %v4620_v55  ;;  %v4171_v43 = vrot.slane %v4143_v38, %v14565_v50  ;;  %v4172_v57 = vcombine.high %v4150_v44, %v4150_v44 }
 0x5c5   : > { %v4653_v40 = vcombine.low %v4126_v24, %v4150_v44  ;;  %v4174_v26 = vcombine.high %v4164_v28, %v4164_v28  ;;  %v4183_v49 = vrot.slane %v3818_v35, %v14565_v50  ;;  %v10986_v8 = vadd.f32 %v14652_v14, %v14648_v37 }
 0x5c6   : > { %v4190_v45 = vrot.slane %v4176_v12, %v14565_v50  ;;  %v4636_v29 = vrot.slane %v4622_v21, %v14565_v50  ;;  %v4654_v41 = vcombine.low %v4164_v28, %v4172_v57  ;;  %v4707_v48 = vrot.slane %v4171_v43, %v14565_v50 }
 0x5c7   : > { %v4669_v47 = vrot.slane %v4653_v40, %v14565_v50  ;;  %v4655_v3 = vcombine.low %v4174_v26, %v4157_v23  ;;  %v10061_v7 = vcombine.high %v4157_v23, %v4171_v43  ;;  %v4191_v17 = vcombine.high %v4183_v49, %v4183_v49 }
 0x5c8   : > { %v4192_v51 = vcombine.high %v4190_v45, %v4190_v45  ;;  %v4637_v16 = vcombine.low %v4629_v54, %v4636_v29  ;;  %v4676_v58 = vrot.slane %v4654_v41, %v14565_v50  ;;  %v4714_v63 = vrot.slane %v4707_v48, %v14565_v50 }
 0x5c9   : > { %v4684_v61 = vcombine.low %v4662_v62, %v4669_v47  ;;  %v4683_v2 = vrot.slane %v4655_v3, %v14565_v50  ;;  %v4725_v37 = vrot.slane %v10061_v7, %v14565_v50  ;;  %v4199_v14 = vrot.slane %v4183_v49, %v14565_v50  ;;  %v14733_v5 = vld [vmem:[#allocation2 + $0x31] sm:$0xff] }
 0x5ca   : > { %v4206_v4 = vrot.slane %v4190_v45, %v14565_v50  ;;  %4932 = vst.msk [vmem:[#allocation2 + $0x40] sm:$0xff] %vm4922_vm6, %v4637_v16  ;;  %v4213_v27 = vrot.slane %v4191_v17, %v14565_v50  ;;  %v4220_v6 = vrot.slane %v4192_v51, %v14565_v50  ;;  %v3819_v25 = vadd.f32 %v10986_v8, %v14554_v1 }
 0x5cb   : > { %v4692_v34 = vrot.slane %v4684_v61, %v14565_v50  ;;  %4935 = vst.msk [vmem:[#allocation2 + $0x58] sm:$0x1] %vm4924_vm3, %v4714_v63  ;;  %11837 = vmatmul.mubr.msk.f32.gmra.mrb[174].mxu1 %vm4922_vm6, %v14733_v5  ;;  %v4685_v52 = vcombine.low %v4676_v58, %v4683_v2  ;;  %v10989_v35 = vadd.f32 %v14669_v60, %v14663_v19 }
 0x5cc   : > { %v4222_v9 = vcombine.high %v4206_v4, %v4206_v4  ;;  %v10992_v54 = vadd.f32 %v14686_v15, %v14677_v20  ;;  %v4716_v56 = vcombine.low %v4199_v14, %v4213_v27  ;;  %v10062_v10 = vcombine.high %v4199_v14, %v4213_v27 }
 0x5cd   : > { %v4718_v11 = vcombine.low %v4206_v4, %v4220_v6  ;;  %v4224_v22 = vcombine.high %v4220_v6, %v4220_v6  ;;  %v4699_v46 = vrot.slane %v4685_v52, %v14565_v50  ;;  %v4225_v1 = vcombine.high %v3819_v25, %v3819_v25 }
 0x5ce   : > { %v4770_v39 = vrot.slane %v4222_v9, %v14565_v50  ;;  %v4232_v18 = vrot.slane %v3819_v25, %v14565_v50  ;;  %v4732_v53 = vrot.slane %v4716_v56, %v14565_v50  ;;  %v4739_v13 = vrot.slane %v10062_v10, %v14565_v50 }
 0x5cf   : > { %v4746_v19 = vrot.slane %v4718_v11, %v14565_v50  ;;  %v3820_v60 = vadd.f32 %v10989_v35, %v14557_v30  ;;  %v4700_v20 = vcombine.low %v4692_v34, %v4699_v46  ;;  %v4239_v24 = vrot.slane %v4225_v1, %v14565_v50 }
 0x5d0   : > { %v4777_v15 = vrot.slane %v4770_v39, %v14565_v50  ;;  %v4240_v32 = vcombine.high %v4232_v18, %v4232_v18  ;;  %v4747_v42 = vcombine.low %v4725_v37, %v4732_v53  ;;  %v4248_v38 = vrot.slane %v4232_v18, %v14565_v50 }
 0x5d1   : > { %v4748_v55 = vcombine.low %v4739_v13, %v4746_v19  ;;  %v4274_v44 = vcombine.high %v3820_v60, %v3820_v60  ;;  %4934 = vst.msk [vmem:[#allocation2 + $0x50] sm:$0xff] %vm4922_vm6, %v4700_v20  ;;  %v4241_v23 = vcombine.high %v4239_v24, %v4239_v24  ;;  %v4255_v28 = vrot.slane %v4239_v24, %v14565_v50  ;;  %v14762_v12 = vld [vmem:[#allocation2 + $0x41] sm:$0xff] }
 0x5d2   : > { %4937 = vst.msk [vmem:[#allocation2 + $0x68] sm:$0x1] %vm4924_vm3, %v4777_v15  ;;  %v4262_v30 = vrot.slane %v4240_v32, %v14565_v50  ;;  %v4281_v62 = vrot.slane %v3820_v60, %v14565_v50  ;;  %v4755_v21 = vrot.slane %v4747_v42, %v14565_v50  ;;  %v4270_v57 = vcombine.high %v4248_v38, %v4248_v38 }
 0x5d3   : > { %v4762_v43 = vrot.slane %v4748_v55, %v14565_v50  ;;  %v4778_v40 = vcombine.low %v4224_v22, %v4248_v38  ;;  %11839 = vmatprep.mubr.msk.f32.mxu1 %vm4922_vm6, %v14762_v12  ;;  %v4269_v26 = vrot.slane %v4241_v23, %v14565_v50  ;;  %v4271_v49 = vcombine.high %v4255_v28, %v4255_v28  ;;  %v10087_v38 = vld [vmem:[%s16187_s5 + $0x50] sm:$0xff]  ;;  %v4942_v23 = vld [vmem:[#allocation2] sm:$0xff] }
 0x5d4   : > { %v4272_v45 = vcombine.high %v4262_v30, %v4262_v30  ;;  %v4288_v8 = vrot.slane %v4274_v44, %v14565_v50  ;;  %v4779_v41 = vcombine.low %v4262_v30, %v4270_v57  ;;  %v4289_v48 = vcombine.high %v4281_v62, %v4281_v62  ;;  %v10088_v44 = vld [vmem:[%s16187_s5 + $0x58] sm:$0xff]  ;;  %v4943_v30 = vld [vmem:[#allocation2 + $0x10] sm:$0xff] }
 0x5d5   : > { %v4763_v29 = vcombine.low %v4755_v21, %v4762_v43  ;;  %v4788_v47 = vrot.slane %v4778_v40, %v14565_v50  ;;  %v4273_v3 = vcombine.high %v4269_v26, %v4269_v26  ;;  %v4781_v17 = vcombine.low %v4269_v26, %v4271_v49  ;;  %v10098_v21 = vld [vmem:[%s16187_s5 + $0x68] sm:$0xff]  ;;  %v4944_v43 = vld [vmem:[#allocation2 + $0x20] sm:$0xff]  ;;  %v4945_v40 = vld [vmem:[#allocation2 + $0x30] sm:$0xff] }
 0x5d6   : > { %v4780_v7 = vcombine.low %v4272_v45, %v4255_v28  ;;  %v4290_v51 = vcombine.high %v4288_v8, %v4288_v8  ;;  %v4795_v16 = vrot.slane %v4779_v41, %v14565_v50  ;;  %v4297_v58 = vrot.slane %v4281_v62, %v14565_v50  ;;  %v10097_v62 = vld [vmem:[%s16187_s5 + $0x60] sm:$0xff] }
 0x5d7   : > { %4936 = vst.msk [vmem:[#allocation2 + $0x60] sm:$0xff] %vm4922_vm6, %v4763_v29  ;;  %v4304_v61 = vrot.slane %v4288_v8, %v14565_v50  ;;  %v4311_v63 = vrot.slane %v4289_v48, %v14565_v50  ;;  %v4809_v37 = vrot.slane %v4781_v17, %v14565_v50  ;;  %v4833_v14 = vrot.slane %v4273_v3, %v14565_v50  ;;  %v4946_v26 = vld [vmem:[#allocation2 + $0x40] sm:$0xff]  ;;  %v10100_v29 = vld [vmem:[%s16187_s5 + $0x78] sm:$0xff] }
 0x5d8   : > { %v4802_v2 = vrot.slane %v4780_v7, %v14565_v50  ;;  %v4318_v4 = vrot.slane %v4290_v51, %v14565_v50  ;;  %v4810_v34 = vcombine.low %v4788_v47, %v4795_v16  ;;  %v3821_v25 = vadd.f32 %v10992_v54, %v14560_v33  ;;  %v14781_v52 = vld [vmem:[#allocation2 + $0x51] sm:$0xff]  ;;  %v10109_v17 = vld [vmem:[%s16188_s6] ss:$0 sm:$0xff] }
 0x5d9   : > { %v4841_v27 = vcombine.low %v4297_v58, %v4311_v63  ;;  %v10063_v6 = vcombine.high %v4297_v58, %v4311_v63  ;;  %v4840_v35 = vrot.slane %v4833_v14, %v14565_v50  ;;  %11840 = vmatmul.mubr.msk.f32.gmra.mrb[176].mxu1 %vm4922_vm6, %v14781_v52  ;;  %v12509_v28 = vpack.c.bf16 %v10088_v44, %v10087_v38  ;;  %v4947_v49 = vld [vmem:[#allocation2 + $0x50] sm:$0xff]  ;;  %v10119_v3 = vld [vmem:[%s16190_s8 + $0x18] sm:$0xff] }
 0x5da   : > { %v4811_v9 = vcombine.low %v4802_v2, %v4809_v37  ;;  %v4843_v56 = vcombine.low %v4304_v61, %v4318_v4  ;;  %v10064_v10 = vcombine.high %v4304_v61, %v4318_v4  ;;  %v4329_v46 = vrot.slane %v3821_v25, %v14565_v50 }
 0x5db   : > { %v4851_v11 = vrot.slane %v4841_v27, %v14565_v50  ;;  %v4858_v22 = vrot.slane %v10063_v6, %v14565_v50  ;;  %v4818_v39 = vrot.slane %v4810_v34, %v14565_v50  ;;  %4939 = vst.msk [vmem:[#allocation2 + $0x78] sm:$0x1] %vm4924_vm3, %v4840_v35  ;;  %v12513_v57 = vpack.c.bf16 %v10098_v21, %v10097_v62 }
 0x5dc   : > { %v4825_v33 = vrot.slane %v4811_v9, %v14565_v50  ;;  %v4865_v54 = vrot.slane %v4843_v56, %v14565_v50  ;;  %v4872_v1 = vrot.slane %v10064_v10, %v14565_v50  ;;  %v4336_v53 = vrot.slane %v4329_v46, %v14565_v50 }
 0x5dd   : > { %v4873_v18 = vcombine.low %v4851_v11, %v4858_v22 }
 0x5de   : > { %v4826_v13 = vcombine.low %v4818_v39, %v4825_v33  ;;  %v4874_v19 = vcombine.low %v4865_v54, %v4872_v1  ;;  %v4960_v60 = vld [vmem:[#allocation2 + $0x61] sm:$0xff]  ;;  %v4896_v20 = vrot.slane %v4336_v53, %v14565_v50 }
 0x5df   : > { %11842 = vmatprep.mubr.msk.f32.mxu1 %vm4922_vm6, %v4960_v60  ;;  %v4881_v15 = vrot.slane %v4873_v18, %v14565_v50  ;;  %v4948_v45 = vld [vmem:[#allocation2 + $0x60] sm:$0xff] }
 0x5e0   : > { %4938 = vst.msk [vmem:[#allocation2 + $0x70] sm:$0xff] %vm4922_vm6, %v4826_v13  ;;  %v4888_v24 = vrot.slane %v4874_v19, %v14565_v50  ;;  %v4903_v32 = vrot.slane %v4896_v20, %v14565_v50 }
 0x5e2   : > { %v4889_v42 = vcombine.low %v4881_v15, %v4888_v24  ;;  %4941 = vst.msk [vmem:[#allocation2 + $0x88] sm:$0x1] %vm4924_vm3, %v4903_v32  ;;  %v10128_v24 = vld [vmem:[%s16189_s7 + $0x20] sm:$0xff]  ;;  %vm8620_vm3 = vcmask 1043456  }
 0x5e4   : > { %4940 = vst.msk [vmem:[#allocation2 + $0x80] sm:$0xff] %vm4922_vm6, %v4889_v42 }
 0x5e7   : > { %v4961_v55 = vld [vmem:[#allocation2 + $0x71] sm:$0xff] }
 0x5e8   : > { %11843 = vmatmul.mubr.msk.f32.gmra.mrb[178].mxu1 %vm4922_vm6, %v4961_v55  ;;  %v4949_v8 = vld [vmem:[#allocation2 + $0x70] sm:$0xff] }
 0x5e9   : > { %11853 = vmatprep.mubr.msk.f32.mxu1 %vm4922_vm6, %v4942_v23 }
 0x5eb   : > { %v5233_v47 = vld [vmem:[#allocation2 + $0x80] sm:$0xff] }
 0x5ec   : > { %11854 = vmatmul.mubr.msk.f32.vlgmr.msra.gmra.mrb[172].mxu1 %vm4922_vm6, %v4943_v30  ;;  %v5383_v48 = vld [vmem:[#allocation2 + $0x81] sm:$0xff] }
 0x5ed   : > { %11856 = vmatprep.mubr.msk.f32.mxu1 %vm4922_vm6, %v4944_v43  ;;  %12508 = vmatpush3.bf16.msra.mxu1 %v14606_v36  ;;  %v10099_v36 = vld [vmem:[%s16187_s5 + $0x70] sm:$0xff] }
 0x5ee   : > { %12510 = vmatprep.subr.bf16.mxu1 %v12509_v28  ;;  %v12517_v41 = vpack.c.bf16 %v10100_v29, %v10099_v36 }
 0x5f0   : > { %11857 = vmatmul.mubr.msk.f32.gmra.mrb[174].mxu1 %vm4922_vm6, %v4945_v40 }
 0x5f1   : > { %11859 = vmatprep.mubr.msk.f32.mxu1 %vm4922_vm6, %v4946_v26  ;;  %12512 = vmatpush3.bf16.msra.mxu1 %v12509_v28 }
 0x5f2   : > { %12514 = vmatprep.subr.bf16.mxu1 %v12513_v57 }
 0x5f4   : > { %11860 = vmatmul.mubr.msk.f32.gmra.mrb[176].mxu1 %vm4922_vm6, %v4947_v49 }
 0x5f5   : > { %11862 = vmatprep.mubr.msk.f32.mxu1 %vm4922_vm6, %v4948_v45 }
 0x5f8   : > { %11863 = vmatmul.mubr.msk.f32.gmra.mrb[178].mxu1 %vm4922_vm6, %v4949_v8 }
 0x5f9   : > { %11873 = vmatprep.mubr.msk.f32.mxu1 %vm4922_vm6, %v4943_v30 }
 0x5fc   : > { %11874 = vmatmul.mubr.msk.f32.vlgmr.msra.gmra.mrb[172].mxu1 %vm4922_vm6, %v4944_v43 }
 0x5fd   : > { %11876 = vmatprep.mubr.msk.f32.mxu1 %vm4922_vm6, %v4945_v40  ;;  %12516 = vmatpush3.bf16.msra.mxu1 %v12513_v57 }
 0x5fe   : > { %12518 = vmatprep.subr.bf16.mxu1 %v12517_v41 }
 0x600   : > { %11877 = vmatmul.mubr.msk.f32.gmra.mrb[174].mxu1 %vm4922_vm6, %v4946_v26 }
 0x601   : > { %11879 = vmatprep.mubr.msk.f32.mxu1 %vm4922_vm6, %v4947_v49  ;;  %12520 = vmatpush3.bf16.msra.mxu1 %v12517_v41 }
 0x604   : > { %11880 = vmatmul.mubr.msk.f32.gmra.mrb[176].mxu1 %vm4922_vm6, %v4948_v45 }
 0x605   : > { %11882 = vmatprep.mubr.msk.f32.mxu1 %vm4922_vm6, %v4949_v8 }
 0x608   : > { %11883 = vmatmul.mubr.msk.f32.gmra.mrb[178].mxu1 %vm4922_vm6, %v5233_v47 }
 0x609   : > { %11893 = vmatprep.mubr.msk.f32.mxu1 %vm4922_vm6, %v14684_v59  ;;  %v10158_v59 = vld [vmem:[%s16190_s8 + $0x30] sm:$0xff] }
 0x60c   : > { %11894 = vmatmul.mubr.msk.f32.vlgmr.msra.gmra.mrb[172].mxu1 %vm4922_vm6, %v14710_v0  ;;  %v10159_v0 = vld [vmem:[%s16190_s8 + $0x38] sm:$0xff] }
 0x60d   : > { %11896 = vmatprep.mubr.msk.f32.mxu1 %vm4922_vm6, %v14733_v5  ;;  %v12581_v5 = vpack.c.bf16 %v10159_v0, %v10158_v59 }
 0x60f   : > { %12582 = vmatprep.subr.bf16.mxu1 %v12581_v5 }
 0x610   : > { %11897 = vmatmul.mubr.msk.f32.gmra.mrb[174].mxu1 %vm4922_vm6, %v14762_v12  ;;  %v10118_v12 = vld [vmem:[%s16190_s8 + $0x10] sm:$0xff] }
 0x611   : > { %11899 = vmatprep.mubr.msk.f32.mxu1 %vm4922_vm6, %v14781_v52  ;;  %12584 = vmatpush3.bf16.msra.mxu1 %v12581_v5  ;;  %v12525_v7 = vpack.c.bf16 %v10119_v3, %v10118_v12 }
 0x613   : > { %12526 = vmatprep.subr.bf16.mxu0 %v12525_v7 }
 0x614   : > { %11900 = vmatmul.mubr.msk.f32.gmra.mrb[176].mxu1 %vm4922_vm6, %v4960_v60 }
 0x615   : > { %11902 = vmatprep.mubr.msk.f32.mxu1 %vm4922_vm6, %v4961_v55 }
 0x618   : > { %11903 = vmatmul.mubr.msk.f32.gmra.mrb[178].mxu1 %vm4922_vm6, %v5383_v48 }
 0x6df   : > { %v11895_v51 = vpop.f32.mrb[172].mxu1 }
 0x6e0   : > { %v5534_v16 = vadd.f32 %v11895_v51, %v10109_v17  ;;  %v5479_v58 = vpop.f32.mrb[173].mxu1 }
 0x6e1   : > { %v5533_v61 = vadd.f32 %v10109_v17, %v5479_v58 }
 0x6e2   : > { %v5550_v63 = vmul.f32 0.2, %v5534_v16  ;;  %vm5542_vm7 = vcmp.ge.f32.partialorder %v5534_v16, 0.0 }
 0x6e3   : > { %vm5541_vm8 = vcmp.ge.f32.partialorder %v5533_v61, 0.0  ;;  %v5549_v2 = vmul.f32 0.2, %v5533_v61  ;;  %v11898_v37 = vpop.f32.mrb[174].mxu1 }
 0x6e4   : > { %v5536_v14 = vadd.f32 %v11898_v37, %v10109_v17  ;;  %v5489_v4 = vpop.f32.mrb[175].mxu1  ;;  %v14869_v6 = vsel %vm5542_vm7, %v5534_v16, %v5550_v63  ;;  %vm9603_vm7 = vcmask 0  }
 0x6e5   : > { %v5535_v34 = vadd.f32 %v10109_v17, %v5489_v4  ;;  %v14867_v27 = vsel %vm5541_vm8, %v5533_v61, %v5549_v2  ;;  %v10130_v4 = vld [vmem:[%s16189_s7 + $0x30] sm:$0xff] }
 0x6e6   : > { %v5552_v25 = vmul.f32 0.2, %v5536_v14  ;;  %11909 = vmatprep.mubr.msk.f32.mxu0 %vm670_vm0, %v14867_v27  ;;  %12023 = vmatprep.mubr.msk.f32.mxu1 %vm670_vm0, %v14867_v27  ;;  %vm5544_vm9 = vcmp.ge.f32.partialorder %v5536_v14, 0.0 }
 0x6e7   : > { %vm5543_vm10 = vcmp.ge.f32.partialorder %v5535_v34, 0.0  ;;  %v5551_v52 = vmul.f32 0.2, %v5535_v34  ;;  %v11901_v9 = vpop.f32.mrb[176].mxu1  ;;  %11910 = vmatmul.mubr.msk.f32.vlgmr.msra.gmra.mrb[76].mxu0 %vm670_vm0, %v14869_v6  ;;  %12024 = vmatmul.mubr.msk.f32.vlgmr.msra.gmra.mrb[180].mxu1 %vm670_vm0, %v14869_v6 }
 0x6e8   : > { %v5538_v35 = vadd.f32 %v11901_v9, %v10109_v17  ;;  %v5499_v56 = vpop.f32.mrb[177].mxu1  ;;  %12528 = vmatpush3.bf16.msra.mxu0 %v12525_v7  ;;  %v14885_v46 = vsel %vm5544_vm9, %v5536_v14, %v5552_v25  ;;  %v10129_v14 = vld [vmem:[%s16189_s7 + $0x28] sm:$0xff]  ;;  %v5696_v25 = vld [vmem:[%s16189_s7] sm:$0xff] }
 0x6e9   : > { %v5537_v10 = vadd.f32 %v10109_v17, %v5499_v56  ;;  %v14879_v11 = vsel %vm5543_vm10, %v5535_v34, %v5551_v52  ;;  %v10131_v34 = vld [vmem:[%s16189_s7 + $0x38] sm:$0x1]  ;;  %v10140_v52 = vld [vmem:[%s16190_s8 + $0x20] sm:$0xff]  ;;  %v10141_v9 = vld [vmem:[%s16190_s8 + $0x28] sm:$0xff] }
 0x6ea   : > { %v5554_v22 = vmul.f32 0.2, %v5538_v35  ;;  %11912 = vmatprep.mubr.msk.f32.mxu0 %vm670_vm0, %v14879_v11  ;;  %12026 = vmatprep.mubr.msk.f32.mxu1 %vm670_vm0, %v14879_v11  ;;  %vm5546_vm11 = vcmp.ge.f32.partialorder %v5538_v35, 0.0  ;;  %v5697_v56 = vld [vmem:[%s16189_s7 + $0x8] sm:$0xff] }
 0x6eb   : > { %vm5545_vm12 = vcmp.ge.f32.partialorder %v5537_v10, 0.0  ;;  %v5553_v39 = vmul.f32 0.2, %v5537_v10  ;;  %v11904_v33 = vpop.f32.mrb[178].mxu1  ;;  %11913 = vmatmul.mubr.msk.f32.gmra.mrb[78].mxu0 %vm670_vm0, %v14885_v46  ;;  %12027 = vmatmul.mubr.msk.f32.gmra.mrb[182].mxu1 %vm670_vm0, %v14885_v46 }
 0x6ec   : > { %v5540_v54 = vadd.f32 %v11904_v33, %v10109_v17  ;;  %v5509_v1 = vpop.f32.mrb[179].mxu1  ;;  %v14897_v19 = vsel %vm5546_vm11, %v5538_v35, %v5554_v22  ;;  %v12561_v35 = vpack.c.bf16 %v10141_v9, %v10140_v52  ;;  %v5699_v22 = vld [vmem:[%s16189_s7 + $0x18] sm:$0x1] }
 0x6ed   : > { %v5539_v18 = vadd.f32 %v10109_v17, %v5509_v1  ;;  %v14891_v53 = vsel %vm5545_vm12, %v5537_v10, %v5553_v39  ;;  %v5698_v10 = vld [vmem:[%s16189_s7 + $0x10] sm:$0xff] }
 0x6ee   : > { %v5556_v13 = vmul.f32 0.2, %v5540_v54  ;;  %11915 = vmatprep.mubr.msk.f32.mxu0 %vm670_vm0, %v14891_v53  ;;  %12029 = vmatprep.mubr.msk.f32.mxu1 %vm670_vm0, %v14891_v53  ;;  %vm5548_vm13 = vcmp.ge.f32.partialorder %v5540_v54, 0.0 }
 0x6ef   : > { %vm5547_vm14 = vcmp.ge.f32.partialorder %v5539_v18, 0.0  ;;  %v5555_v60 = vmul.f32 0.2, %v5539_v18  ;;  %11916 = vmatmul.mubr.msk.f32.gmra.mrb[80].mxu0 %vm670_vm0, %v14897_v19  ;;  %12030 = vmatmul.mubr.msk.f32.gmra.mrb[184].mxu1 %vm670_vm0, %v14897_v19 }
 0x6f0   : > { %v14909_v15 = vsel %vm5548_vm13, %v5540_v54, %v5556_v13 }
 0x6f1   : > { %v14903_v20 = vsel %vm5547_vm14, %v5539_v18, %v5555_v60 }
 0x6f2   : > { %11918 = vmatprep.mubr.msk.f32.mxu0 %vm670_vm0, %v14903_v20  ;;  %12032 = vmatprep.mubr.msk.f32.mxu1 %vm670_vm0, %v14903_v20 }
 0x6f3   : > { %11919 = vmatmul.mubr.msk.f32.gmra.mrb[82].mxu0 %vm670_vm0, %v14909_v15  ;;  %12033 = vmatmul.mubr.msk.f32.gmra.mrb[186].mxu1 %vm670_vm0, %v14909_v15 }
 0x6f4   : > { %11925 = vmatprep.mubr.msk.f32.mxu0 %vm670_vm0, %v14867_v27 }
 0x6f7   : > { %11926 = vmatmul.mubr.msk.f32.vlgmr.msra.gmra.mrb[84].mxu0 %vm670_vm0, %v14869_v6 }
 0x6f8   : > { %11928 = vmatprep.mubr.msk.f32.mxu0 %vm670_vm0, %v14879_v11 }
 0x6fb   : > { %11929 = vmatmul.mubr.msk.f32.gmra.mrb[86].mxu0 %vm670_vm0, %v14885_v46 }
 0x6fc   : > { %11931 = vmatprep.mubr.msk.f32.mxu0 %vm670_vm0, %v14891_v53 }
 0x6ff   : > { %11932 = vmatmul.mubr.msk.f32.gmra.mrb[88].mxu0 %vm670_vm0, %v14897_v19 }
 0x700   : > { %11934 = vmatprep.mubr.msk.f32.mxu0 %vm670_vm0, %v14903_v20 }
 0x703   : > { %11935 = vmatmul.mubr.msk.f32.gmra.mrb[90].mxu0 %vm670_vm0, %v14909_v15 }
 0x704   : > { %11953 = vmatprep.mubr.msk.f32.mxu0 %vm5813_vm15, %v10128_v24  ;;  %v10153_v24 = vld [vmem:[%s16189_s7 + $0x58] sm:$0x1] }
 0x7ba   : > { %v11911_v32 = vpop.f32.mrb[76].mxu0  ;;  %v12025_v42 = vpop.f32.mrb[180].mxu1 }
 0x7bb   : > { %v5657_v55 = vpop.f32.mrb[77].mxu0  ;;  %v6291_v38 = vpop.f32.mrb[181].mxu1 }
 0x7bc   : > { %v12545_v44 = vpack.c.bf16 %v11911_v32, %v5657_v55  ;;  %v14935_v23 = vpack.c.bf16 %v12025_v42, %v6291_v38  ;;  %v10168_v32 = vld [vmem:[%s16189_s7 + $0x60] sm:$0xff]  ;;  %v10169_v42 = vld [vmem:[%s16189_s7 + $0x68] sm:$0xff]  ;;  %v10170_v55 = vld [vmem:[%s16189_s7 + $0x70] sm:$0xff] }
 0x7bd   : > { %v10171_v38 = vld [vmem:[%s16189_s7 + $0x78] sm:$0x1] }
 0x7be   : > { %v11914_v28 = vpop.f32.mrb[78].mxu0  ;;  %v12028_v30 = vpop.f32.mrb[182].mxu1 }
 0x7bf   : > { %v5667_v62 = vpop.f32.mrb[79].mxu0  ;;  %v6301_v21 = vpop.f32.mrb[183].mxu1 }
 0x7c0   : > { %v12549_v43 = vpack.c.bf16 %v11914_v28, %v5667_v62  ;;  %v14937_v57 = vpack.c.bf16 %v12028_v30, %v6301_v21  ;;  %v10181_v30 = vld [vmem:[%s16191_s9 + $0x50] sm:$0xff]  ;;  %v10182_v62 = vld [vmem:[%s16191_s9 + $0x58] sm:$0xff] }
 0x7c1   : > { %v12605_v21 = vpack.c.bf16 %v10182_v62, %v10181_v30 }
 0x7c2   : > { %v11917_v40 = vpop.f32.mrb[80].mxu0  ;;  %v12031_v26 = vpop.f32.mrb[184].mxu1 }
 0x7c3   : > { %v5677_v49 = vpop.f32.mrb[81].mxu0  ;;  %v6311_v45 = vpop.f32.mrb[185].mxu1 }
 0x7c4   : > { %v12553_v8 = vpack.c.bf16 %v11917_v40, %v5677_v49  ;;  %v14939_v36 = vpack.c.bf16 %v12031_v26, %v6311_v45  ;;  %v10185_v26 = vld [vmem:[%s16191_s9 + $0x70] sm:$0xff]  ;;  %v10186_v49 = vld [vmem:[%s16191_s9 + $0x78] sm:$0xff] }
 0x7c5   : > { %v12613_v45 = vpack.c.bf16 %v10186_v49, %v10185_v26 }
 0x7c6   : > { %v11920_v29 = vpop.f32.mrb[82].mxu0  ;;  %v12034_v41 = vpop.f32.mrb[186].mxu1 }
 0x7c7   : > { %v5687_v47 = vpop.f32.mrb[83].mxu0  ;;  %v6321_v48 = vpop.f32.mrb[187].mxu1 }
 0x7c8   : > { %v12557_v59 = vpack.c.bf16 %v11920_v29, %v5687_v47  ;;  %v14941_v0 = vpack.c.bf16 %v12034_v41, %v6321_v48  ;;  %v7218_v41 = vld [vmem:[%s16194_s12] sm:$0xff]  ;;  %v7219_v47 = vld [vmem:[%s16194_s12 + $0x8] sm:$0xff] }
 0x7c9   : > { %v12665_v48 = vpack.c.bf16 %v7219_v47, %v7218_v41 }
 0x7ca   : > { %v11927_v5 = vpop.f32.mrb[84].mxu0 }
 0x7cb   : > { %v5769_v12 = vpop.f32.mrb[85].mxu0 }
 0x7cc   : > { %v12529_v3 = vpack.c.bf16 %v11927_v5, %v5769_v12 }
 0x7ce   : > { %v11930_v7 = vpop.f32.mrb[86].mxu0  ;;  %12530 = vmatprep.subr.bf16.mxu0 %v12529_v3 }
 0x7cf   : > { %v5779_v17 = vpop.f32.mrb[87].mxu0  ;;  %12532 = vmatpush3.bf16.msra.mxu0 %v12529_v3 }
 0x7d0   : > { %v12533_v51 = vpack.c.bf16 %v11930_v7, %v5779_v17 }
 0x7d2   : > { %v11933_v16 = vpop.f32.mrb[88].mxu0  ;;  %12534 = vmatprep.subr.bf16.mxu0 %v12533_v51 }
 0x7d3   : > { %v5789_v58 = vpop.f32.mrb[89].mxu0  ;;  %12536 = vmatpush3.bf16.msra.mxu0 %v12533_v51 }
 0x7d4   : > { %v12537_v61 = vpack.c.bf16 %v11933_v16, %v5789_v58 }
 0x7d6   : > { %v11936_v63 = vpop.f32.mrb[90].mxu0  ;;  %12538 = vmatprep.subr.bf16.mxu0 %v12537_v61 }
 0x7d7   : > { %v5799_v2 = vpop.f32.mrb[91].mxu0  ;;  %12540 = vmatpush3.bf16.msra.mxu0 %v12537_v61 }
 0x7d8   : > { %v12541_v37 = vpack.c.bf16 %v11936_v63, %v5799_v2 }
 0x7da   : > { %12542 = vmatprep.subr.bf16.mxu0 %v12541_v37 }
 0x7db   : > { %12544 = vmatpush3.bf16.msra.mxu0 %v12541_v37 }
 0x7dc   : > { %12546 = vmatprep.subr.bf16.mxu0 %v12545_v44 }
 0x7de   : > { %11954 = vmatmul.mubr.msk.f32.vlgmr.msra.gmra.mrb[92].mxu0 %vm5813_vm15, %v10129_v14 }
 0x7df   : > { %12548 = vmatpush3.bf16.msra.mxu0 %v12545_v44  ;;  %11956 = vmatprep.mubr.msk.f32.mxu0 %vm5813_vm15, %v10130_v4  ;;  %v10179_v44 = vld [vmem:[%s16191_s9 + $0x40] sm:$0xff] }
 0x7e0   : > { %12550 = vmatprep.subr.bf16.mxu0 %v12549_v43 }
 0x7e2   : > { %11957 = vmatmul.mubr.msk.f32.gmra.mrb[94].mxu0 %vm5813_vm15, %v10131_v34 }
 0x7e3   : > { %12552 = vmatpush3.bf16.msra.mxu0 %v12549_v43  ;;  %11975 = vmatprep.mubr.msk.f32.mxu0 %vm5813_vm15, %v5696_v25  ;;  %v10183_v43 = vld [vmem:[%s16191_s9 + $0x60] sm:$0xff] }
 0x7e4   : > { %12554 = vmatprep.subr.bf16.mxu0 %v12553_v8 }
 0x7e7   : > { %12556 = vmatpush3.bf16.msra.mxu0 %v12553_v8  ;;  %v6811_v8 = vld [vmem:[%s16191_s9] sm:$0xff] }
 0x7e8   : > { %12558 = vmatprep.subr.bf16.mxu0 %v12557_v59 }
 0x7eb   : > { %12560 = vmatpush3.bf16.msra.mxu0 %v12557_v59 }
 0x7ec   : > { %12562 = vmatprep.subr.bf16.mxu0 %v12561_v35 }
 0x7ee   : > { %11976 = vmatmul.mubr.msk.f32.vlgmr.msra.gmra.mrb[92].mxu0 %vm5813_vm15, %v5697_v56 }
 0x7ef   : > { %11978 = vmatprep.mubr.msk.f32.mxu0 %vm5813_vm15, %v5698_v10  ;;  %12564 = vmatpush3.bf16.msra.mxu0 %v12561_v35 }
 0x7f2   : > { %11979 = vmatmul.mubr.msk.f32.gmra.mrb[94].mxu0 %vm5813_vm15, %v5699_v22 }
 0x7f3   : > { %11985 = vmatprep.mubr.msk.f32.mxu0 %vm670_vm0, %v14867_v27  ;;  %v10150_v27 = vld [vmem:[%s16189_s7 + $0x40] sm:$0xff] }
 0x7f6   : > { %11986 = vmatmul.mubr.msk.f32.vlgmr.msra.gmra.mrb[96].mxu0 %vm670_vm0, %v14869_v6 }
 0x7f7   : > { %11988 = vmatprep.mubr.msk.f32.mxu0 %vm670_vm0, %v14879_v11 }
 0x7fa   : > { %11989 = vmatmul.mubr.msk.f32.gmra.mrb[98].mxu0 %vm670_vm0, %v14885_v46 }
 0x7fb   : > { %11991 = vmatprep.mubr.msk.f32.mxu0 %vm670_vm0, %v14891_v53 }
 0x7fe   : > { %11992 = vmatmul.mubr.msk.f32.gmra.mrb[100].mxu0 %vm670_vm0, %v14897_v19 }
 0x7ff   : > { %11994 = vmatprep.mubr.msk.f32.mxu0 %vm670_vm0, %v14903_v20  ;;  %v10151_v20 = vld [vmem:[%s16189_s7 + $0x48] sm:$0xff] }
 0x802   : > { %11995 = vmatmul.mubr.msk.f32.gmra.mrb[102].mxu0 %vm670_vm0, %v14909_v15  ;;  %v10152_v15 = vld [vmem:[%s16189_s7 + $0x50] sm:$0xff] }
 0x803   : > { %12013 = vmatprep.mubr.msk.f32.mxu0 %vm5813_vm15, %v10150_v27 }
 0x8c9   : > { %v11987_v6 = vpop.f32.mrb[96].mxu0 }
 0x8ca   : > { %v6077_v11 = vpop.f32.mrb[97].mxu0 }
 0x8cb   : > { %v12565_v46 = vpack.c.bf16 %v11987_v6, %v6077_v11 }
 0x8cd   : > { %v11990_v39 = vpop.f32.mrb[98].mxu0  ;;  %12566 = vmatprep.subr.bf16.mxu0 %v12565_v46 }
 0x8ce   : > { %v6087_v33 = vpop.f32.mrb[99].mxu0  ;;  %12568 = vmatpush3.bf16.msra.mxu0 %v12565_v46 }
 0x8cf   : > { %v12569_v54 = vpack.c.bf16 %v11990_v39, %v6087_v33 }
 0x8d1   : > { %v11993_v1 = vpop.f32.mrb[100].mxu0  ;;  %12570 = vmatprep.subr.bf16.mxu0 %v12569_v54 }
 0x8d2   : > { %v6097_v18 = vpop.f32.mrb[101].mxu0  ;;  %12572 = vmatpush3.bf16.msra.mxu0 %v12569_v54 }
 0x8d3   : > { %v12573_v53 = vpack.c.bf16 %v11993_v1, %v6097_v18 }
 0x8d5   : > { %v11996_v13 = vpop.f32.mrb[102].mxu0  ;;  %12574 = vmatprep.subr.bf16.mxu0 %v12573_v53 }
 0x8d6   : > { %v6107_v19 = vpop.f32.mrb[103].mxu0  ;;  %12576 = vmatpush3.bf16.msra.mxu0 %v12573_v53 }
 0x8d7   : > { %v12577_v60 = vpack.c.bf16 %v11996_v13, %v6107_v19 }
 0x8d9   : > { %12578 = vmatprep.subr.bf16.mxu0 %v12577_v60 }
 0x8da   : > { %12580 = vmatpush3.bf16.msra.mxu0 %v12577_v60 }
 0x8db   : > { %12586 = vmatprep.subr.bf16.mxu0 %v14935_v23 }
 0x8dd   : > { %12014 = vmatmul.mubr.msk.f32.vlgmr.msra.gmra.mrb[92].mxu0 %vm5813_vm15, %v10151_v20 }
 0x8de   : > { %12588 = vmatpush3.bf16.msra.mxu0 %v14935_v23  ;;  %12016 = vmatprep.mubr.msk.f32.mxu0 %vm5813_vm15, %v10152_v15  ;;  %v10180_v23 = vld [vmem:[%s16191_s9 + $0x48] sm:$0xff] }
 0x8df   : > { %12590 = vmatprep.subr.bf16.mxu0 %v14937_v57  ;;  %v12601_v28 = vpack.c.bf16 %v10180_v23, %v10179_v44 }
 0x8e1   : > { %12017 = vmatmul.mubr.msk.f32.gmra.mrb[94].mxu0 %vm5813_vm15, %v10153_v24  ;;  %12602 = vmatprep.subr.bf16.mxu1 %v12601_v28 }
 0x8e2   : > { %12592 = vmatpush3.bf16.msra.mxu0 %v14937_v57  ;;  %12051 = vmatprep.mubr.msk.f32.mxu0 %vm5813_vm15, %v10168_v32  ;;  %v10184_v57 = vld [vmem:[%s16191_s9 + $0x68] sm:$0xff] }
 0x8e3   : > { %12594 = vmatprep.subr.bf16.mxu0 %v14939_v36  ;;  %12604 = vmatpush3.bf16.msra.mxu1 %v12601_v28  ;;  %v12609_v40 = vpack.c.bf16 %v10184_v57, %v10183_v43 }
 0x8e4   : > { %12606 = vmatprep.subr.bf16.mxu1 %v12605_v21 }
 0x8e6   : > { %12596 = vmatpush3.bf16.msra.mxu0 %v14939_v36  ;;  %v6812_v36 = vld [vmem:[%s16191_s9 + $0x8] sm:$0xff] }
 0x8e7   : > { %12598 = vmatprep.subr.bf16.mxu0 %v14941_v0  ;;  %12608 = vmatpush3.bf16.msra.mxu1 %v12605_v21  ;;  %v15063_v29 = vpack.c.bf16 %v6812_v36, %v6811_v8 }
 0x8e8   : > { %12610 = vmatprep.subr.bf16.mxu1 %v12609_v40 }
 0x8ea   : > { %12600 = vmatpush3.bf16.msra.mxu0 %v14941_v0 }
 0x8eb   : > { %12612 = vmatpush3.bf16.msra.mxu1 %v12609_v40  ;;  %12666 = vmatprep.subr.bf16.mxu0 %v12665_v48 }
 0x8ec   : > { %12614 = vmatprep.subr.bf16.mxu1 %v12613_v45 }
 0x8ed   : > { %12052 = vmatmul.mubr.msk.f32.vlgmr.msra.gmra.mrb[92].mxu0 %vm5813_vm15, %v10169_v42 }
 0x8ee   : > { %12054 = vmatprep.mubr.msk.f32.mxu0 %vm5813_vm15, %v10170_v55  ;;  %12668 = vmatpush3.bf16.msra.mxu0 %v12665_v48 }
 0x8ef   : > { %12616 = vmatpush3.bf16.msra.mxu1 %v12613_v45 }
 0x8f0   : > { %12618 = vmatprep.subr.bf16.mxu1 %v15063_v29 }
 0x8f1   : > { %12055 = vmatmul.mubr.msk.f32.gmra.mrb[94].mxu0 %vm5813_vm15, %v10171_v38 }
 0x9c0   : > { %v12053_v59 = vpop.f32.mrb[92].mxu0 }
 0x9c1   : > { %v6489_v0 = vcombine.high %v12053_v59, %v12053_v59  ;;  %v6496_v5 = vrot.slane %v12053_v59, %v14565_v50  ;;  %v6413_v12 = vpop.f32.mrb[93].mxu0 }
 0x9c2   : > { %v6440_v3 = vcombine.high %v6413_v12, %v6413_v12  ;;  %v6447_v7 = vrot.slane %v6413_v12, %v14565_v50 }
 0x9c3   : > { %v6503_v17 = vrot.slane %v6489_v0, %v14565_v50  ;;  %v6504_v51 = vcombine.high %v6496_v5, %v6496_v5  ;;  %v6512_v2 = vrot.slane %v6496_v5, %v14565_v50 }
 0x9c4   : > { %v6454_v16 = vrot.slane %v6440_v3, %v14565_v50  ;;  %v6455_v58 = vcombine.high %v6447_v7, %v6447_v7  ;;  %v12056_v61 = vpop.f32.mrb[94].mxu0  ;;  %v6463_v25 = vrot.slane %v6447_v7, %v14565_v50 }
 0x9c5   : > { %v6505_v63 = vcombine.high %v6503_v17, %v6503_v17  ;;  %v6519_v37 = vrot.slane %v6503_v17, %v14565_v50  ;;  %v6526_v14 = vrot.slane %v6504_v51, %v14565_v50  ;;  %v6423_v4 = vpop.f32.mrb[95].mxu0  ;;  %v6593_v32 = vrot.slane %v12056_v61, %v14565_v50 }
 0x9c6   : > { %v6456_v34 = vcombine.high %v6454_v16, %v6454_v16  ;;  %v6470_v52 = vrot.slane %v6454_v16, %v14565_v50  ;;  %v6477_v9 = vrot.slane %v6455_v58, %v14565_v50  ;;  %v6538_v39 = vcombine.high %v6423_v4, %v6423_v4 }
 0x9c7   : > { %v6533_v35 = vrot.slane %v6505_v63, %v14565_v50  ;;  %v6535_v56 = vcombine.high %v6519_v37, %v6519_v37  ;;  %v10177_v10 = vcombine.high %v6512_v2, %v6526_v14  ;;  %v6662_v20 = vrot.slane %v6526_v14, %v14565_v50 }
 0x9c8   : > { %v6484_v22 = vrot.slane %v6456_v34, %v14565_v50  ;;  %v6486_v27 = vcombine.high %v6470_v52, %v6470_v52  ;;  %v6601_v6 = vcombine.low %v6463_v25, %v6477_v9  ;;  %v10176_v11 = vcombine.high %v6463_v25, %v6477_v9 }
 0x9c9   : > { %v6680_v46 = vcombine.low %v6519_v37, %v6533_v35  ;;  %v6623_v18 = vrot.slane %v6470_v52, %v14565_v50  ;;  %v6687_v53 = vrot.slane %v10177_v10, %v14565_v50  ;;  %v6701_v19 = vrot.slane %v6535_v56, %v14565_v50 }
 0x9ca   : > { %v6488_v33 = vcombine.high %v6484_v22, %v6484_v22  ;;  %v6609_v54 = vrot.slane %v6601_v6, %v14565_v50  ;;  %v6616_v1 = vrot.slane %v10176_v11, %v14565_v50  ;;  %v6640_v60 = vcombine.low %v6484_v22, %v6486_v27  ;;  %v6813_v27 = vld [vmem:[%s16191_s9 + $0x10] sm:$0xff]  ;;  %v6814_v6 = vld [vmem:[%s16191_s9 + $0x18] sm:$0xff]  ;;  %v6815_v11 = vld [vmem:[%s16191_s9 + $0x20] sm:$0xff] }
 0x9cb   : > { %v6694_v13 = vrot.slane %v6680_v46, %v14565_v50  ;;  %v6638_v55 = vrot.slane %v6623_v18, %v14565_v50  ;;  %v6537_v38 = vcombine.high %v6533_v35, %v6533_v35  ;;  %v6545_v44 = vrot.slane %v6423_v4, %v14565_v50  ;;  %v6816_v46 = vld [vmem:[%s16191_s9 + $0x28] sm:$0xff]  ;;  %v6817_v18 = vld [vmem:[%s16191_s9 + $0x30] sm:$0xff] }
 0x9cc   : > { %v6624_v15 = vcombine.low %v6609_v54, %v6616_v1  ;;  %v6641_v24 = vcombine.low %v6488_v33, %v6512_v2  ;;  %v6648_v28 = vrot.slane %v6640_v60, %v14565_v50  ;;  %v6552_v62 = vrot.slane %v6538_v39, %v14565_v50 }
 0x9cd   : > { %v6702_v42 = vcombine.low %v6687_v53, %v6694_v13  ;;  %v6716_v43 = vrot.slane %v6701_v19, %v14565_v50  ;;  %v6553_v57 = vcombine.high %v6545_v44, %v6545_v44  ;;  %v6561_v40 = vrot.slane %v6545_v44, %v14565_v50  ;;  %v6818_v53 = vld [vmem:[%s16191_s9 + $0x38] sm:$0xff]  ;;  %v10191_v19 = vld [vmem:[%s16191_s9 + $0x80] sm:$0xff] }
 0x9ce   : > { %v6631_v23 = vrot.slane %v6624_v15, %v14565_v50  ;;  %v6655_v30 = vrot.slane %v6641_v24, %v14565_v50  ;;  %v6677_v26 = vrot.slane %v6662_v20, %v14565_v50  ;;  %v6554_v8 = vcombine.high %v6552_v62, %v6552_v62  ;;  %v10193_v20 = vld [vmem:[%s16191_s9 + $0x90] sm:$0xff]  ;;  %v10194_v15 = vld [vmem:[%s16191_s9 + $0x98] sm:$0xff] }
 0x9cf   : > { %v6709_v21 = vrot.slane %v6702_v42, %v14565_v50  ;;  %v6575_v41 = vrot.slane %v6553_v57, %v14565_v50  ;;  %v6583_v47 = vcombine.high %v6561_v40, %v6561_v40  ;;  %v6718_v48 = vcombine.low %v6537_v38, %v6561_v40  ;;  %v10196_v38 = vld [vmem:[%s16191_s9 + $0xa8] sm:$0xff]  ;;  %v10203_v57 = vld [vmem:[%s16191_s9 + $0xd0] sm:$0xff]  ;;  %v10204_v40 = vld [vmem:[%s16191_s9 + $0xd8] sm:$0xff] }
 0x9d0   : > { %v6639_v49 = vcombine.low %v6631_v23, %v6638_v55  ;;  %v6663_v45 = vcombine.low %v6648_v28, %v6655_v30  ;;  %v6600_v0 = vrot.slane %v6593_v32, %v14565_v50  ;;  %v6568_v5 = vrot.slane %v6552_v62, %v14565_v50  ;;  %v10195_v55 = vld [vmem:[%s16191_s9 + $0xa0] sm:$0xff]  ;;  %v10197_v23 = vld [vmem:[%s16191_s9 + $0xb0] sm:$0xff]  ;;  %v10198_v28 = vld [vmem:[%s16191_s9 + $0xb8] sm:$0xff] }
 0x9d1   : > { %v6717_v36 = vcombine.low %v6709_v21, %v6716_v43  ;;  %v6582_v12 = vrot.slane %v6554_v8, %v14565_v50  ;;  %v6585_v3 = vcombine.high %v6575_v41, %v6575_v41  ;;  %v6719_v7 = vcombine.low %v6575_v41, %v6583_v47  ;;  %v10201_v62 = vld [vmem:[%s16191_s9 + $0xc0] sm:$0xff]  ;;  %v10202_v21 = vld [vmem:[%s16191_s9 + $0xc8] sm:$0xff]  ;;  %v10207_v47 = vld [vmem:[%s16191_s9 + $0xf0] sm:$0xff] }
 0x9d2   : > { %v6670_v59 = vrot.slane %v6663_v45, %v14565_v50  ;;  %6802 = vst.msk [vmem:[#allocation3] sm:$0x1f] %vm6801_vm1, %v6639_v49  ;;  %v6726_v17 = vrot.slane %v6718_v48, %v14565_v50  ;;  %v6779_v2 = vrot.slane %v6600_v0, %v14565_v50  ;;  %v12621_v33 = vpack.c.bf16 %v6814_v6, %v6813_v27  ;;  %v10205_v8 = vld [vmem:[%s16191_s9 + $0xe0] sm:$0xff]  ;;  %v10208_v48 = vld [vmem:[%s16191_s9 + $0xf8] sm:$0xff] }
 0x9d3   : > { %6804 = vst.msk [vmem:[#allocation3 + $0x10] sm:$0x1f] %vm6801_vm1, %v6717_v36  ;;  %v6757_v16 = vcombine.low %v6568_v5, %v6582_v12  ;;  %v10178_v58 = vcombine.high %v6568_v5, %v6582_v12  ;;  %v6733_v61 = vrot.slane %v6719_v7, %v14565_v50  ;;  %v6740_v63 = vrot.slane %v6585_v3, %v14565_v50  ;;  %v10206_v36 = vld [vmem:[%s16191_s9 + $0xe8] sm:$0xff]  ;;  %v7220_v5 = vld [vmem:[%s16194_s12 + $0x10] sm:$0xff]  ;;  %v7221_v12 = vld [vmem:[%s16194_s12 + $0x18] sm:$0xff] }
 0x9d4   : > { %v6678_v51 = vcombine.low %v6670_v59, %v6677_v26  ;;  %v6794_v9 = vrot.slane %v6779_v2, %v14565_v50  ;;  %v12625_v1 = vpack.c.bf16 %v6816_v46, %v6815_v11  ;;  %v12629_v13 = vpack.c.bf16 %v6818_v53, %v6817_v18  ;;  %v10214_v7 = vld [vmem:[%s16194_s12 + $0x20] sm:$0xff]  ;;  %v10228_v18 = vld [vmem:[%s16194_s12 + $0x50] sm:$0xff]  ;;  %v10229_v53 = vld [vmem:[%s16194_s12 + $0x58] sm:$0xff] }
 0x9d5   : > { %v6765_v37 = vrot.slane %v6757_v16, %v14565_v50  ;;  %v6772_v14 = vrot.slane %v10178_v58, %v14565_v50  ;;  %v6741_v4 = vcombine.low %v6726_v17, %v6733_v61  ;;  %v6755_v52 = vrot.slane %v6740_v63, %v14565_v50  ;;  %v10215_v17 = vld [vmem:[%s16194_s12 + $0x28] sm:$0xff]  ;;  %v10211_v16 = vld [vmem:[%s16192_s10] ss:$0 sm:$0xff] }
 0x9d6   : > { %6803 = vst.msk [vmem:[#allocation3 + $0x8] sm:$0x1f] %vm6801_vm1, %v6678_v51  ;;  %v12637_v32 = vpack.c.bf16 %v10194_v15, %v10193_v20  ;;  %v12641_v44 = vpack.c.bf16 %v10196_v38, %v10195_v55  ;;  %v12645_v30 = vpack.c.bf16 %v10198_v28, %v10197_v23  ;;  %v12649_v43 = vpack.c.bf16 %v10202_v21, %v10201_v62  ;;  %v10226_v46 = vld [vmem:[%s16194_s12 + $0x40] sm:$0xff]  ;;  %v10237_v20 = vld [vmem:[%s16194_s12 + $0x68] sm:$0xff]  ;;  %v10238_v55 = vld [vmem:[%s16194_s12 + $0x70] sm:$0xff] }
 0x9d7   : > { %v6780_v34 = vcombine.low %v6765_v37, %v6772_v14  ;;  %v6748_v25 = vrot.slane %v6741_v4, %v14565_v50  ;;  %v12653_v49 = vpack.c.bf16 %v10204_v40, %v10203_v57  ;;  %v12657_v41 = vpack.c.bf16 %v10206_v36, %v10205_v8  ;;  %v10216_v14 = vld [vmem:[%s16194_s12 + $0x30] sm:$0xff]  ;;  %v10217_v4 = vld [vmem:[%s16194_s12 + $0x38] sm:$0xff]  ;;  %v10251_v62 = vld [vmem:[%s16195_s13 + $0x88] sm:$0xff] }
 0x9d8   : > { %v12661_v59 = vpack.c.bf16 %v10208_v48, %v10207_v47  ;;  %v12669_v3 = vpack.c.bf16 %v7221_v12, %v7220_v5  ;;  %v12673_v51 = vpack.c.bf16 %v10215_v17, %v10214_v7  ;;  %v10239_v38 = vld [vmem:[%s16194_s12 + $0x78] sm:$0xff]  ;;  %v10242_v28 = vld [vmem:[%s16193_s11 + $0x30] sm:$0xff]  ;;  %v13190_v21 = vmov 0.0|0.0   ;;  %v10254_v12 = vld [vmem:[%s16195_s13 + $0xa0] sm:$0xff] }
 0x9d9   : > { %v6787_v35 = vrot.slane %v6780_v34, %v14565_v50  ;;  %v6756_v56 = vcombine.low %v6748_v25, %v6755_v52  ;;  %v12677_v52 = vpack.c.bf16 %v10217_v4, %v10216_v14  ;;  %v12705_v23 = vpack.c.bf16 %v10239_v38, %v10238_v55  ;;  %v10243_v8 = vld [vmem:[%s16193_s11 + $0x38] sm:$0x1]  ;;  %v8026_v48 = vld [vmem:[%s16195_s13 + $0x10] sm:$0xff]  ;;  %v8028_v7 = vld [vmem:[%s16195_s13 + $0x20] sm:$0xff] }
 0x9da   : > { %12670 = vmatprep.subr.bf16.mxu0 %v12669_v3  ;;  %v10253_v47 = vld [vmem:[%s16195_s13 + $0x98] sm:$0xff]  ;;  %v10258_v4 = vld [vmem:[%s16195_s13 + $0xc0] sm:$0xff] }
 0x9db   : > { %v6795_v10 = vcombine.low %v6787_v35, %v6794_v9  ;;  %6805 = vst.msk [vmem:[#allocation3 + $0x18] sm:$0x1f] %vm6801_vm1, %v6756_v56  ;;  %12672 = vmatpush3.bf16.msra.mxu0 %v12669_v3  ;;  %v10220_v35 = vld [vmem:[%s16193_s11 + $0x10] sm:$0xff]  ;;  %v10255_v3 = vld [vmem:[%s16195_s13 + $0xa8] sm:$0xff] }
 0x9dc   : > { %12674 = vmatprep.subr.bf16.mxu0 %v12673_v51  ;;  %v12720_v17 = vpack.c.bf16 %v10255_v3, %v10254_v12  ;;  %v13193_v3 = vmov 1983009808  }
 0x9dd   : > { %v13165_v22 = vld [vmem:[#allocation3 + $0x1] ss:$8 sps:$4 sm:$0xff]   ;;  %6806 = vst.msk [vmem:[#allocation3 + $0x20] sm:$0x1f] %vm6801_vm1, %v6795_v10 }
 0x9de   : > { %12073 = vmatprep.mubr.msk.f32.mxu1 %vm5813_vm15, %v13165_v22  ;;  %v13167_v54 = vld [vmem:[#allocation3] ss:$8 sps:$4 sm:$0xff]  }
 0x9df   : > { %v13169_v42 = vld [vmem:[#allocation3 + $0x8] ss:$8 sps:$4 sm:$0xff]  }
 0x9e0   : > { %v13171_v45 = vld [vmem:[#allocation3 + $0x9] ss:$8 sps:$4 sm:$0xff]  }
 0x9e2   : > { %v13166_v39 = vld [vmem:[#allocation3 + $0x11] ss:$8 sps:$4 sm:$0xff]  }
 0x9e3   : > { %12074 = vmatmul.mubr.msk.f32.vlgmr.msra.gmra.mrb[188].mxu1 %vm5813_vm15, %v13166_v39  ;;  %v13168_v24 = vld [vmem:[#allocation3 + $0x10] ss:$8 sps:$4 sm:$0xff]  }
 0x9e4   : > { %12620 = vmatpush3.bf16.msra.mxu1 %v15063_v29  ;;  %12092 = vmatprep.mubr.msk.f32.mxu1 %vm5813_vm15, %v13167_v54  ;;  %v10192_v29 = vld [vmem:[%s16191_s9 + $0x88] sm:$0xff]  ;;  %v7303_v54 = vld [vmem:[%s16193_s11] sm:$0xff] }
 0x9e5   : > { %12622 = vmatprep.subr.bf16.mxu1 %v12621_v33  ;;  %v12633_v60 = vpack.c.bf16 %v10192_v29, %v10191_v19  ;;  %v13170_v26 = vld [vmem:[#allocation3 + $0x18] ss:$8 sps:$4 sm:$0xff]   ;;  %v12693_v19 = vpack.c.bf16 %v10229_v53, %v10228_v18  ;;  %v10232_v29 = vld [vmem:[%s16193_s11 + $0x20] sm:$0xff]  ;;  %v10265_v53 = vld [vmem:[%s16195_s13 + $0xf8] sm:$0xff] }
 0x9e6   : > { %v13172_v0 = vld [vmem:[#allocation3 + $0x19] ss:$8 sps:$4 sm:$0xff]  }
 0x9e7   : > { %v10227_v39 = vld [vmem:[%s16194_s12 + $0x48] sm:$0xff]  ;;  %v10264_v18 = vld [vmem:[%s16195_s13 + $0xf0] sm:$0xff] }
 0x9e8   : > { %12624 = vmatpush3.bf16.msra.mxu1 %v12621_v33  ;;  %v10221_v33 = vld [vmem:[%s16193_s11 + $0x18] sm:$0x1] }
 0x9e9   : > { %12626 = vmatprep.subr.bf16.mxu1 %v12625_v1 }
 0x9ec   : > { %12628 = vmatpush3.bf16.msra.mxu1 %v12625_v1  ;;  %v12689_v1 = vpack.c.bf16 %v10227_v39, %v10226_v46  ;;  %v10262_v46 = vld [vmem:[%s16195_s13 + $0xe0] sm:$0xff]  ;;  %v10263_v39 = vld [vmem:[%s16195_s13 + $0xe8] sm:$0xff] }
 0x9ed   : > { %12630 = vmatprep.subr.bf16.mxu1 %v12629_v13 }
 0x9f0   : > { %12632 = vmatpush3.bf16.msra.mxu1 %v12629_v13  ;;  %v7304_v13 = vld [vmem:[%s16193_s11 + $0x8] sm:$0x1] }
 0x9f1   : > { %12634 = vmatprep.subr.bf16.mxu1 %v12633_v60 }
 0x9f3   : > { %12093 = vmatmul.mubr.msk.f32.vlgmr.msra.gmra.mrb[188].mxu1 %vm5813_vm15, %v13168_v24 }
 0x9f4   : > { %12636 = vmatpush3.bf16.msra.mxu1 %v12633_v60  ;;  %12111 = vmatprep.mubr.msk.f32.mxu1 %vm5813_vm15, %v13169_v42  ;;  %v10236_v60 = vld [vmem:[%s16194_s12 + $0x60] sm:$0xff] }
 0x9f5   : > { %12638 = vmatprep.subr.bf16.mxu1 %v12637_v32  ;;  %v12701_v42 = vpack.c.bf16 %v10237_v20, %v10236_v60  ;;  %v8039_v60 = vld [vmem:[%s16195_s13 + $0x78] sm:$0xff]  ;;  %v12735_v20 = vpack.c.bf16 %v10265_v53, %v10264_v18 }
 0x9f6   : > { %v10289_v18 = vld [vmem:[%s16195_s13 + $0x1b8] sm:$0xff] }
 0x9f8   : > { %12640 = vmatpush3.bf16.msra.mxu1 %v12637_v32 }
 0x9f9   : > { %12642 = vmatprep.subr.bf16.mxu1 %v12641_v44 }
 0x9fc   : > { %12644 = vmatpush3.bf16.msra.mxu1 %v12641_v44  ;;  %v10233_v44 = vld [vmem:[%s16193_s11 + $0x28] sm:$0x1] }
 0x9fd   : > { %12646 = vmatprep.subr.bf16.mxu1 %v12645_v30 }
 0xa00   : > { %12648 = vmatpush3.bf16.msra.mxu1 %v12645_v30  ;;  %v10250_v30 = vld [vmem:[%s16195_s13 + $0x80] sm:$0xff] }
 0xa01   : > { %12650 = vmatprep.subr.bf16.mxu1 %v12649_v43 }
 0xa03   : > { %12112 = vmatmul.mubr.msk.f32.vlgmr.msra.gmra.mrb[188].mxu1 %vm5813_vm15, %v13170_v26 }
 0xa04   : > { %12652 = vmatpush3.bf16.msra.mxu1 %v12649_v43  ;;  %12130 = vmatprep.mubr.msk.f32.mxu1 %vm5813_vm15, %v13171_v45  ;;  %v12714_v43 = vpack.c.bf16 %v10251_v62, %v10250_v30  ;;  %v8025_v45 = vld [vmem:[%s16195_s13 + $0x8] sm:$0xff] }
 0xa05   : > { %12654 = vmatprep.subr.bf16.mxu1 %v12653_v49 }
 0xa08   : > { %12656 = vmatpush3.bf16.msra.mxu1 %v12653_v49  ;;  %v8024_v49 = vld [vmem:[%s16195_s13] sm:$0xff] }
 0xa09   : > { %12658 = vmatprep.subr.bf16.mxu1 %v12657_v41  ;;  %v12738_v36 = vpack.c.bf16 %v8025_v45, %v8024_v49 }
 0xa0c   : > { %12660 = vmatpush3.bf16.msra.mxu1 %v12657_v41  ;;  %v10252_v41 = vld [vmem:[%s16195_s13 + $0x90] sm:$0xff] }
 0xa0d   : > { %12662 = vmatprep.subr.bf16.mxu1 %v12661_v59 }
 0xa10   : > { %12664 = vmatpush3.bf16.msra.mxu1 %v12661_v59  ;;  %v12717_v59 = vpack.c.bf16 %v10253_v47, %v10252_v41 }
 0xa11   : > { %12713 = vmatprep.subr.bf16.mxu1 %v13190_v21 }
 0xa13   : > { %12131 = vmatmul.mubr.msk.f32.vlgmr.msra.gmra.mrb[188].mxu1 %vm5813_vm15, %v13172_v0  ;;  %v8027_v0 = vld [vmem:[%s16195_s13 + $0x18] sm:$0xff] }
 0xa14   : > { %12715 = vmatpush3.bf16.msra.mxu1 %v12714_v43  ;;  %v12741_v5 = vpack.c.bf16 %v8027_v0, %v8026_v48 }
 0xa15   : > { %12716 = vmatprep.subr.bf16.mxu1 %v13190_v21 }
 0xa18   : > { %12718 = vmatpush3.bf16.msra.mxu1 %v12717_v59 }
 0xa19   : > { %12719 = vmatprep.subr.bf16.mxu1 %v13190_v21 }
 0xa1c   : > { %12721 = vmatpush3.bf16.msra.mxu1 %v12720_v17 }
 0xa1d   : > { %12722 = vmatprep.subr.bf16.mxu1 %v13190_v21 }
 0xae6   : > { %v12132_v58 = vpop.f32.mrb[188].mxu1 }
 0xae7   : > { %v7211_v61 = vadd.f32 %v12132_v58, %v10211_v16  ;;  %v7192_v63 = vpop.f32.mrb[189].mxu1  ;;  %v10256_v58 = vld [vmem:[%s16195_s13 + $0xb0] sm:$0xff] }
 0xae8   : > { %v7210_v2 = vadd.f32 %v10211_v16, %v7192_v63  ;;  %v8030_v63 = vld [vmem:[%s16195_s13 + $0x30] sm:$0xff] }
 0xae9   : > { %v7215_v37 = vmul.f32 0.2, %v7211_v61  ;;  %vm7213_vm2 = vcmp.ge.f32.partialorder %v7211_v61, 0.0 }
 0xaea   : > { %vm7212_vm4 = vcmp.ge.f32.partialorder %v7210_v2, 0.0  ;;  %v7214_v34 = vmul.f32 0.2, %v7210_v2 }
 0xaeb   : > { %v7217_v9 = vsel %vm7213_vm2, %v7211_v61, %v7215_v37  ;;  %v10257_v61 = vld [vmem:[%s16195_s13 + $0xb8] sm:$0xff] }
 0xaec   : > { %v7216_v25 = vsel %vm7212_vm4, %v7210_v2, %v7214_v34  ;;  %v12723_v2 = vpack.c.bf16 %v10257_v61, %v10256_v58  ;;  %v8031_v37 = vld [vmem:[%s16195_s13 + $0x38] sm:$0xff]  ;;  %v10259_v34 = vld [vmem:[%s16195_s13 + $0xc8] sm:$0xff]  ;;  %v10266_v58 = vld [vmem:[%s16195_s13 + $0x100] sm:$0xff] }
 0xaed   : > { %12141 = vmatprep.mubr.msk.f32.mxu0 %vm4922_vm6, %v7216_v25  ;;  %v12747_v14 = vpack.c.bf16 %v8031_v37, %v8030_v63  ;;  %v10267_v63 = vld [vmem:[%s16195_s13 + $0x108] sm:$0xff] }
 0xaee   : > { %12142 = vmatmul.mubr.msk.f32.vlgmr.msra.gmra.mrb[104].mxu0 %vm4922_vm6, %v7217_v9  ;;  %12724 = vmatpush3.bf16.msra.mxu1 %v12723_v2  ;;  %v10283_v2 = vld [vmem:[%s16195_s13 + $0x188] sm:$0xff] }
 0xaef   : > { %12676 = vmatpush3.bf16.msra.mxu0 %v12673_v51  ;;  %12152 = vmatprep.mubr.msk.f32.mxu0 %vm4922_vm6, %v7216_v25  ;;  %v8029_v51 = vld [vmem:[%s16195_s13 + $0x28] sm:$0xff] }
 0xaf0   : > { %12678 = vmatprep.subr.bf16.mxu0 %v12677_v52  ;;  %v12744_v16 = vpack.c.bf16 %v8029_v51, %v8028_v7  ;;  %12725 = vmatprep.subr.bf16.mxu1 %v13190_v21  ;;  %v8063_v7 = vunpack.c.l.s4 %v13193_v3  ;;  %v10303_v3 = vld [vmem:[%s16198_s16 + $0x98] sm:$0xff] }
 0xaf3   : > { %12680 = vmatpush3.bf16.msra.mxu0 %v12677_v52  ;;  %v12726_v52 = vpack.c.bf16 %v10259_v34, %v10258_v4  ;;  %v12762_v34 = vpack.c.bf16 %v10267_v63, %v10266_v58  ;;  %v10300_v58 = vld [vmem:[%s16198_s16 + $0x80] sm:$0xff]  ;;  %v10302_v63 = vld [vmem:[%s16198_s16 + $0x90] sm:$0xff] }
 0xaf5   : > { %12727 = vmatpush3.bf16.msra.mxu1 %v12726_v52  ;;  %v10269_v52 = vld [vmem:[%s16195_s13 + $0x118] sm:$0xff] }
 0xaf6   : > { %12153 = vmatmul.mubr.msk.f32.vlgmr.msra.gmra.mrb[106].mxu0 %vm4922_vm6, %v7217_v9  ;;  %12728 = vmatprep.subr.bf16.mxu1 %v13190_v21 }
 0xaf7   : > { %12159 = vmatprep.mubr.msk.f32.mxu0 %vm670_vm0, %v10220_v35 }
 0xbc1   : > { %v12143_v56 = vpop.f32.mrb[104].mxu0 }
 0xbc2   : > { %v7294_v10 = vpop.f32.mrb[105].mxu0 }
 0xbc3   : > { %v12685_v22 = vpack.c.bf16 %v12143_v56, %v7294_v10  ;;  %v10260_v56 = vld [vmem:[%s16195_s13 + $0xd0] sm:$0xff]  ;;  %v10261_v10 = vld [vmem:[%s16195_s13 + $0xd8] sm:$0xff] }
 0xbc9   : > { %v12154_v27 = vpop.f32.mrb[106].mxu0 }
 0xbca   : > { %v7376_v6 = vpop.f32.mrb[107].mxu0 }
 0xbcb   : > { %v12681_v11 = vpack.c.bf16 %v12154_v27, %v7376_v6  ;;  %v12729_v27 = vpack.c.bf16 %v10261_v10, %v10260_v56  ;;  %v8035_v6 = vld [vmem:[%s16195_s13 + $0x58] sm:$0xff] }
 0xbcd   : > { %12682 = vmatprep.subr.bf16.mxu0 %v12681_v11  ;;  %12730 = vmatpush3.bf16.msra.mxu1 %v12729_v27  ;;  %v10271_v27 = vld [vmem:[%s16195_s13 + $0x128] sm:$0xff] }
 0xbce   : > { %12684 = vmatpush3.bf16.msra.mxu0 %v12681_v11  ;;  %12731 = vmatprep.subr.bf16.mxu1 %v13190_v21 }
 0xbcf   : > { %12686 = vmatprep.subr.bf16.mxu0 %v12685_v22 }
 0xbd1   : > { %12160 = vmatmul.mubr.msk.f32.vlgmr.msra.gmra.mrb[108].mxu0 %vm670_vm0, %v10221_v33  ;;  %v8036_v33 = vld [vmem:[%s16195_s13 + $0x60] sm:$0xff] }
 0xbd2   : > { %12688 = vmatpush3.bf16.msra.mxu0 %v12685_v22  ;;  %12166 = vmatprep.mubr.msk.f32.mxu0 %vm670_vm0, %v7303_v54  ;;  %v8034_v22 = vld [vmem:[%s16195_s13 + $0x50] sm:$0xff]  ;;  %v12732_v54 = vpack.c.bf16 %v10263_v39, %v10262_v46 }
 0xbd3   : > { %12690 = vmatprep.subr.bf16.mxu0 %v12689_v1  ;;  %v12753_v11 = vpack.c.bf16 %v8035_v6, %v8034_v22  ;;  %v10270_v22 = vld [vmem:[%s16195_s13 + $0x120] sm:$0xff] }
 0xbd4   : > { %12733 = vmatpush3.bf16.msra.mxu1 %v12732_v54  ;;  %v10286_v6 = vld [vmem:[%s16195_s13 + $0x1a0] sm:$0xff]  ;;  %v12768_v46 = vpack.c.bf16 %v10271_v27, %v10270_v22  ;;  %v10273_v54 = vld [vmem:[%s16195_s13 + $0x138] sm:$0xff]  ;;  %v8444_v27 = vld [vmem:[%s16198_s16 + $0x48] sm:$0xff] }
 0xbd5   : > { %12734 = vmatprep.subr.bf16.mxu1 %v13190_v21 }
 0xbd8   : > { %12736 = vmatpush3.bf16.msra.mxu1 %v12735_v20  ;;  %v10290_v20 = vld [vmem:[%s16195_s13 + $0x1c0] sm:$0xff] }
 0xbd9   : > { %12167 = vmatmul.mubr.msk.f32.vlgmr.msra.gmra.mrb[108].mxu0 %vm670_vm0, %v7304_v13  ;;  %v13192_v13 = vmov 0.0   ;;  %12761 = vmatprep.subr.bf16.mxu1 %v13190_v21 }
 0xbda   : > { %12692 = vmatpush3.bf16.msra.mxu0 %v12689_v1  ;;  %12177 = vmatprep.mubr.msk.f32.mxu0 %vm4922_vm6, %v7216_v25  ;;  %v8037_v1 = vld [vmem:[%s16195_s13 + $0x68] sm:$0xff] }
 0xbdb   : > { %12694 = vmatprep.subr.bf16.mxu0 %v12693_v19 }
 0xbde   : > { %12696 = vmatpush3.bf16.msra.mxu0 %v12693_v19  ;;  %v12756_v19 = vpack.c.bf16 %v8037_v1, %v8036_v33  ;;  %v10272_v33 = vld [vmem:[%s16195_s13 + $0x130] sm:$0xff] }
 0xbdf   : > { %v10288_v1 = vld [vmem:[%s16195_s13 + $0x1b0] sm:$0xff]  ;;  %v12771_v53 = vpack.c.bf16 %v10273_v54, %v10272_v33  ;;  %v8443_v33 = vld [vmem:[%s16198_s16 + $0x40] sm:$0xff] }
 0xbe0   : > { %v8445_v54 = vld [vmem:[%s16198_s16 + $0x50] sm:$0xff] }
 0xbe1   : > { %12178 = vmatmul.mubr.msk.f32.vlgmr.msra.gmra.mrb[110].mxu0 %vm4922_vm6, %v7217_v9 }
 0xbe2   : > { %12184 = vmatprep.mubr.msk.f32.mxu0 %vm670_vm0, %v10232_v29  ;;  %v8038_v29 = vld [vmem:[%s16195_s13 + $0x70] sm:$0xff] }
 0xcb4   : > { %v12179_v15 = vpop.f32.mrb[110].mxu0 }
 0xcb5   : > { %v7621_v24 = vpop.f32.mrb[111].mxu0 }
 0xcb6   : > { %v12697_v32 = vpack.c.bf16 %v12179_v15, %v7621_v24  ;;  %v12759_v15 = vpack.c.bf16 %v8039_v60, %v8038_v29  ;;  %v10274_v29 = vld [vmem:[%s16195_s13 + $0x140] sm:$0xff]  ;;  %v10275_v60 = vld [vmem:[%s16195_s13 + $0x148] sm:$0xff] }
 0xcb8   : > { %12698 = vmatprep.subr.bf16.mxu0 %v12697_v32 }
 0xcb9   : > { %12700 = vmatpush3.bf16.msra.mxu0 %v12697_v32 }
 0xcba   : > { %12702 = vmatprep.subr.bf16.mxu0 %v12701_v42 }
 0xcbc   : > { %12185 = vmatmul.mubr.msk.f32.vlgmr.msra.gmra.mrb[108].mxu0 %vm670_vm0, %v10233_v44 }
 0xcbd   : > { %12704 = vmatpush3.bf16.msra.mxu0 %v12701_v42  ;;  %12195 = vmatprep.mubr.msk.f32.mxu0 %vm4922_vm6, %v7216_v25  ;;  %v8032_v25 = vld [vmem:[%s16195_s13 + $0x40] sm:$0xff] }
 0xcbe   : > { %12706 = vmatprep.subr.bf16.mxu0 %v12705_v23 }
 0xcc1   : > { %12708 = vmatpush3.bf16.msra.mxu0 %v12705_v23 }
 0xcc4   : > { %12196 = vmatmul.mubr.msk.f32.vlgmr.msra.gmra.mrb[112].mxu0 %vm4922_vm6, %v7217_v9  ;;  %v8033_v9 = vld [vmem:[%s16195_s13 + $0x48] sm:$0xff]  ;;  %vm8616_vm6 = vcmask 31744  }
 0xcc5   : > { %12202 = vmatprep.mubr.msk.f32.mxu0 %vm670_vm0, %v10242_v28  ;;  %v12750_v35 = vpack.c.bf16 %v8033_v9, %v8032_v25  ;;  %v10284_v9 = vld [vmem:[%s16195_s13 + $0x190] sm:$0xff] }
 0xd97   : > { %v12197_v57 = vpop.f32.mrb[112].mxu0 }
 0xd98   : > { %v7787_v40 = vpop.f32.mrb[113].mxu0 }
 0xd99   : > { %v12709_v26 = vpack.c.bf16 %v12197_v57, %v7787_v40 }
 0xd9b   : > { %12710 = vmatprep.subr.bf16.mxu0 %v12709_v26 }
 0xd9c   : > { %12712 = vmatpush3.bf16.msra.mxu0 %v12709_v26 }
 0xd9d   : > { %12737 = vmatprep.subr.bf16.mxu0 %v13190_v21 }
 0xd9f   : > { %12203 = vmatmul.mubr.msk.f32.vlgmr.msra.gmra.mrb[108].mxu0 %vm670_vm0, %v10243_v8  ;;  %vm13191_vm0 = vmmov 0  }
 0xda0   : > { %12739 = vmatpush3.bf16.msra.mxu0 %v12738_v36  ;;  %12237 = vmatprep.mubr.msk.f32.mxu1 %vm13191_vm0, %v13192_v13 }
 0xda1   : > { %12740 = vmatprep.subr.bf16.mxu0 %v13190_v21  ;;  %12272 = vmatprep.mubr.msk.f32.mxu0 %vm13191_vm0, %v13192_v13 }
 0xda4   : > { %12742 = vmatpush3.bf16.msra.mxu0 %v12741_v5 }
 0xda5   : > { %12743 = vmatprep.subr.bf16.mxu0 %v13190_v21 }
 0xda8   : > { %12745 = vmatpush3.bf16.msra.mxu0 %v12744_v16  ;;  %v8064_v16 = vunpack.c.0.s8 %v8063_v7  ;;  %v8435_v7 = vld [vmem:[%s16198_s16] sm:$0xff] }
 0xda9   : > { %12746 = vmatprep.subr.bf16.mxu0 %v13190_v21 }
 0xdaa   : > { %v15418_v61 = vsub.s32 %v8064_v16, %v14562_v31 }
 0xdac   : > { %12748 = vmatpush3.bf16.msra.mxu0 %v12747_v14  ;;  %v10268_v14 = vld [vmem:[%s16195_s13 + $0x110] sm:$0xff] }
 0xdad   : > { %12749 = vmatprep.subr.bf16.mxu0 %v13190_v21  ;;  %v12765_v56 = vpack.c.bf16 %v10269_v52, %v10268_v14  ;;  %v10305_v14 = vld [vmem:[%s16198_s16 + $0xa8] sm:$0xff]  ;;  %v8439_v52 = vld [vmem:[%s16198_s16 + $0x20] sm:$0xff] }
 0xdb0   : > { %12751 = vmatpush3.bf16.msra.mxu0 %v12750_v35  ;;  %v10285_v35 = vld [vmem:[%s16195_s13 + $0x198] sm:$0xff] }
 0xdb1   : > { %12752 = vmatprep.subr.bf16.mxu0 %v13190_v21  ;;  %v12789_v10 = vpack.c.bf16 %v10285_v35, %v10284_v9  ;;  %v8441_v9 = vld [vmem:[%s16198_s16 + $0x30] sm:$0xff]  ;;  %v10304_v35 = vld [vmem:[%s16198_s16 + $0xa0] sm:$0xff] }
 0xdb4   : > { %12754 = vmatpush3.bf16.msra.mxu0 %v12753_v11  ;;  %v10287_v11 = vld [vmem:[%s16195_s13 + $0x1a8] sm:$0xff] }
 0xdb5   : > { %12755 = vmatprep.subr.bf16.mxu0 %v13190_v21  ;;  %v12792_v39 = vpack.c.bf16 %v10287_v11, %v10286_v6  ;;  %v8446_v6 = vld [vmem:[%s16198_s16 + $0x58] sm:$0xff]  ;;  %v10309_v11 = vld [vmem:[%s16198_s16 + $0xc8] sm:$0xff] }
 0xdb8   : > { %12757 = vmatpush3.bf16.msra.mxu0 %v12756_v19  ;;  %v12795_v19 = vpack.c.bf16 %v10289_v18, %v10288_v1  ;;  %v12819_v18 = vpack.c.bf16 %v8445_v54, %v8443_v33  ;;  %v10351_v33 = vld [vmem:[%s16198_s16 + $0x1b0] sm:$0xff]  ;;  %v10333_v54 = vld [vmem:[%s16198_s16 + $0x148] sm:$0xff] }
 0xdb9   : > { %12758 = vmatprep.subr.bf16.mxu0 %v13190_v21 }
 0xdbc   : > { %12760 = vmatpush3.bf16.msra.mxu0 %v12759_v15  ;;  %v10291_v15 = vld [vmem:[%s16195_s13 + $0x1c8] sm:$0xff] }
 0xdbd   : > { %12785 = vmatprep.subr.bf16.mxu0 %v13190_v21 }
 0xe72   : > { %v12204_v24 = vpop.f32.mrb[108].mxu0 }
 0xe73   : > { %v7871_v32 = vpop.f32.mrb[109].mxu0  ;;  %v7939_v38 = vrot.slane %v12204_v24, %v14565_v50  ;;  %v12774_v24 = vpack.c.bf16 %v10275_v60, %v10274_v29  ;;  %v8448_v60 = vld [vmem:[%s16198_s16 + $0x68] sm:$0xff] }
 0xe74   : > { %v7884_v42 = vcombine.high %v7871_v32, %v7871_v32  ;;  %v7891_v55 = vrot.slane %v7871_v32, %v14565_v50  ;;  %v12798_v32 = vpack.c.bf16 %v10291_v15, %v10290_v20  ;;  %v8450_v20 = vld [vmem:[%s16198_s16 + $0x78] sm:$0xff]  ;;  %v10313_v15 = vld [vmem:[%s16198_s16 + $0xe8] sm:$0xff] }
 0xe75   : > { %v7946_v57 = vrot.slane %v7939_v38, %v14565_v50  ;;  %v10292_v38 = vld [vmem:[%s16195_s13 + $0x1d0] sm:$0xff] }
 0xe76   : > { %v7898_v44 = vrot.slane %v7884_v42, %v14565_v50  ;;  %v7899_v23 = vcombine.high %v7891_v55, %v7891_v55  ;;  %v7907_v28 = vrot.slane %v7891_v55, %v14565_v50  ;;  %v10276_v42 = vld [vmem:[%s16195_s13 + $0x150] sm:$0xff]  ;;  %v10277_v55 = vld [vmem:[%s16195_s13 + $0x158] sm:$0xff] }
 0xe77   : > { %v8007_v48 = vrot.slane %v7946_v57, %v14565_v50  ;;  %v10295_v57 = vld [vmem:[%s16195_s13 + $0x1e8] sm:$0xff] }
 0xe78   : > { %v7900_v30 = vcombine.high %v7898_v44, %v7898_v44  ;;  %v7921_v62 = vrot.slane %v7899_v23, %v14565_v50  ;;  %v7929_v43 = vcombine.high %v7907_v28, %v7907_v28  ;;  %v7914_v40 = vrot.slane %v7898_v44, %v14565_v50  ;;  %v10293_v44 = vld [vmem:[%s16195_s13 + $0x1d8] sm:$0xff] }
 0xe79   : > { %v12777_v23 = vpack.c.bf16 %v10277_v55, %v10276_v42  ;;  %v8447_v42 = vld [vmem:[%s16198_s16 + $0x60] sm:$0xff]  ;;  %v8449_v55 = vld [vmem:[%s16198_s16 + $0x70] sm:$0xff] }
 0xe7a   : > { %v7928_v26 = vrot.slane %v7900_v30, %v14565_v50  ;;  %v7931_v49 = vcombine.high %v7921_v62, %v7921_v62  ;;  %v7947_v45 = vcombine.low %v7907_v28, %v7921_v62  ;;  %v7961_v36 = vrot.slane %v7929_v43, %v14565_v50  ;;  %v10278_v30 = vld [vmem:[%s16195_s13 + $0x160] sm:$0xff]  ;;  %v10279_v62 = vld [vmem:[%s16195_s13 + $0x168] sm:$0xff] }
 0xe7b   : > { %v12801_v28 = vpack.c.bf16 %v10293_v44, %v10292_v38  ;;  %v10294_v43 = vld [vmem:[%s16195_s13 + $0x1e0] sm:$0xff]  ;;  %v12823_v44 = vpack.c.bf16 %v8449_v55, %v8447_v42  ;;  %v10355_v42 = vld [vmem:[%s16198_s16 + $0x1d0] sm:$0xff]  ;;  %v10337_v55 = vld [vmem:[%s16198_s16 + $0x168] sm:$0xff] }
 0xe7c   : > { %v7954_v8 = vrot.slane %v7947_v45, %v14565_v50  ;;  %v7970_v41 = vcombine.low %v7931_v49, %v7914_v40  ;;  %v10246_v47 = vcombine.high %v7914_v40, %v7928_v26  ;;  %v7984_v5 = vrot.slane %v7928_v26, %v14565_v50  ;;  %v10280_v49 = vld [vmem:[%s16195_s13 + $0x170] sm:$0xff]  ;;  %v10281_v45 = vld [vmem:[%s16195_s13 + $0x178] sm:$0xff] }
 0xe7d   : > { %v12780_v40 = vpack.c.bf16 %v10279_v62, %v10278_v30  ;;  %v12804_v26 = vpack.c.bf16 %v10295_v57, %v10294_v43 }
 0xe7e   : > { %v7962_v59 = vcombine.low %v7954_v8, %v7961_v36  ;;  %v7977_v0 = vrot.slane %v7970_v41, %v14565_v50  ;;  %v8000_v12 = vrot.slane %v10246_v47, %v14565_v50  ;;  %v10282_v50 = vld [vmem:[%s16195_s13 + $0x180] sm:$0xff]  ;;  %v10296_v8 = vld [vmem:[%s16195_s13 + $0x1f0] sm:$0xff]  ;;  %v10297_v36 = vld [vmem:[%s16195_s13 + $0x1f8] sm:$0xff]  ;;  %v12783_v41 = vpack.c.bf16 %v10281_v45, %v10280_v49 }
 0xe7f   : > { %v12786_v25 = vpack.c.bf16 %v10283_v2, %v10282_v50  ;;  %v12807_v47 = vpack.c.bf16 %v10297_v36, %v10296_v8  ;;  %v8440_v50 = vld [vmem:[%s16198_s16 + $0x28] sm:$0xff]  ;;  %v12827_v2 = vpack.c.bf16 %v10302_v63, %v10300_v58  ;;  %v10347_v58 = vld [vmem:[%s16198_s16 + $0x190] sm:$0xff] }
 0xe80   : > { %v7985_v17 = vcombine.low %v7977_v0, %v7984_v5  ;;  %v8008_v51 = vcombine.low %v8000_v12, %v8007_v48  ;;  %10247 = vst.sshfl [vmem:[#allocation4] sm:$0x15 pattern:$0x73625140] %v7962_v59  ;;  %v8436_v0 = vld [vmem:[%s16198_s16 + $0x8] sm:$0xff]  ;;  %v8438_v5 = vld [vmem:[%s16198_s16 + $0x18] sm:$0xff] }
 0xe81   : > { %v12809_v12 = vpack.c.bf16 %v8438_v5, %v8436_v0  ;;  %v10329_v63 = vld [vmem:[%s16198_s16 + $0x128] sm:$0xff] }
 0xe82   : > { %10248 = vst.sshfl [vmem:[#allocation4 + $0x4] sm:$0x15 pattern:$0x73625140] %v7985_v17  ;;  %v8437_v17 = vld [vmem:[%s16198_s16 + $0x10] sm:$0xff] }
 0xe83   : > { %10249 = vst.sshfl [vmem:[#allocation4 + $0x8] sm:$0x15 pattern:$0x73625140] %v8008_v51  ;;  %v12811_v16 = vpack.c.bf16 %v8437_v17, %v8435_v7  ;;  %v10348_v7 = vld [vmem:[%s16198_s16 + $0x198] sm:$0xff]  ;;  %v10324_v17 = vld [vmem:[%s16198_s16 + $0x100] sm:$0xff] }
 0xe89   : > { %v13177_v37 = vld.sshfl [vmem:[#allocation4 + $0x1] sm:$0xf pattern:$0x76325410] }
 0xe8a   : > { %v13178_v4 = vld.sshfl [vmem:[#allocation4] sm:$0xf pattern:$0x76325410]  ;;  %12238 = vmatmul.mubr.f32.vlgmr.msra.gmra.mrb[190].mxu1 %v13177_v37 }
 0xe8b   : > { %12273 = vmatmul.mubr.f32.vlgmr.msra.gmra.mrb[114].mxu0 %v13178_v4  ;;  %12763 = vmatpush3.bf16.msra.mxu1 %v12762_v34  ;;  %v13179_v48 = vld.sshfl [vmem:[#allocation4 + $0x4] sm:$0xf pattern:$0x76325410] }
 0xe8c   : > { %12787 = vmatpush3.bf16.msra.mxu0 %v12786_v25  ;;  %12764 = vmatprep.subr.bf16.mxu1 %v13190_v21  ;;  %v13180_v59 = vld.sshfl [vmem:[#allocation4 + $0x5] sm:$0xf pattern:$0x76325410] }
 0xe8d   : > { %12788 = vmatprep.subr.bf16.mxu0 %v13190_v21  ;;  %12307 = vmatprep.mubr.msk.f32.mxu1 %vm13191_vm0, %v13192_v13  ;;  %v8442_v37 = vld [vmem:[%s16198_s16 + $0x38] sm:$0xff] }
 0xe8e   : > { %12342 = vmatprep.mubr.msk.f32.mxu0 %vm13191_vm0, %v13192_v13  ;;  %v10307_v4 = vld [vmem:[%s16198_s16 + $0xb8] sm:$0xff]  ;;  %v12813_v34 = vpack.c.bf16 %v8442_v37, %v8440_v50 }
 0xe8f   : > { %12766 = vmatpush3.bf16.msra.mxu1 %v12765_v56  ;;  %v12829_v25 = vpack.c.bf16 %v10307_v4, %v10305_v14  ;;  %v12815_v56 = vpack.c.bf16 %v8441_v9, %v8439_v52  ;;  %v10331_v4 = vld [vmem:[%s16198_s16 + $0x138] sm:$0xff] }
 0xe90   : > { %12790 = vmatpush3.bf16.msra.mxu0 %v12789_v10  ;;  %12767 = vmatprep.subr.bf16.mxu1 %v13190_v21  ;;  %v10306_v10 = vld [vmem:[%s16198_s16 + $0xb0] sm:$0xff] }
 0xe91   : > { %12791 = vmatprep.subr.bf16.mxu0 %v13190_v21  ;;  %v12831_v22 = vpack.c.bf16 %v10306_v10, %v10304_v35  ;;  %v10317_v35 = vld [vmem:[%s16197_s15 + $0x4] sm:$0xf] }
 0xe93   : > { %12769 = vmatpush3.bf16.msra.mxu1 %v12768_v46  ;;  %v12817_v46 = vpack.c.bf16 %v8446_v6, %v8444_v27  ;;  %v10328_v27 = vld [vmem:[%s16198_s16 + $0x120] sm:$0xff]  ;;  %v10330_v6 = vld [vmem:[%s16198_s16 + $0x130] sm:$0xff] }
 0xe94   : > { %12793 = vmatpush3.bf16.msra.mxu0 %v12792_v39  ;;  %12770 = vmatprep.subr.bf16.mxu1 %v13190_v21  ;;  %v10311_v39 = vld [vmem:[%s16198_s16 + $0xd8] sm:$0xff] }
 0xe95   : > { %12794 = vmatprep.subr.bf16.mxu0 %v13190_v21  ;;  %v12833_v1 = vpack.c.bf16 %v10311_v39, %v10309_v11  ;;  %v12845_v11 = vpack.c.bf16 %v10331_v4, %v10329_v63  ;;  %v10349_v39 = vld [vmem:[%s16198_s16 + $0x1a0] sm:$0xff] }
 0xe96   : > { %v10371_v63 = vld [vmem:[%s16199_s17 + $0x120] sm:$0xff] }
 0xe97   : > { %12772 = vmatpush3.bf16.msra.mxu1 %v12771_v53  ;;  %v10308_v53 = vld [vmem:[%s16198_s16 + $0xc0] sm:$0xff] }
 0xe98   : > { %12796 = vmatpush3.bf16.msra.mxu0 %v12795_v19  ;;  %12773 = vmatprep.subr.bf16.mxu1 %v13190_v21  ;;  %v10310_v19 = vld [vmem:[%s16198_s16 + $0xd0] sm:$0xff] }
 0xe99   : > { %12797 = vmatprep.subr.bf16.mxu0 %v13190_v21  ;;  %v12835_v29 = vpack.c.bf16 %v10310_v19, %v10308_v53  ;;  %v10356_v53 = vld [vmem:[%s16198_s16 + $0x1d8] sm:$0xff]  ;;  %v12847_v19 = vpack.c.bf16 %v10330_v6, %v10328_v27 }
 0xe9b   : > { %12775 = vmatpush3.bf16.msra.mxu1 %v12774_v24  ;;  %v12821_v24 = vpack.c.bf16 %v8450_v20, %v8448_v60  ;;  %v10332_v60 = vld [vmem:[%s16198_s16 + $0x140] sm:$0xff]  ;;  %v10334_v20 = vld [vmem:[%s16198_s16 + $0x150] sm:$0xff] }
 0xe9c   : > { %12799 = vmatpush3.bf16.msra.mxu0 %v12798_v32  ;;  %12776 = vmatprep.subr.bf16.mxu1 %v13190_v21  ;;  %v10315_v32 = vld [vmem:[%s16198_s16 + $0xf8] sm:$0xff] }
 0xe9d   : > { %12800 = vmatprep.subr.bf16.mxu0 %v13190_v21  ;;  %v12837_v38 = vpack.c.bf16 %v10315_v32, %v10313_v15  ;;  %v10353_v32 = vld [vmem:[%s16198_s16 + $0x1c0] sm:$0xff] }
 0xe9f   : > { %12778 = vmatpush3.bf16.msra.mxu1 %v12777_v23  ;;  %v10312_v23 = vld [vmem:[%s16198_s16 + $0xe0] sm:$0xff] }
 0xea0   : > { %12802 = vmatpush3.bf16.msra.mxu0 %v12801_v28  ;;  %12779 = vmatprep.subr.bf16.mxu1 %v13190_v21  ;;  %v10314_v28 = vld [vmem:[%s16198_s16 + $0xf0] sm:$0xff] }
 0xea1   : > { %12803 = vmatprep.subr.bf16.mxu0 %v13190_v21  ;;  %v12839_v30 = vpack.c.bf16 %v10314_v28, %v10312_v23  ;;  %v10360_v23 = vld [vmem:[%s16198_s16 + $0x1f8] sm:$0xff]  ;;  %v12851_v28 = vpack.c.bf16 %v10334_v20, %v10332_v60  ;;  %v9158_v20 = vld [vmem:[%s16199_s17 + $0xa0] sm:$0xff] }
 0xea2   : > { %v9141_v60 = vld [vmem:[%s16199_s17 + $0x18] sm:$0xff] }
 0xea3   : > { %12781 = vmatpush3.bf16.msra.mxu1 %v12780_v40 }
 0xea4   : > { %12805 = vmatpush3.bf16.msra.mxu0 %v12804_v26  ;;  %12782 = vmatprep.subr.bf16.mxu1 %v13190_v21 }
 0xea5   : > { %12806 = vmatprep.subr.bf16.mxu0 %v13190_v21  ;;  %v10301_v21 = vld [vmem:[%s16198_s16 + $0x88] sm:$0xff] }
 0xea6   : > { %v12825_v51 = vpack.c.bf16 %v10303_v3, %v10301_v21  ;;  %v10325_v21 = vld [vmem:[%s16198_s16 + $0x108] sm:$0xff] }
 0xea7   : > { %12784 = vmatpush3.bf16.msra.mxu1 %v12783_v41  ;;  %v10298_v41 = vld [vmem:[%s16196_s14] ss:$0 sm:$0xff]  ;;  %v10346_v3 = vld [vmem:[%s16198_s16 + $0x188] sm:$0xff] }
 0xea8   : > { %12808 = vmatpush3.bf16.msra.mxu0 %v12807_v47  ;;  %12810 = vmatprep.subr.bf16.mxu1 %v12809_v12  ;;  %v10327_v12 = vld [vmem:[%s16198_s16 + $0x118] sm:$0xff]  ;;  %v12857_v14 = vpack.c.bf16 %v10348_v7, %v10346_v3  ;;  %v10369_v3 = vld [vmem:[%s16199_s17 + $0x110] sm:$0xff] }
 0xea9   : > { %12826 = vmatprep.subr.bf16.mxu0 %v12825_v51  ;;  %v10326_v51 = vld [vmem:[%s16198_s16 + $0x110] sm:$0xff]  ;;  %v12841_v37 = vpack.c.bf16 %v10327_v12, %v10325_v21  ;;  %v10386_v21 = vld [vmem:[%s16199_s17 + $0x198] sm:$0xff] }
 0xeaa   : > { %12308 = vmatmul.mubr.f32.vlgmr.msra.gmra.mrb[192].mxu1 %v13179_v48  ;;  %v12843_v10 = vpack.c.bf16 %v10326_v51, %v10324_v17  ;;  %v10370_v7 = vld [vmem:[%s16199_s17 + $0x118] sm:$0xff]  ;;  %v10387_v51 = vld [vmem:[%s16199_s17 + $0x1a0] sm:$0xff] }
 0xeab   : > { %12343 = vmatmul.mubr.f32.vlgmr.msra.gmra.mrb[116].mxu0 %v13180_v59  ;;  %8518 = vmatprep.mubr.f32.mxu1 %v13192_v13  ;;  %v12879_v17 = vpack.c.bf16 %v10370_v7, %v10369_v3  ;;  %v9165_v7 = vld [vmem:[%s16199_s17 + $0xd8] sm:$0xff] }
 0xeac   : > { %8607 = vmatprep.mubr.f32.mxu0 %v13192_v13  ;;  %12812 = vmatpush1.bf16.msra.mxu1 %v12811_v16  ;;  %v10345_v16 = vld [vmem:[%s16198_s16 + $0x180] sm:$0xff] }
 0xead   : > { %12828 = vmatpush1.bf16.msra.mxu0 %v12827_v2  ;;  %12814 = vmatprep.subr.bf16.mxu1 %v12813_v34  ;;  %v10350_v34 = vld [vmem:[%s16198_s16 + $0x1a8] sm:$0xff] }
 0xeae   : > { %12830 = vmatprep.subr.bf16.mxu0 %v12829_v25  ;;  %v10352_v25 = vld [vmem:[%s16198_s16 + $0x1b8] sm:$0xff] }
 0xeb0   : > { %12816 = vmatpush1.bf16.msra.mxu1 %v12815_v56  ;;  %v8525_v56 = vld [vmem:[%s16197_s15] sm:$0xf] }
 0xeb1   : > { %12832 = vmatpush1.bf16.msra.mxu0 %v12831_v22  ;;  %12818 = vmatprep.subr.bf16.mxu1 %v12817_v46  ;;  %v12859_v22 = vpack.c.bf16 %v10347_v58, %v10345_v16  ;;  %v12861_v46 = vpack.c.bf16 %v10352_v25, %v10350_v34  ;;  %v10388_v16 = vld [vmem:[%s16199_s17 + $0x1a8] sm:$0xff]  ;;  %v10373_v34 = vld [vmem:[%s16199_s17 + $0x130] sm:$0xff]  ;;  %v10374_v25 = vld [vmem:[%s16199_s17 + $0x138] sm:$0xff] }
 0xeb2   : > { %12834 = vmatprep.subr.bf16.mxu0 %v12833_v1  ;;  %v10335_v1 = vld [vmem:[%s16198_s16 + $0x158] sm:$0xff]  ;;  %v12881_v58 = vpack.c.bf16 %v10388_v16, %v10387_v51 }
 0xeb3   : > { %v12849_v15 = vpack.c.bf16 %v10335_v1, %v10333_v54  ;;  %v9139_v54 = vld [vmem:[%s16199_s17 + $0x8] sm:$0xff]  ;;  %v9156_v1 = vld [vmem:[%s16199_s17 + $0x90] sm:$0xff]  ;;  %v10378_v51 = vld [vmem:[%s16199_s17 + $0x158] sm:$0xff] }
 0xeb4   : > { %12820 = vmatpush1.bf16.msra.mxu1 %v12819_v18  ;;  %v10354_v18 = vld [vmem:[%s16198_s16 + $0x1c8] sm:$0xff] }
 0xeb5   : > { %12836 = vmatpush1.bf16.msra.mxu0 %v12835_v29  ;;  %12822 = vmatprep.subr.bf16.mxu1 %v12821_v24  ;;  %v12863_v29 = vpack.c.bf16 %v10351_v33, %v10349_v39  ;;  %v12865_v24 = vpack.c.bf16 %v10356_v53, %v10354_v18  ;;  %v9138_v33 = vld [vmem:[%s16199_s17] sm:$0xff]  ;;  %v9157_v18 = vld [vmem:[%s16199_s17 + $0x98] sm:$0xff] }
 0xeb6   : > { %12838 = vmatprep.subr.bf16.mxu0 %v12837_v38  ;;  %v10339_v38 = vld [vmem:[%s16198_s16 + $0x178] sm:$0xff]  ;;  %v12907_v53 = vpack.c.bf16 %v9139_v54, %v9138_v33  ;;  %v9168_v33 = vld [vmem:[%s16199_s17 + $0xf0] sm:$0xff] }
 0xeb8   : > { %12824 = vmatpush1.bf16.msra.mxu1 %v12823_v44  ;;  %v10358_v44 = vld [vmem:[%s16198_s16 + $0x1e8] sm:$0xff] }
 0xeb9   : > { %12840 = vmatpush1.bf16.msra.mxu0 %v12839_v30  ;;  %v12867_v30 = vpack.c.bf16 %v10355_v42, %v10353_v32  ;;  %v9142_v42 = vld [vmem:[%s16199_s17 + $0x20] sm:$0xff] }
 0xf5d   : > { %v8136_v62 = vpop.f32.mrb[190].mxu1 }
 0xf5e   : > { %v8217_v43 = vpop.f32.mrb[114].mxu0  ;;  %v12239_v57 = vpop.f32.mrb[191].mxu1 }
 0xf5f   : > { %v8218_v40 = vadd.f32 %v8217_v43, %v8136_v62  ;;  %v12274_v26 = vpop.f32.mrb[115].mxu0  ;;  %v10336_v62 = vld [vmem:[%s16198_s16 + $0x160] sm:$0xff]  ;;  %v12853_v43 = vpack.c.bf16 %v10339_v38, %v10337_v55  ;;  %v12869_v57 = vpack.c.bf16 %v10360_v23, %v10358_v44  ;;  %v9143_v55 = vld [vmem:[%s16199_s17 + $0x28] sm:$0xff]  ;;  %v9160_v38 = vld [vmem:[%s16199_s17 + $0xb0] sm:$0xff] }
 0xf60   : > { %v10357_v26 = vld [vmem:[%s16198_s16 + $0x1e0] sm:$0xff]  ;;  %v9161_v44 = vld [vmem:[%s16199_s17 + $0xb8] sm:$0xff]  ;;  %v12915_v23 = vpack.c.bf16 %v9143_v55, %v9142_v42  ;;  %v10448_v55 = vld [vmem:[%s16199_s17 + $0x388] sm:$0xff] }
 0xf7d   : > { %v8318_v49 = vpop.f32.mrb[192].mxu1 }
 0xf7e   : > { %v8322_v45 = vadd.f32 %v8318_v49, %v8218_v40  ;;  %v8419_v8 = vpop.f32.mrb[116].mxu0  ;;  %v12309_v36 = vpop.f32.mrb[193].mxu1  ;;  %v10338_v40 = vld [vmem:[%s16198_s16 + $0x170] sm:$0xff] }
 0xf7f   : > { %v12344_v47 = vpop.f32.mrb[117].mxu0  ;;  %v10359_v49 = vld [vmem:[%s16198_s16 + $0x1f0] sm:$0xff]  ;;  %v10383_v36 = vld [vmem:[%s16199_s17 + $0x180] sm:$0xff] }
 0xf80   : > { %v8423_v48 = vadd.f32 %v8419_v8, %v8322_v45  ;;  %v12855_v45 = vpack.c.bf16 %v10338_v40, %v10336_v62  ;;  %v12871_v8 = vpack.c.bf16 %v10359_v49, %v10357_v26  ;;  %v9145_v62 = vld [vmem:[%s16199_s17 + $0x38] sm:$0xff]  ;;  %v10392_v40 = vld [vmem:[%s16199_s17 + $0x1c8] sm:$0xff]  ;;  %v9162_v26 = vld [vmem:[%s16199_s17 + $0xc0] sm:$0xff] }
 0xf82   : > { %v8431_v59 = vadd.f32 %v10298_v41, %v8423_v48  ;;  %v10384_v41 = vld [vmem:[%s16199_s17 + $0x188] sm:$0xff]  ;;  %v10367_v48 = vld [vmem:[%s16199_s17 + $0x100] sm:$0xff] }
 0xf83   : > { %v12873_v47 = vpack.c.bf16 %v10384_v41, %v10383_v36  ;;  %v10376_v36 = vld [vmem:[%s16199_s17 + $0x148] sm:$0xff] }
 0xf84   : > { %vm8432_vm5 = vcmp.ge.f32.partialorder %v8431_v59, 0.0  ;;  %v8433_v0 = vmul.f32 0.2, %v8431_v59 }
 0xf86   : > { %v15632_v5 = vsel %vm8432_vm5, %v8431_v59, %v8433_v0  ;;  %v10368_v59 = vld [vmem:[%s16199_s17 + $0x108] sm:$0xff] }
 0xf87   : > { %10299 = vmatmul.mubr.msk.f32.vlgmr.msra.gmra.mrb[194].mxu1 %vm5813_vm15, %v15632_v5  ;;  %10316 = vmatmul.mubr.msk.f32.vlgmr.msra.gmra.mrb[118].mxu0 %vm5813_vm15, %v15632_v5  ;;  %v12875_v0 = vpack.c.bf16 %v10368_v59, %v10367_v48  ;;  %v9146_v48 = vld [vmem:[%s16199_s17 + $0x40] sm:$0xff]  ;;  %v9147_v59 = vld [vmem:[%s16199_s17 + $0x48] sm:$0xff] }
 0xf88   : > { %8691 = vmatprep.mubr.f32.mxu0 %v13192_v13  ;;  %8771 = vmatprep.mubr.f32.mxu1 %v13192_v13 }
0x105a   : > { %v8520_v50 = vpop.f32.mrb[194].mxu1  ;;  %v8609_v2 = vpop.f32.mrb[118].mxu0 }
0x105b   : > { %v8522_v52 = vpop.f32.mrb[195].mxu1  ;;  %v8611_v9 = vpop.f32.mrb[119].mxu0 }
0x105c   : > { %10318 = vmatprep.subr.msk.mxu0 %vm8620_vm3, %v8611_v9  ;;  %10321 = vmatprep.subr.msk.mxu1 %vm8620_vm3, %v8522_v52  ;;  %v12887_v52 = vpack.c.bf16 %v10374_v25, %v10373_v34  ;;  %v9167_v25 = vld [vmem:[%s16199_s17 + $0xe8] sm:$0xff] }
0x105d   : > { %10319 = vmatpush1.msk.msra.mxu0 %vm8620_vm3, %v8609_v2  ;;  %10322 = vmatpush1.msk.msra.mxu1 %vm8620_vm3, %v8520_v50  ;;  %v10372_v50 = vld [vmem:[%s16199_s17 + $0x128] sm:$0xff] }
0x105e   : > { %12842 = vmatprep.subr.bf16.mxu1 %v12841_v37  ;;  %12858 = vmatprep.subr.bf16.mxu0 %v12857_v14  ;;  %v12883_v2 = vpack.c.bf16 %v10372_v50, %v10371_v63  ;;  %v10389_v37 = vld [vmem:[%s16199_s17 + $0x1b0] sm:$0xff]  ;;  %v10390_v14 = vld [vmem:[%s16199_s17 + $0x1b8] sm:$0xff] }
0x105f   : > { %10320 = vmatmul.mubr.msk.f32.vlgmr.msra.gmra.mrb[120].mxu0 %vm8616_vm6, %v10317_v35  ;;  %10323 = vmatmul.mubr.msk.f32.vlgmr.msra.gmra.mrb[196].mxu1 %vm8616_vm6, %v8525_v56  ;;  %v12885_v4 = vpack.c.bf16 %v10390_v14, %v10389_v37  ;;  %v9154_v56 = vld [vmem:[%s16199_s17 + $0x80] sm:$0xff]  ;;  %v9148_v63 = vld [vmem:[%s16199_s17 + $0x50] sm:$0xff]  ;;  %v9149_v50 = vld [vmem:[%s16199_s17 + $0x58] sm:$0xff] }
0x1060   : > { %12844 = vmatpush1.bf16.msra.mxu1 %v12843_v10  ;;  %12860 = vmatpush1.bf16.msra.mxu0 %v12859_v22  ;;  %v9155_v10 = vld [vmem:[%s16199_s17 + $0x88] sm:$0xff]  ;;  %v10395_v37 = vld [vmem:[%s16199_s17 + $0x1e0] sm:$0xff] }
0x1061   : > { %12846 = vmatprep.subr.bf16.mxu1 %v12845_v11  ;;  %12862 = vmatprep.subr.bf16.mxu0 %v12861_v46  ;;  %v10341_v46 = vld [vmem:[%s16197_s15 + $0x8] sm:$0xf]  ;;  %v12905_v39 = vpack.c.bf16 %v9155_v10, %v9154_v56 }
0x1062   : > { %8859 = vmatprep.mubr.f32.mxu1 %v13192_v13  ;;  %9031 = vmatprep.mubr.f32.mxu0 %v13192_v13  ;;  %v10396_v14 = vld [vmem:[%s16199_s17 + $0x1e8] sm:$0xff] }
0x1063   : > { %v12897_v34 = vpack.c.bf16 %v10396_v14, %v10395_v37  ;;  %v10380_v56 = vld [vmem:[%s16199_s17 + $0x168] sm:$0xff] }
0x1064   : > { %12848 = vmatpush1.bf16.msra.mxu1 %v12847_v19  ;;  %12864 = vmatpush1.bf16.msra.mxu0 %v12863_v29  ;;  %v12909_v19 = vpack.c.bf16 %v9157_v18, %v9156_v1  ;;  %v9140_v29 = vld [vmem:[%s16199_s17 + $0x10] sm:$0xff]  ;;  %v9169_v1 = vld [vmem:[%s16199_s17 + $0xf8] sm:$0xff]  ;;  %v10452_v37 = vld [vmem:[%s16199_s17 + $0x3a8] sm:$0xff] }
0x1065   : > { %12850 = vmatprep.subr.bf16.mxu1 %v12849_v15  ;;  %12866 = vmatprep.subr.bf16.mxu0 %v12865_v24  ;;  %v9159_v15 = vld [vmem:[%s16199_s17 + $0xa8] sm:$0xff]  ;;  %v12911_v24 = vpack.c.bf16 %v9141_v60, %v9140_v29  ;;  %v10381_v18 = vld [vmem:[%s16199_s17 + $0x170] sm:$0xff]  ;;  %v9153_v60 = vld [vmem:[%s16199_s17 + $0x78] sm:$0xff] }
0x1066   : > { %v12913_v32 = vpack.c.bf16 %v9159_v15, %v9158_v20  ;;  %v9152_v29 = vld [vmem:[%s16199_s17 + $0x70] sm:$0xff]  ;;  %v10415_v15 = vld [vmem:[%s16199_s17 + $0x280] sm:$0xff] }
0x1067   : > { %v12935_v20 = vpack.c.bf16 %v9153_v60, %v9152_v29 }
0x1068   : > { %12852 = vmatpush1.bf16.msra.mxu1 %v12851_v28  ;;  %12868 = vmatpush1.bf16.msra.mxu0 %v12867_v30  ;;  %v12917_v28 = vpack.c.bf16 %v9161_v44, %v9160_v38  ;;  %v9144_v30 = vld [vmem:[%s16199_s17 + $0x30] sm:$0xff] }
0x1069   : > { %12854 = vmatprep.subr.bf16.mxu1 %v12853_v43  ;;  %12870 = vmatprep.subr.bf16.mxu0 %v12869_v57  ;;  %v12919_v43 = vpack.c.bf16 %v9145_v62, %v9144_v30  ;;  %v10391_v57 = vld [vmem:[%s16199_s17 + $0x1c0] sm:$0xff] }
0x106a   : > { %v12889_v49 = vpack.c.bf16 %v10392_v40, %v10391_v57  ;;  %v10399_v40 = vld [vmem:[%s16199_s17 + $0x200] sm:$0xff] }
0x106c   : > { %12856 = vmatpush1.bf16.msra.mxu1 %v12855_v45  ;;  %12872 = vmatpush1.bf16.msra.mxu0 %v12871_v8  ;;  %v9163_v45 = vld [vmem:[%s16199_s17 + $0xc8] sm:$0xff]  ;;  %v10375_v8 = vld [vmem:[%s16199_s17 + $0x140] sm:$0xff] }
0x106d   : > { %12874 = vmatprep.subr.bf16.mxu0 %v12873_v47  ;;  %v12921_v41 = vpack.c.bf16 %v9163_v45, %v9162_v26  ;;  %v12891_v47 = vpack.c.bf16 %v10376_v36, %v10375_v8  ;;  %v15983_v26 = vsub.s32 0, %v14562_v31  ;;  %v10417_v45 = vld [vmem:[%s16199_s17 + $0x290] sm:$0xff]  ;;  %v10450_v36 = vld [vmem:[%s16199_s17 + $0x398] sm:$0xff] }
0x106e   : > { %v10449_v8 = vld [vmem:[%s16199_s17 + $0x390] sm:$0xff] }
0x106f   : > { %10340 = vmatmul.mubr.msk.f32.vlgmr.msra.gmra.mrb[198].mxu1 %vm5813_vm15, %v15632_v5  ;;  %10361 = vmatmul.mubr.msk.f32.vlgmr.msra.gmra.mrb[122].mxu0 %vm5813_vm15, %v15632_v5  ;;  %v10385_v5 = vld [vmem:[%s16199_s17 + $0x190] sm:$0xff] }
0x1070   : > { %8941 = vmatprep.mubr.f32.mxu1 %v13192_v13  ;;  %12876 = vmatpush3.bf16.msra.mxu0 %v12875_v0  ;;  %v12877_v12 = vpack.c.bf16 %v10386_v21, %v10385_v5  ;;  %v12923_v0 = vpack.c.bf16 %v9147_v59, %v9146_v48  ;;  %v10393_v5 = vld [vmem:[%s16199_s17 + $0x1d0] sm:$0xff]  ;;  %v10394_v21 = vld [vmem:[%s16199_s17 + $0x1d8] sm:$0xff] }
0x1071   : > { %v12893_v3 = vpack.c.bf16 %v10394_v21, %v10393_v5 }
0x1072   : > { %12878 = vmatprep.subr.bf16.mxu0 %v12877_v12  ;;  %v9164_v12 = vld [vmem:[%s16199_s17 + $0xd0] sm:$0xff] }
0x1073   : > { %v12925_v16 = vpack.c.bf16 %v9165_v7, %v9164_v12  ;;  %v10402_v7 = vld [vmem:[%s16199_s17 + $0x218] sm:$0xff] }
0x1074   : > { %12880 = vmatpush3.bf16.msra.mxu0 %v12879_v17  ;;  %v10377_v17 = vld [vmem:[%s16199_s17 + $0x150] sm:$0xff] }
0x1075   : > { %12882 = vmatprep.subr.bf16.mxu0 %v12881_v58  ;;  %v12895_v58 = vpack.c.bf16 %v10378_v51, %v10377_v17  ;;  %v12973_v51 = vpack.c.bf16 %v10450_v36, %v10449_v8  ;;  %v10410_v8 = vld [vmem:[%s16199_s17 + $0x258] sm:$0xff] }
0x1078   : > { %12884 = vmatpush3.bf16.msra.mxu0 %v12883_v2  ;;  %v12927_v2 = vpack.c.bf16 %v9149_v50, %v9148_v63  ;;  %v10419_v63 = vld [vmem:[%s16199_s17 + $0x2a0] sm:$0xff]  ;;  %v10420_v50 = vld [vmem:[%s16199_s17 + $0x2a8] sm:$0xff] }
0x1079   : > { %12886 = vmatprep.subr.bf16.mxu0 %v12885_v4  ;;  %v9166_v4 = vld [vmem:[%s16199_s17 + $0xe0] sm:$0xff] }
0x107a   : > { %v12929_v10 = vpack.c.bf16 %v9167_v25, %v9166_v4 }
0x107c   : > { %12888 = vmatpush3.bf16.msra.mxu0 %v12887_v52  ;;  %v10379_v52 = vld [vmem:[%s16199_s17 + $0x160] sm:$0xff] }
0x107d   : > { %12890 = vmatprep.subr.bf16.mxu0 %v12889_v49  ;;  %v9212_v49 = vsub.s32 1, %v14562_v31  ;;  %v10418_v31 = vld [vmem:[%s16199_s17 + $0x298] sm:$0xff] }
0x107e   : > { %v12941_v17 = vpack.c.bf16 %v10418_v31, %v10417_v45  ;;  %v10409_v31 = vld [vmem:[%s16199_s17 + $0x250] sm:$0xff] }
0x1080   : > { %12892 = vmatpush3.bf16.msra.mxu0 %v12891_v47 }
0x1081   : > { %12894 = vmatprep.subr.bf16.mxu0 %v12893_v3  ;;  %v10401_v3 = vld [vmem:[%s16199_s17 + $0x210] sm:$0xff] }
0x1082   : > { %v12943_v25 = vpack.c.bf16 %v10402_v7, %v10401_v3  ;;  %v10411_v7 = vld [vmem:[%s16199_s17 + $0x260] sm:$0xff] }
0x1084   : > { %12896 = vmatpush3.bf16.msra.mxu0 %v12895_v58  ;;  %v10434_v58 = vld [vmem:[%s16199_s17 + $0x318] sm:$0xff] }
0x1085   : > { %12898 = vmatprep.subr.bf16.mxu0 %v12897_v34 }
0x1132   : > { %v15803_v9 = vpop.f32.mrb[120].mxu0 }
0x1133   : > { %v15805_v35 = vpop.f32.mrb[121].mxu0 }
0x1142   : > { %v8861_v22 = vpop.f32.mrb[198].mxu1  ;;  %v9033_v27 = vpop.f32.mrb[122].mxu0 }
0x1143   : > { %v8863_v6 = vpop.f32.mrb[199].mxu1  ;;  %v9035_v11 = vpop.f32.mrb[123].mxu0 }
0x1144   : > { %10342 = vmatprep.subr.msk.mxu1 %vm8620_vm3, %v8863_v6  ;;  %v9151_v6 = vld [vmem:[%s16199_s17 + $0x68] sm:$0xff] }
0x1145   : > { %10343 = vmatpush1.msk.msra.mxu1 %vm8620_vm3, %v8861_v22  ;;  %v12899_v22 = vpack.c.bf16 %v10380_v56, %v10379_v52  ;;  %v10403_v56 = vld [vmem:[%s16199_s17 + $0x220] sm:$0xff] }
0x1146   : > { %10344 = vmatmul.mubr.msk.f32.vlgmr.msra.gmra.mrb[196].mxu1 %vm8616_vm6, %v10341_v46  ;;  %10363 = vmatprep.subr.msk.mxu1 %vm8620_vm3, %v9035_v11  ;;  %v10397_v46 = vld [vmem:[%s16199_s17 + $0x1f0] sm:$0xff] }
0x1147   : > { %10364 = vmatpush1.msk.msra.mxu1 %vm8620_vm3, %v9033_v27  ;;  %9113 = vmatprep.mubr.f32.mxu1 %v13192_v13  ;;  %v10362_v13 = vld [vmem:[%s16197_s15 + $0xc] sm:$0xf]  ;;  %v9150_v27 = vld [vmem:[%s16199_s17 + $0x60] sm:$0xff] }
0x1148   : > { %12906 = vmatprep.subr.bf16.mxu1 %v12905_v39  ;;  %v12931_v11 = vpack.c.bf16 %v9151_v6, %v9150_v27  ;;  %12900 = vmatpush3.bf16.msra.mxu0 %v12899_v22  ;;  %v10398_v39 = vld [vmem:[%s16199_s17 + $0x1f8] sm:$0xff]  ;;  %v12945_v27 = vpack.c.bf16 %v10420_v50, %v10419_v63  ;;  %v10444_v63 = vld [vmem:[%s16199_s17 + $0x368] sm:$0xff]  ;;  %v10429_v50 = vld [vmem:[%s16199_s17 + $0x2f0] sm:$0xff] }
0x1149   : > { %v12901_v54 = vpack.c.bf16 %v10398_v39, %v10397_v46  ;;  %v10436_v46 = vld [vmem:[%s16199_s17 + $0x328] sm:$0xff]  ;;  %v10421_v39 = vld [vmem:[%s16199_s17 + $0x2b0] sm:$0xff] }
0x114b   : > { %12902 = vmatprep.subr.bf16.mxu0 %v12901_v54  ;;  %v10453_v54 = vld [vmem:[%s16199_s17 + $0x3b0] sm:$0xff] }
0x114e   : > { %10365 = vmatmul.mubr.msk.f32.vlgmr.msra.gmra.mrb[196].mxu1 %vm8616_vm6, %v10362_v13  ;;  %v10382_v13 = vld [vmem:[%s16199_s17 + $0x178] sm:$0xff] }
0x114f   : > { %12908 = vmatpush3.bf16.msra.mxu1 %v12907_v53  ;;  %v12933_v53 = vpack.c.bf16 %v9169_v1, %v9168_v33  ;;  %v10422_v33 = vld [vmem:[%s16199_s17 + $0x2b8] sm:$0xff] }
0x1150   : > { %12910 = vmatprep.subr.bf16.mxu1 %v12909_v19  ;;  %v12903_v19 = vpack.c.bf16 %v10382_v13, %v10381_v18  ;;  %v10454_v1 = vld [vmem:[%s16199_s17 + $0x3b8] sm:$0xff]  ;;  %v12949_v29 = vpack.c.bf16 %v10422_v33, %v10421_v39 }
0x1151   : > { %v12981_v60 = vpack.c.bf16 %v10454_v1, %v10453_v54 }
0x1152   : > { %12904 = vmatpush3.bf16.msra.mxu0 %v12903_v19  ;;  %v10406_v19 = vld [vmem:[%s16199_s17 + $0x238] sm:$0xff] }
0x1153   : > { %12912 = vmatpush3.bf16.msra.mxu1 %v12911_v24  ;;  %v10416_v24 = vld [vmem:[%s16199_s17 + $0x288] sm:$0xff] }
0x1154   : > { %12914 = vmatprep.subr.bf16.mxu1 %v12913_v32  ;;  %v10447_v32 = vld [vmem:[%s16199_s17 + $0x380] sm:$0xff]  ;;  %v12937_v42 = vpack.c.bf16 %v10416_v24, %v10415_v15  ;;  %v10438_v15 = vld [vmem:[%s16199_s17 + $0x338] sm:$0xff] }
0x1155   : > { %v12969_v38 = vpack.c.bf16 %v10448_v55, %v10447_v32  ;;  %v10423_v24 = vld [vmem:[%s16199_s17 + $0x2c0] sm:$0xff]  ;;  %v10424_v32 = vld [vmem:[%s16199_s17 + $0x2c8] sm:$0xff] }
0x1156   : > { %12938 = vmatprep.subr.bf16.mxu0 %v12937_v42  ;;  %v10455_v42 = vld [vmem:[%s16199_s17 + $0x3c0] sm:$0xff]  ;;  %v10456_v55 = vld [vmem:[%s16199_s17 + $0x3c8] sm:$0xff] }
0x1157   : > { %12916 = vmatpush3.bf16.msra.mxu1 %v12915_v23 }
0x1158   : > { %12918 = vmatprep.subr.bf16.mxu1 %v12917_v28 }
0x115b   : > { %12920 = vmatpush3.bf16.msra.mxu1 %v12919_v43 }
0x115c   : > { %12922 = vmatprep.subr.bf16.mxu1 %v12921_v41 }
0x115f   : > { %12924 = vmatpush3.bf16.msra.mxu1 %v12923_v0 }
0x1160   : > { %12926 = vmatprep.subr.bf16.mxu1 %v12925_v16  ;;  %v10433_v16 = vld [vmem:[%s16199_s17 + $0x310] sm:$0xff] }
0x1161   : > { %v12975_v52 = vpack.c.bf16 %v10434_v58, %v10433_v16  ;;  %v10443_v58 = vld [vmem:[%s16199_s17 + $0x360] sm:$0xff] }
0x1163   : > { %12928 = vmatpush3.bf16.msra.mxu1 %v12927_v2  ;;  %v10451_v2 = vld [vmem:[%s16199_s17 + $0x3a0] sm:$0xff] }
0x1164   : > { %12930 = vmatprep.subr.bf16.mxu1 %v12929_v10  ;;  %v10404_v10 = vld [vmem:[%s16199_s17 + $0x228] sm:$0xff]  ;;  %v12977_v6 = vpack.c.bf16 %v10452_v37, %v10451_v2  ;;  %v10430_v2 = vld [vmem:[%s16199_s17 + $0x2f8] sm:$0xff]  ;;  %v10461_v37 = vld [vmem:[%s16199_s17 + $0x3f0] sm:$0xff] }
0x1165   : > { %v12947_v18 = vpack.c.bf16 %v10404_v10, %v10403_v56  ;;  %v10413_v56 = vld [vmem:[%s16199_s17 + $0x270] sm:$0xff]  ;;  %v12965_v10 = vpack.c.bf16 %v10430_v2, %v10429_v50 }
0x1167   : > { %12932 = vmatpush3.bf16.msra.mxu1 %v12931_v11  ;;  %v10435_v11 = vld [vmem:[%s16199_s17 + $0x320] sm:$0xff] }
0x1168   : > { %12934 = vmatprep.subr.bf16.mxu1 %v12933_v53  ;;  %v12979_v13 = vpack.c.bf16 %v10436_v46, %v10435_v11  ;;  %v10405_v53 = vld [vmem:[%s16199_s17 + $0x230] sm:$0xff]  ;;  %v10446_v11 = vld [vmem:[%s16199_s17 + $0x378] sm:$0xff] }
0x116b   : > { %12936 = vmatpush3.bf16.msra.mxu1 %v12935_v20  ;;  %v10437_v20 = vld [vmem:[%s16199_s17 + $0x330] sm:$0xff] }
0x116c   : > { %12970 = vmatprep.subr.bf16.mxu1 %v12969_v38  ;;  %v12951_v38 = vpack.c.bf16 %v10406_v19, %v10405_v53 }
0x1221   : > { %v9115_v44 = vpop.f32.mrb[196].mxu1 }
0x1222   : > { %v13001_v23 = vadd.f32 %v9115_v44, %v15803_v9  ;;  %v9117_v28 = vpop.f32.mrb[197].mxu1  ;;  %v10400_v9 = vld [vmem:[%s16199_s17 + $0x208] sm:$0xff]  ;;  %v12983_v44 = vpack.c.bf16 %v10438_v15, %v10437_v20 }
0x1223   : > { %v13002_v30 = vadd.f32 %v9117_v28, %v15805_v35  ;;  %v10432_v35 = vld [vmem:[%s16199_s17 + $0x308] sm:$0xff]  ;;  %v12939_v48 = vpack.c.bf16 %v10400_v9, %v10399_v40  ;;  %v10425_v40 = vld [vmem:[%s16199_s17 + $0x2d0] sm:$0xff] }
0x1224   : > { %v10408_v28 = vld [vmem:[%s16199_s17 + $0x248] sm:$0xff]  ;;  %v10457_v9 = vld [vmem:[%s16199_s17 + $0x3d0] sm:$0xff] }
0x1225   : > { %v9124_v62 = vcombine.low %v13001_v23, %v13002_v30  ;;  %v10407_v23 = vld [vmem:[%s16199_s17 + $0x240] sm:$0xff]  ;;  %v12953_v30 = vpack.c.bf16 %v10424_v32, %v10423_v24 }
0x1227   : > { %v9131_v43 = vrot.slane %v9124_v62, %v15418_v61  ;;  %10366 = vst.sshfl [vmem:[#allocation5] sm:$0x33 pattern:$0x76325410] %v9124_v62  ;;  %v10431_v61 = vld [vmem:[%s16199_s17 + $0x300] sm:$0xff]  ;;  %v12985_v62 = vpack.c.bf16 %v10456_v55, %v10455_v42 }
0x1228   : > { %v12971_v59 = vpack.c.bf16 %v10432_v35, %v10431_v61  ;;  %v10458_v61 = vld [vmem:[%s16199_s17 + $0x3d8] sm:$0xff]  ;;  %v12955_v35 = vpack.c.bf16 %v10408_v28, %v10407_v23 }
0x1229   : > { %v9132_v57 = vcombine.high %v9131_v43, %v9131_v43  ;;  %v10439_v43 = vld [vmem:[%s16199_s17 + $0x340] sm:$0xff] }
0x122b   : > { %9136 = vst [vmem:[#allocation5 + $0x4] sm:$0xf] %v9132_v57  ;;  %v10440_v57 = vld [vmem:[%s16199_s17 + $0x348] sm:$0xff] }
0x122c   : > { %v12987_v45 = vpack.c.bf16 %v10440_v57, %v10439_v43 }
0x122e   : > { %v9171_v41 = vld [vmem:[#allocation5 + $0x1] ss:$2 sm:$0x3]  ;;  %v9137_v47 = vld [vmem:[#allocation5] ss:$2 sm:$0x3] }
0x122f   : > { %v9209_v0 = vrot.slane %v9171_v41, %v15983_v26  ;;  %v9213_v5 = vrot.slane %v9171_v41, %v9212_v49  ;;  %v9290_v21 = vrot.slane %v9137_v47, %v15983_v26  ;;  %v9294_v12 = vrot.slane %v9137_v47, %v9212_v49  ;;  %v10441_v47 = vld [vmem:[%s16199_s17 + $0x350] sm:$0xff] }
0x1230   : > { %v12989_v41 = vpack.c.bf16 %v10458_v61, %v10457_v9 }
0x1231   : > { %9280 = vmatprep.mubr.f32.mxu0 %v9213_v5  ;;  %9361 = vmatprep.mubr.f32.mxu1 %v9294_v12  ;;  %v10459_v5 = vld [vmem:[%s16199_s17 + $0x3e0] sm:$0xff]  ;;  %v12959_v12 = vpack.c.bf16 %v10410_v8, %v10409_v31 }
0x1232   : > { %9281 = vmatmul.mubr.f32.vlgmr.msra.gmra.mrb[124].mxu0 %v9209_v0  ;;  %9362 = vmatmul.mubr.f32.vlgmr.msra.gmra.mrb[200].mxu1 %v9290_v21  ;;  %v16033_v14 = vld [vmem:[#allocation5 + $0x4] ss:$2 sm:$0x3]  ;;  %v16035_v4 = vld [vmem:[#allocation5 + $0x5] ss:$2 sm:$0x3] }
0x1233   : > { %12940 = vmatpush3.bf16.msra.mxu0 %v12939_v48  ;;  %12972 = vmatpush3.bf16.msra.mxu1 %v12971_v59  ;;  %v9410_v34 = vrot.slane %v16033_v14, %v9212_v49  ;;  %v9527_v22 = vrot.slane %v16035_v4, %v9212_v49  ;;  %v10426_v49 = vld [vmem:[%s16199_s17 + $0x2d8] sm:$0xff]  ;;  %v10427_v59 = vld [vmem:[%s16199_s17 + $0x2e0] sm:$0xff]  ;;  %v10428_v0 = vld [vmem:[%s16199_s17 + $0x2e8] sm:$0xff]  ;;  %v9406_v33 = vrot.slane %v16033_v14, %v15983_v26 }
0x1234   : > { %12942 = vmatprep.subr.bf16.mxu0 %v12941_v17  ;;  %12974 = vmatprep.subr.bf16.mxu1 %v12973_v51  ;;  %v12957_v36 = vpack.c.bf16 %v10426_v49, %v10425_v40  ;;  %v10442_v48 = vld [vmem:[%s16199_s17 + $0x358] sm:$0xff]  ;;  %v10460_v21 = vld [vmem:[%s16199_s17 + $0x3e8] sm:$0xff]  ;;  %v12961_v51 = vpack.c.bf16 %v10428_v0, %v10427_v59  ;;  %v9523_v54 = vrot.slane %v16035_v4, %v15983_v26 }
0x1235   : > { %9477 = vmatprep.mubr.f32.mxu0 %v9410_v34  ;;  %9594 = vmatprep.mubr.f32.mxu1 %v9527_v22  ;;  %v12991_v3 = vpack.c.bf16 %v10442_v48, %v10441_v47  ;;  %v10412_v17 = vld [vmem:[%s16199_s17 + $0x268] sm:$0xff]  ;;  %v12993_v16 = vpack.c.bf16 %v10460_v21, %v10459_v5  ;;  %v10462_v34 = vld [vmem:[%s16199_s17 + $0x3f8] sm:$0xff] }
0x1236   : > { %v12997_v22 = vpack.c.bf16 %v10462_v34, %v10461_v37 }
0x1237   : > { %12944 = vmatpush3.bf16.msra.mxu0 %v12943_v25  ;;  %12976 = vmatpush3.bf16.msra.mxu1 %v12975_v52  ;;  %v12963_v25 = vpack.c.bf16 %v10412_v17, %v10411_v7  ;;  %v12995_v52 = vpack.c.bf16 %v10444_v63, %v10443_v58 }
0x1238   : > { %12946 = vmatprep.subr.bf16.mxu0 %v12945_v27  ;;  %12978 = vmatprep.subr.bf16.mxu1 %v12977_v6  ;;  %v10414_v27 = vld [vmem:[%s16199_s17 + $0x278] sm:$0xff]  ;;  %v10445_v6 = vld [vmem:[%s16199_s17 + $0x370] sm:$0xff] }
0x1239   : > { %v12967_v46 = vpack.c.bf16 %v10414_v27, %v10413_v56  ;;  %v12999_v39 = vpack.c.bf16 %v10446_v11, %v10445_v6 }
0x123b   : > { %12948 = vmatpush3.bf16.msra.mxu0 %v12947_v18  ;;  %12980 = vmatpush3.bf16.msra.mxu1 %v12979_v13 }
0x123c   : > { %12950 = vmatprep.subr.bf16.mxu0 %v12949_v29  ;;  %12982 = vmatprep.subr.bf16.mxu1 %v12981_v60 }
0x123f   : > { %12952 = vmatpush3.bf16.msra.mxu0 %v12951_v38  ;;  %12984 = vmatpush3.bf16.msra.mxu1 %v12983_v44  ;;  %v9601_v38 = vld [vmem:[#allocation6] sm:$0x1] }
0x1240   : > { %12954 = vmatprep.subr.bf16.mxu0 %v12953_v30  ;;  %12986 = vmatprep.subr.bf16.mxu1 %v12985_v62 }
0x1243   : > { %12956 = vmatpush3.bf16.msra.mxu0 %v12955_v35  ;;  %12988 = vmatpush3.bf16.msra.mxu1 %v12987_v45 }
0x1244   : > { %12958 = vmatprep.subr.bf16.mxu0 %v12957_v36  ;;  %12990 = vmatprep.subr.bf16.mxu1 %v12989_v41 }
0x1247   : > { %12960 = vmatpush3.bf16.msra.mxu0 %v12959_v12  ;;  %12992 = vmatpush3.bf16.msra.mxu1 %v12991_v3 }
0x1248   : > { %12962 = vmatprep.subr.bf16.mxu0 %v12961_v51  ;;  %12994 = vmatprep.subr.bf16.mxu1 %v12993_v16 }
0x124b   : > { %12964 = vmatpush3.bf16.msra.mxu0 %v12963_v25  ;;  %12996 = vmatpush3.bf16.msra.mxu1 %v12995_v52 }
0x124c   : > { %12966 = vmatprep.subr.bf16.mxu0 %v12965_v10  ;;  %12998 = vmatprep.subr.bf16.mxu1 %v12997_v22 }
0x124f   : > { %12968 = vmatpush3.bf16.msra.mxu0 %v12967_v46  ;;  %13000 = vmatpush3.bf16.msra.mxu1 %v12999_v39 }
0x1252   : > { %9478 = vmatmul.mubr.f32.vlgmr.msra.gmra.mrb[126].mxu0 %v9406_v33  ;;  %9595 = vmatmul.mubr.f32.vlgmr.msra.gmra.mrb[202].mxu1 %v9523_v54 }
0x1305   : > { %v11309_v1 = vpop.f32.mrb[124].mxu0  ;;  %v11344_v18 = vpop.f32.mrb[200].mxu1 }
0x1306   : > { %v11310_v13 = vpop.f32.mrb[125].mxu0  ;;  %v11345_v53 = vpop.f32.mrb[201].mxu1 }
0x1307   : > { %v11311_v19 = vadd.f32 %v11310_v13, %v11309_v1  ;;  %v11346_v29 = vadd.f32 %v11345_v53, %v11344_v18 }
0x1309   : > { %v9364_v60 = vadd.f32 %v11346_v29, %v11311_v19 }
0x1325   : > { %v11379_v20 = vpop.f32.mrb[126].mxu0  ;;  %v11414_v15 = vpop.f32.mrb[202].mxu1 }
0x1326   : > { %v11380_v24 = vpop.f32.mrb[127].mxu0  ;;  %v11415_v32 = vpop.f32.mrb[203].mxu1 }
0x1327   : > { %v11381_v42 = vadd.f32 %v11380_v24, %v11379_v20  ;;  %v11416_v55 = vadd.f32 %v11415_v32, %v11414_v15 }
0x1329   : > { %v9483_v14 = vadd.f32 %v11381_v42, %v9364_v60 }
0x132b   : > { %v9600_v44 = vadd.f32 %v11416_v55, %v9483_v14 }
0x132d   : > { %v9602_v26 = vadd.f32 %v9601_v38, %v9600_v44 }
0x132f   : > { %9604 = vst.msk [vmem:[%s600_s18] sm:$0x1] %vm9603_vm7, %v9602_v26 }
0x1330 PF: > { %s31_s20 = sadd.s32 1, %s13187_s20  }
0x1331   : > { %p28_p4 = scmp.ge.s32.totalorder %s31_s20, 4  }
0x1333   :  { %30 = sbr.rel (!%p28_p4) target bundleno = 5 (0x5), region = 172 }

</bundles_post_ra>
